<compile_context>
chip_gen: v7x
topology: tpu7x:2x2x1
jax: 0.10.0
libtpu: 0.0.40
codegen_flags: <defaults>
</compile_context>

<pallas_src>
import functools

import jax
import jax.numpy as jnp
from jax.experimental import pallas as pl
from jax.experimental.pallas import tpu as pltpu


# ---------------------------------------------------------------------------
# generation-dependent tiling / VMEM configuration
# ---------------------------------------------------------------------------
def _round_up(a: int, b: int) -> int:
    return (a + b - 1) // b * b


def _physical_vmem_bytes() -> int:
    """Trace-time query of per-core VMEM; conservative 64 MiB fallback."""
    try:
        info = pltpu.get_tpu_info()
        for attr in ("vmem_capacity_bytes", "vmem_bytes", "vmem_size_bytes"):
            v = getattr(info, attr, None)
            if v:
                return int(v)
    except Exception:
        pass
    return 64 * 1024 * 1024            # v7x-sized (most restrictive) fallback


@functools.lru_cache(maxsize=None)
def _chip_config():
    phys = _physical_vmem_bytes()
    if phys >= 96 * 1024 * 1024:       # v5e / v6e: 128 MiB physical VMEM
        return {"vmem_limit": 100 * 1024 * 1024,
                "tile_t_max": 256, "tile_i_max": 1024}
    # v7x: 64 MiB per TensorCore
    return {"vmem_limit": 48 * 1024 * 1024,
            "tile_t_max": 256, "tile_i_max": 1024}


def _pick_tile_i(intermediate: int, target: int) -> int:
    """Largest multiple-of-128 divisor of `intermediate` <= target (falls back
    to the full dimension, which is always a legal block)."""
    target = max(128, (target // 128) * 128)
    if intermediate <= target:
        return intermediate
    t = min(target, (intermediate // 128) * 128)
    while t >= 128:
        if intermediate % t == 0:
            return t
        t -= 128
    return intermediate


def _tile_t_pref(T: int, t_max: int):
    """Token-tile candidates (descending), preferring >= 2 tiles (megacore)."""
    cap = min(t_max, max(32, _round_up(max(T, 1), 32)))
    cands = [c for c in (256, 128, 64, 32) if c <= cap] or [32]
    multi = [c for c in cands if _round_up(max(T, 1), c) // c >= 2]
    rest = [c for c in cands if c not in multi]
    return (multi + rest) if multi else cands


def _grouped_tile_t_pref(n_rows: int, num_experts: int, t_max: int):
    """Per-expert padding tile: scale with average rows-per-expert so the
    E*(tile_t-1) worst-case phantom rows stay small at decode batch sizes."""
    avg = max(1, -(-n_rows // max(1, num_experts)))
    cap = min(t_max, max(32, _round_up(avg, 32)))
    return [c for c in (256, 128, 64, 32) if c <= cap] or [32]


def _choose_tiles(H, I, in_bytes, out_bytes, tile_t_pref, cfg):
    """Largest (tile_t, tile_i) whose double-buffered working set fits VMEM."""
    budget = int(cfg["vmem_limit"] * 0.85)
    i_targets = sorted({cfg["tile_i_max"], 512, 256, 128}, reverse=True)
    for tt in tile_t_pref:
        for tgt in i_targets:
            ti = _pick_tile_i(I, tgt)
            est = (2 * tt * H * (in_bytes + out_bytes)   # x + out (dbl-buf)
                   + 6 * H * ti * in_bytes               # wg/wu/wd (dbl-buf)
                   + tt * H * 4                          # fp32 accumulator
                   + 2 * tt * 4)                         # per-row weights
            if est <= budget:
                return tt, ti
    return tile_t_pref[-1], _pick_tile_i(I, 128)


# ---------------------------------------------------------------------------
# shared-experts MLP kernel (Ernie4_5_MoeMLP): silu(x@Wg) * (x@Wu) @ Wd
# ---------------------------------------------------------------------------
def _mlp_kernel(x_ref, wg_ref, wu_ref, wd_ref, o_ref, acc_ref):
    k = pl.program_id(1)

    @pl.when(k == 0)
    def _init():
        acc_ref[...] = jnp.zeros_like(acc_ref)

    x = x_ref[...]
    gate = jnp.dot(x, wg_ref[...], preferred_element_type=jnp.float32)
    up = jnp.dot(x, wu_ref[...], preferred_element_type=jnp.float32)
    act = (gate * jax.lax.logistic(gate)) * up            # SiluAndMul (fp32)
    # intentional: down-proj runs at the weight dtype (bf16 MXU path) with
    # fp32 accumulation in acc_ref
    acc_ref[...] += jnp.dot(act.astype(wd_ref.dtype), wd_ref[...],
                            preferred_element_type=jnp.float32)

    @pl.when(k == pl.num_programs(1) - 1)
    def _flush():
        o_ref[...] = acc_ref[...].astype(o_ref.dtype)


def ernie45_mlp(x, w_gate, w_up, w_down, *, tile_t=None, tile_i=None):
    """Ernie4_5_MoeMLP forward: [T, H] -> [T, H].  w_gate / w_up are the two
    column halves of MergedColumnParallelLinear's gate_up weight."""
    T, H = x.shape
    I = w_gate.shape[1]
    assert w_up.shape == (H, I) and w_down.shape == (I, H)

    cfg = _chip_config()
    in_b = jnp.dtype(x.dtype).itemsize
    tt_auto, ti_auto = _choose_tiles(H, I, in_b, in_b,
                                     _tile_t_pref(T, cfg["tile_t_max"]), cfg)
    tile_t = tile_t or tt_auto
    tile_i = tile_i or ti_auto

    Tp = _round_up(max(T, 1), tile_t)
    xp = x if Tp == T else jnp.pad(x, ((0, Tp - T), (0, 0)))
    n_t, n_k = Tp // tile_t, I // tile_i

    cost = pl.CostEstimate(
        flops=int(6 * Tp * H * I),
        transcendentals=int(Tp * I),
        # the full weight set is streamed once per token tile
        bytes_accessed=int(2 * Tp * H * in_b + n_t * 3 * H * I * in_b),
    )

    out = pl.pallas_call(
        _mlp_kernel,
        out_shape=jax.ShapeDtypeStruct((Tp, H), x.dtype),
        grid_spec=pltpu.PrefetchScalarGridSpec(
            num_scalar_prefetch=0,
            grid=(n_t, n_k),
            in_specs=[
                pl.BlockSpec((tile_t, H), lambda i, k: (i, 0)),   # x token tile
                pl.BlockSpec((H, tile_i), lambda i, k: (0, k)),   # W_gate chunk
                pl.BlockSpec((H, tile_i), lambda i, k: (0, k)),   # W_up chunk
                pl.BlockSpec((tile_i, H), lambda i, k: (k, 0)),   # W_down chunk
            ],
            out_specs=pl.BlockSpec((tile_t, H), lambda i, k: (i, 0)),
            scratch_shapes=[pltpu.VMEM((tile_t, H), jnp.float32)],
        ),
        compiler_params=pltpu.CompilerParams(
            dimension_semantics=("parallel", "arbitrary"),
            vmem_limit_bytes=cfg["vmem_limit"],
        ),
        cost_estimate=cost,
    )(xp, w_gate, w_up, w_down)
    return out[:T]


# ---------------------------------------------------------------------------
# router (ReplicatedLinear, no bias) -- kept in XLA: E << 128 lanes would make
# a Pallas kernel emit lane-masked partial stores, and the matmul is tiny.
# ---------------------------------------------------------------------------
def ernie45_router_logits(x, w_router):
    return jnp.dot(x, w_router, preferred_element_type=jnp.float32)


# ---------------------------------------------------------------------------
# grouped / ragged routed-expert kernel (FusedMoE experts)
# ---------------------------------------------------------------------------
def _grouped_expert_kernel(nvalid_ref, eid_ref, x_ref, wg_ref, wu_ref, wd_ref,
                           w_ref, o_ref, acc_ref):
    del eid_ref            # consumed by the weight index_maps (scalar prefetch)
    i = pl.program_id(0)
    k = pl.program_id(1)

    @pl.when(k == 0)
    def _init():
        acc_ref[...] = jnp.zeros_like(acc_ref)

    # skip the MXU work on the all-padding tail tiles (static worst-case grid)
    @pl.when(i < nvalid_ref[0])
    def _compute():
        x = x_ref[...]
        gate = jnp.dot(x, wg_ref[...], preferred_element_type=jnp.float32)
        up = jnp.dot(x, wu_ref[...], preferred_element_type=jnp.float32)
        act = (gate * jax.lax.logistic(gate)) * up
        acc_ref[...] += jnp.dot(act.astype(wd_ref.dtype), wd_ref[...],
                                preferred_element_type=jnp.float32)

    @pl.when(k == pl.num_programs(1) - 1)
    def _flush():
        # fold the per-row routing weight in at flush time; padded / skipped
        # rows end up as zeros (weight == 0, acc initialized to zeros)
        o_ref[...] = (acc_ref[...] * w_ref[...]).astype(o_ref.dtype)


def _route_and_group(topk_idx, topk_w, num_experts, tile_t):
    """Sort (token, expert) pairs by expert and pad every expert group up to a
    whole token tile so one grouped kernel covers all experts."""
    T, K = topk_idx.shape
    n_rows = T * K
    flat_e = topk_idx.reshape(-1).astype(jnp.int32)
    flat_t = jnp.repeat(jnp.arange(T, dtype=jnp.int32), K)
    flat_w = topk_w.reshape(-1).astype(jnp.float32)

    order = jnp.argsort(flat_e)
    se, st, sw = flat_e[order], flat_t[order], flat_w[order]

    counts = jnp.zeros((num_experts,), jnp.int32).at[flat_e].add(1)
    padded = ((counts + tile_t - 1) // tile_t) * tile_t
    grp_start = jnp.concatenate(
        [jnp.zeros((1,), jnp.int32), jnp.cumsum(counts)[:-1]])
    pad_start = jnp.concatenate(
        [jnp.zeros((1,), jnp.int32), jnp.cumsum(padded)[:-1]])

    rank = jnp.arange(n_rows, dtype=jnp.int32) - grp_start[se]
    dest = pad_start[se] + rank                    # padded row of each pair

    rows = _round_up(n_rows + num_experts * (tile_t - 1), tile_t)   # static
    n_tiles = rows // tile_t

    row_token = jnp.full((rows,), T, jnp.int32).at[dest].set(st)
    row_weight = jnp.zeros((rows,), jnp.float32).at[dest].set(sw).reshape(rows, 1)

    # inverse map: original (token, k) pair -> its padded output row, so the
    # combine can be a gather + dense K-way sum instead of a scatter-add
    pair_dest = jnp.zeros((n_rows,), jnp.int32).at[order].set(dest)

    pad_end = jnp.cumsum(padded)
    tile_start = jnp.arange(n_tiles, dtype=jnp.int32) * tile_t
    tile_expert = jnp.searchsorted(pad_end, tile_start, side="right")
    tile_expert = jnp.minimum(tile_expert, num_experts - 1).astype(jnp.int32)

    # every tile below this index contains at least one real row
    n_valid = (jnp.sum(padded) // tile_t).astype(jnp.int32).reshape(1)
    return row_token, row_weight, tile_expert, n_valid, pair_dest, rows, n_tiles


def ernie45_grouped_experts(x, w_gate_all, w_up_all, w_down_all,
                            topk_idx, topk_w, *, tile_t=None, tile_i=None):
    """Routed experts: one pipelined pallas_call over expert-sorted tokens."""
    T, H = x.shape
    E, _, I = w_gate_all.shape
    K = topk_idx.shape[1]

    cfg = _chip_config()
    in_b = jnp.dtype(x.dtype).itemsize
    tt_auto, ti_auto = _choose_tiles(
        H, I, in_b, in_b, _grouped_tile_t_pref(T * K, E, cfg["tile_t_max"]), cfg)
    tile_t = tile_t or tt_auto
    tile_i = tile_i or ti_auto
    n_k = I // tile_i

    (row_token, row_weight, tile_expert, n_valid, pair_dest,
     rows, n_tiles) = _route_and_group(topk_idx, topk_w, E, tile_t)

    # gather tokens into expert-sorted (padded) order; row T is a zero pad row
    # TODO(synk): for large T, replace this materialized gather with an
    # in-kernel DMA gather driven by a scalar-prefetched row_token table.
    x_pad = jnp.concatenate([x, jnp.zeros((1, H), x.dtype)], axis=0)
    x_rows = jnp.take(x_pad, row_token, axis=0)

    # expert-stacked weights flattened to 2-D so plain 2-D BlockSpecs apply
    wg2 = w_gate_all.reshape(E * H, I)
    wu2 = w_up_all.reshape(E * H, I)
    wd2 = w_down_all.reshape(E * I, H)

    cost = pl.CostEstimate(
        flops=int(6 * rows * H * I),
        transcendentals=int(rows * I),
        # weights are re-streamed once per token tile (not once per expert)
        bytes_accessed=int(n_tiles * 3 * H * I * in_b
                           + 2 * rows * H * in_b + rows * 4),
    )

    out_rows = pl.pallas_call(
        _grouped_expert_kernel,
        out_shape=jax.ShapeDtypeStruct((rows, H), x.dtype),
        grid_spec=pltpu.PrefetchScalarGridSpec(
            num_scalar_prefetch=2,      # n_valid tiles + per-tile expert table
            grid=(n_tiles, n_k),
            in_specs=[
                pl.BlockSpec((tile_t, H), lambda i, k, nv, eid: (i, 0)),
                pl.BlockSpec((H, tile_i), lambda i, k, nv, eid: (eid[i], k)),
                pl.BlockSpec((H, tile_i), lambda i, k, nv, eid: (eid[i], k)),
                pl.BlockSpec((tile_i, H),
                             lambda i, k, nv, eid: (eid[i] * n_k + k, 0)),
                pl.BlockSpec((tile_t, 1), lambda i, k, nv, eid: (i, 0)),
            ],
            out_specs=pl.BlockSpec((tile_t, H), lambda i, k, nv, eid: (i, 0)),
            scratch_shapes=[pltpu.VMEM((tile_t, H), jnp.float32)],
        ),
        compiler_params=pltpu.CompilerParams(
            dimension_semantics=("parallel", "arbitrary"),
            vmem_limit_bytes=cfg["vmem_limit"],
        ),
        cost_estimate=cost,
    )(n_valid, tile_expert, x_rows, wg2, wu2, wd2, row_weight)

    # combine top-k expert outputs: inverse-permutation gather + dense K-way
    # sum in fp32 (no duplicate-index scatter-add)
    gathered = jnp.take(out_rows, pair_dest, axis=0).astype(jnp.float32)
    return gathered.reshape(T, K, H).sum(axis=1)


# ---------------------------------------------------------------------------
# full Ernie4_5_MoeMoE forward
# ---------------------------------------------------------------------------
def ernie45_moe_moe(hidden_states, params, *, top_k):
    """Forward pass of Ernie4_5_MoeMoE (single device, tp_size == 1)."""
    orig_shape = hidden_states.shape
    H = orig_shape[-1]
    x = hidden_states.reshape(-1, H)

    # shared experts (Ernie4_5_MoeMLP)
    shared = None
    if params.get("shared_w_gate") is not None:
        shared = ernie45_mlp(x, params["shared_w_gate"], params["shared_w_up"],
                             params["shared_w_down"])

    # router (ReplicatedLinear, no bias)
    logits = ernie45_router_logits(x, params["router_w"])

    # top-k routing (FusedMoE, renormalize=True, e_score_correction_bias)
    # TODO(synk): top-k select + sort-by-expert bookkeeping stays in plain JAX
    # (no Pallas top-k / sort primitive); tp_size>1 all-reduce not modeled.
    probs = jax.nn.softmax(logits, axis=-1)
    sel = probs + params["e_score_correction_bias"].astype(jnp.float32)[None, :]
    _, topk_idx = jax.lax.top_k(sel, top_k)
    topk_w = jnp.take_along_axis(probs, topk_idx, axis=1)
    topk_w = topk_w / jnp.sum(topk_w, axis=-1, keepdims=True)

    # routed experts (grouped/ragged)
    routed = ernie45_grouped_experts(
        x, params["w_gate_all"], params["w_up_all"], params["w_down_all"],
        topk_idx, topk_w)

    # final add in fp32, single cast back to the activation dtype
    out = routed if shared is None else routed + shared.astype(jnp.float32)
    return out.astype(x.dtype).reshape(orig_shape)


# ---------------------------------------------------------------------------
# pure-JAX reference
# ---------------------------------------------------------------------------
def _reference_moe(hidden_states, params, top_k, router_logits=None):
    H = hidden_states.shape[-1]
    x = hidden_states.reshape(-1, H).astype(jnp.float32)
    hp = jax.lax.Precision.HIGHEST

    def mlp(xx, wg, wu, wd):
        g = jnp.dot(xx, wg.astype(jnp.float32), precision=hp)
        u = jnp.dot(xx, wu.astype(jnp.float32), precision=hp)
        return jnp.dot(jax.nn.silu(g) * u, wd.astype(jnp.float32), precision=hp)

    shared = mlp(x, params["shared_w_gate"], params["shared_w_up"],
                 params["shared_w_down"])

    if router_logits is None:
        router_logits = jnp.dot(x, params["router_w"].astype(jnp.float32),
                                precision=hp)
    probs = jax.nn.softmax(router_logits.astype(jnp.float32), axis=-1)
    sel = probs + params["e_score_correction_bias"].astype(jnp.float32)[None, :]
    _, topk_idx = jax.lax.top_k(sel, top_k)
    w = jnp.take_along_axis(probs, topk_idx, axis=1)
    w = w / jnp.sum(w, axis=-1, keepdims=True)

    T, E = probs.shape
    dense_w = jnp.zeros((T, E), jnp.float32).at[
        jnp.arange(T)[:, None], topk_idx].add(w)
    routed = jnp.zeros_like(x)
    for e in range(E):
        routed = routed + dense_w[:, e:e + 1] * mlp(
            x, params["w_gate_all"][e], params["w_up_all"][e],
            params["w_down_all"][e])
    return (routed + shared).reshape(hidden_states.shape)


# ---------------------------------------------------------------------------
# test
# ---------------------------------------------------------------------------
if __name__ == "__main__":
    # small config consistent with Ernie4_5_MoeMoE (single device, tp=1)
    hidden_size = 64
    moe_intermediate_size = 256
    moe_num_experts = 8
    moe_k = 2
    moe_num_shared_experts = 2
    shared_intermediate = moe_intermediate_size * moe_num_shared_experts  # 512
    batch, seq = 2, 80          # 160 tokens -> exercises token-tile padding

    key = jax.random.PRNGKey(0)
    ks = jax.random.split(key, 9)
    w = 0.05
    hidden_states = jax.random.normal(
        ks[0], (batch, seq, hidden_size), jnp.float32)
    params = {
        "router_w": jax.random.normal(
            ks[1], (hidden_size, moe_num_experts), jnp.float32) * 0.3,
        "e_score_correction_bias": jax.random.normal(
            ks[2], (moe_num_experts,), jnp.float32) * 0.1,
        "w_gate_all": jax.random.normal(
            ks[3], (moe_num_experts, hidden_size, moe_intermediate_size),
            jnp.float32) * w,
        "w_up_all": jax.random.normal(
            ks[4], (moe_num_experts, hidden_size, moe_intermediate_size),
            jnp.float32) * w,
        "w_down_all": jax.random.normal(
            ks[5], (moe_num_experts, moe_intermediate_size, hidden_size),
            jnp.float32) * w,
        "shared_w_gate": jax.random.normal(
            ks[6], (hidden_size, shared_intermediate), jnp.float32) * w,
        "shared_w_up": jax.random.normal(
            ks[7], (hidden_size, shared_intermediate), jnp.float32) * w,
        "shared_w_down": jax.random.normal(
            ks[8], (shared_intermediate, hidden_size), jnp.float32) * w,
    }

    fwd = jax.jit(functools.partial(ernie45_moe_moe, top_k=moe_k))
    out = jax.block_until_ready(fwd(hidden_states, params))
    assert out.shape == hidden_states.shape
    assert bool(jnp.all(jnp.isfinite(out)))

    # full forward vs reference.  The reference reuses the same router logits
    # so top-k tie-breaking is identical (matmul rounding can flip near-tied
    # expert selections; that is a test artifact, not a kernel bug).
    x2d = hidden_states.reshape(-1, hidden_size)
    logits_k = ernie45_router_logits(x2d, params["router_w"])
    ref = _reference_moe(hidden_states, params, moe_k, router_logits=logits_k)
    max_err = float(jnp.max(jnp.abs(out - ref)))
    assert jnp.allclose(out, ref, atol=1e-2, rtol=5e-2), \
        f"moe mismatch, max abs err={max_err}"

    # standalone shared-MLP kernel check
    shared_k = ernie45_mlp(x2d, params["shared_w_gate"], params["shared_w_up"],
                           params["shared_w_down"])
    hpp = jax.lax.Precision.HIGHEST
    g = jnp.dot(x2d, params["shared_w_gate"], precision=hpp)
    u = jnp.dot(x2d, params["shared_w_up"], precision=hpp)
    shared_ref = jnp.dot(jax.nn.silu(g) * u, params["shared_w_down"],
                         precision=hpp)
    assert jnp.allclose(shared_k, shared_ref, atol=1e-2, rtol=5e-2), \
        "shared MLP mismatch"

    # bf16 weights/activations path (production config): smoke run
    to_bf16 = lambda a: a.astype(jnp.bfloat16)
    params_bf16 = {k: (v if k == "e_score_correction_bias" else to_bf16(v))
                   for k, v in params.items()}
    fwd_bf16 = jax.jit(functools.partial(ernie45_moe_moe, top_k=moe_k))
    out_bf16 = jax.block_until_ready(
        fwd_bf16(to_bf16(hidden_states), params_bf16))
    assert out_bf16.shape == hidden_states.shape
    assert bool(jnp.all(jnp.isfinite(out_bf16.astype(jnp.float32))))

    print("KERNEL_OK")
</pallas_src>

<mosaic_0001>
module attributes {stable_mosaic.version = 11 : i64} {
  func.func private @main(%arg0: i32) attributes {dimension_semantics = [#tpu.dimension_semantics<core_parallel>], iteration_bounds = array<i64: 2>, tpu.core_type = #tpu.core_type<sc_scalar_subcore>, window_params = []} {
    return
  }
}

module attributes {stable_mosaic.version = 11 : i64} {
  func.func private @main(%arg0: i32) attributes {dimension_semantics = [#tpu.dimension_semantics<core_parallel>], iteration_bounds = array<i64: 2>, tpu.core_type = #tpu.core_type<sc_scalar_subcore>, window_params = []} {
    return
  }
}

module attributes {stable_mosaic.version = 11 : i64} {
  func.func @_mlp_kernel(%arg0: i32, %arg1: i32, %arg2: memref<128x64xf32, #tpu.memory_space<vmem>>, %arg3: memref<64x512xf32, #tpu.memory_space<vmem>>, %arg4: memref<64x512xf32, #tpu.memory_space<vmem>>, %arg5: memref<512x64xf32, #tpu.memory_space<vmem>>, %arg6: memref<128x64xf32, #tpu.memory_space<vmem>>, %arg7: memref<128x64xf32, #tpu.memory_space<vmem>>) attributes {dimension_semantics = [#tpu.dimension_semantics<parallel>, #tpu.dimension_semantics<arbitrary>], iteration_bounds = array<i64: 2, 1>, scalar_prefetch = 0 : i64, scratch_operands = 1 : i64, tpu.core_type = #tpu.core_type<tc>, window_params = [{transform_indices = @transform_0, window_bounds = array<i64: 128, 64>}, {transform_indices = @transform_1, window_bounds = array<i64: 64, 512>}, {transform_indices = @transform_2, window_bounds = array<i64: 64, 512>}, {transform_indices = @transform_3, window_bounds = array<i64: 512, 64>}, {transform_indices = @transform_4, window_bounds = array<i64: 128, 64>}]} {
    %c0_i32 = arith.constant 0 : i32
    %0 = arith.cmpi eq, %arg1, %c0_i32 : i32
    %1 = arith.extui %0 : i1 to i32
    %c0_i32_0 = arith.constant 0 : i32
    %2 = arith.cmpi ne, %1, %c0_i32_0 : i32
    scf.if %2 {
      %cst_17 = arith.constant 0.000000e+00 : f32
      %23 = vector.broadcast %cst_17 : f32 to vector<128x64xf32>
      %c0_18 = arith.constant 0 : index
      %c0_19 = arith.constant 0 : index
      %24 = vector.load %arg7[%c0_18, %c0_19] : memref<128x64xf32, #tpu.memory_space<vmem>>, vector<128x64xf32>
      tpu.vector_store %arg7[%c0_18, %c0_19], %23 {strides = array<i32>} : memref<128x64xf32, #tpu.memory_space<vmem>>, vector<128x64xf32>,
    } else {
    }
    %c0 = arith.constant 0 : index
    %c0_1 = arith.constant 0 : index
    %3 = vector.load %arg2[%c0, %c0_1] : memref<128x64xf32, #tpu.memory_space<vmem>>, vector<128x64xf32>
    %c0_2 = arith.constant 0 : index
    %c0_3 = arith.constant 0 : index
    %4 = vector.load %arg3[%c0_2, %c0_3] : memref<64x512xf32, #tpu.memory_space<vmem>>, vector<64x512xf32>
    %cst = arith.constant dense<0.000000e+00> : vector<128x512xf32>
    %5 = tpu.matmul %3, %4, %cst {dimension_numbers = #tpu.dot_dimension_numbers<[1], [0], [0], [1], [0, 0, 1, 1], [], []>} : vector<128x64xf32>, vector<64x512xf32>, vector<128x512xf32> -> vector<128x512xf32>
    %c0_4 = arith.constant 0 : index
    %c0_5 = arith.constant 0 : index
    %6 = vector.load %arg4[%c0_4, %c0_5] : memref<64x512xf32, #tpu.memory_space<vmem>>, vector<64x512xf32>
    %cst_6 = arith.constant dense<0.000000e+00> : vector<128x512xf32>
    %7 = tpu.matmul %3, %6, %cst_6 {dimension_numbers = #tpu.dot_dimension_numbers<[1], [0], [0], [1], [0, 0, 1, 1], [], []>} : vector<128x64xf32>, vector<64x512xf32>, vector<128x512xf32> -> vector<128x512xf32>
    %8 = arith.negf %5 : vector<128x512xf32>
    %9 = math.exp %8 : vector<128x512xf32>
    %cst_7 = arith.constant 1.000000e+00 : f32
    %10 = vector.broadcast %cst_7 : f32 to vector<128x512xf32>
    %11 = arith.addf %10, %9 : vector<128x512xf32>
    %12 = arith.divf %10, %11 : vector<128x512xf32>
    %13 = arith.mulf %5, %12 : vector<128x512xf32>
    %14 = arith.mulf %13, %7 : vector<128x512xf32>
    %c0_8 = arith.constant 0 : index
    %c0_9 = arith.constant 0 : index
    %15 = vector.load %arg7[%c0_8, %c0_9] : memref<128x64xf32, #tpu.memory_space<vmem>>, vector<128x64xf32>
    %c0_10 = arith.constant 0 : index
    %c0_11 = arith.constant 0 : index
    %16 = vector.load %arg5[%c0_10, %c0_11] : memref<512x64xf32, #tpu.memory_space<vmem>>, vector<512x64xf32>
    %cst_12 = arith.constant dense<0.000000e+00> : vector<128x64xf32>
    %17 = tpu.matmul %14, %16, %cst_12 {dimension_numbers = #tpu.dot_dimension_numbers<[1], [0], [0], [1], [0, 0, 1, 1], [], []>} : vector<128x512xf32>, vector<512x64xf32>, vector<128x64xf32> -> vector<128x64xf32>
    %18 = arith.addf %15, %17 : vector<128x64xf32>
    %c0_13 = arith.constant 0 : index
    %c0_14 = arith.constant 0 : index
    %19 = vector.load %arg7[%c0_13, %c0_14] : memref<128x64xf32, #tpu.memory_space<vmem>>, vector<128x64xf32>
    tpu.vector_store %arg7[%c0_13, %c0_14], %18 {strides = array<i32>} : memref<128x64xf32, #tpu.memory_space<vmem>>, vector<128x64xf32>,
    %c0_i32_15 = arith.constant 0 : i32
    %20 = arith.cmpi eq, %arg1, %c0_i32_15 : i32
    %21 = arith.extui %20 : i1 to i32
    %c0_i32_16 = arith.constant 0 : i32
    %22 = arith.cmpi ne, %21, %c0_i32_16 : i32
    scf.if %22 {
      %c0_17 = arith.constant 0 : index
      %c0_18 = arith.constant 0 : index
      %23 = vector.load %arg7[%c0_17, %c0_18] : memref<128x64xf32, #tpu.memory_space<vmem>>, vector<128x64xf32>
      %c0_19 = arith.constant 0 : index
      %c0_20 = arith.constant 0 : index
      %24 = vector.load %arg6[%c0_19, %c0_20] : memref<128x64xf32, #tpu.memory_space<vmem>>, vector<128x64xf32>
      tpu.vector_store %arg6[%c0_19, %c0_20], %23 {strides = array<i32>} : memref<128x64xf32, #tpu.memory_space<vmem>>, vector<128x64xf32>,
    } else {
    }
    return
  }
  func.func @transform_0(%arg0: i32, %arg1: i32) -> (i32, i32) {
    %c0_i32 = arith.constant 0 : i32
    %c0_i32_0 = arith.constant 0 : i32
    return %arg0, %c0_i32 : i32, i32
  }
  func.func @transform_1(%arg0: i32, %arg1: i32) -> (i32, i32) {
    %c0_i32 = arith.constant 0 : i32
    %c0_i32_0 = arith.constant 0 : i32
    return %c0_i32, %arg1 : i32, i32
  }
  func.func @transform_2(%arg0: i32, %arg1: i32) -> (i32, i32) {
    %c0_i32 = arith.constant 0 : i32
    %c0_i32_0 = arith.constant 0 : i32
    return %c0_i32, %arg1 : i32, i32
  }
  func.func @transform_3(%arg0: i32, %arg1: i32) -> (i32, i32) {
    %c0_i32 = arith.constant 0 : i32
    %c0_i32_0 = arith.constant 0 : i32
    return %arg1, %c0_i32 : i32, i32
  }
  func.func @transform_4(%arg0: i32, %arg1: i32) -> (i32, i32) {
    %c0_i32 = arith.constant 0 : i32
    %c0_i32_0 = arith.constant 0 : i32
    return %arg0, %c0_i32 : i32, i32
  }
}

module attributes {stable_mosaic.version = 11 : i64} {
  func.func @_grouped_expert_kernel(%arg0: i32, %arg1: i32, %arg2: memref<1xi32, #tpu.memory_space<smem>>, %arg3: memref<13xi32, #tpu.memory_space<smem>>, %arg4: memref<64x64xf32, #tpu.memory_space<vmem>>, %arg5: memref<64x256xf32, #tpu.memory_space<vmem>>, %arg6: memref<64x256xf32, #tpu.memory_space<vmem>>, %arg7: memref<256x64xf32, #tpu.memory_space<vmem>>, %arg8: memref<64x1xf32, #tpu.memory_space<vmem>>, %arg9: memref<64x64xf32, #tpu.memory_space<vmem>>, %arg10: memref<64x64xf32, #tpu.memory_space<vmem>>) attributes {dimension_semantics = [#tpu.dimension_semantics<parallel>, #tpu.dimension_semantics<arbitrary>], iteration_bounds = array<i64: 13, 1>, scalar_prefetch = 2 : i64, scratch_operands = 1 : i64, tpu.core_type = #tpu.core_type<tc>, window_params = [{transform_indices = @transform_0, window_bounds = array<i64: 64, 64>}, {transform_indices = @transform_1, window_bounds = array<i64: 64, 256>}, {transform_indices = @transform_2, window_bounds = array<i64: 64, 256>}, {transform_indices = @transform_3, window_bounds = array<i64: 256, 64>}, {transform_indices = @transform_4, window_bounds = array<i64: 64, 1>}, {transform_indices = @transform_5, window_bounds = array<i64: 64, 64>}]} {
    %c0_i32 = arith.constant 0 : i32
    %0 = arith.cmpi eq, %arg1, %c0_i32 : i32
    %1 = arith.extui %0 : i1 to i32
    %c0_i32_0 = arith.constant 0 : i32
    %2 = arith.cmpi ne, %1, %c0_i32_0 : i32
    scf.if %2 {
      %cst = arith.constant 0.000000e+00 : f32
      %10 = vector.broadcast %cst : f32 to vector<64x64xf32>
      %c0_4 = arith.constant 0 : index
      %c0_5 = arith.constant 0 : index
      %11 = vector.load %arg10[%c0_4, %c0_5] : memref<64x64xf32, #tpu.memory_space<vmem>>, vector<64x64xf32>
      tpu.vector_store %arg10[%c0_4, %c0_5], %10 {strides = array<i32>} : memref<64x64xf32, #tpu.memory_space<vmem>>, vector<64x64xf32>,
    } else {
    }
    %c0 = arith.constant 0 : index
    %3 = memref.load %arg2[%c0] : memref<1xi32, #tpu.memory_space<smem>>
    %4 = arith.cmpi slt, %arg0, %3 : i32
    %5 = arith.extui %4 : i1 to i32
    %c0_i32_1 = arith.constant 0 : i32
    %6 = arith.cmpi ne, %5, %c0_i32_1 : i32
    scf.if %6 {
      %c0_4 = arith.constant 0 : index
      %c0_5 = arith.constant 0 : index
      %10 = vector.load %arg4[%c0_4, %c0_5] : memref<64x64xf32, #tpu.memory_space<vmem>>, vector<64x64xf32>
      %c0_6 = arith.constant 0 : index
      %c0_7 = arith.constant 0 : index
      %11 = vector.load %arg5[%c0_6, %c0_7] : memref<64x256xf32, #tpu.memory_space<vmem>>, vector<64x256xf32>
      %cst = arith.constant dense<0.000000e+00> : vector<64x256xf32>
      %12 = tpu.matmul %10, %11, %cst {dimension_numbers = #tpu.dot_dimension_numbers<[1], [0], [0], [1], [0, 0, 1, 1], [], []>} : vector<64x64xf32>, vector<64x256xf32>, vector<64x256xf32> -> vector<64x256xf32>
      %c0_8 = arith.constant 0 : index
      %c0_9 = arith.constant 0 : index
      %13 = vector.load %arg6[%c0_8, %c0_9] : memref<64x256xf32, #tpu.memory_space<vmem>>, vector<64x256xf32>
      %cst_10 = arith.constant dense<0.000000e+00> : vector<64x256xf32>
      %14 = tpu.matmul %10, %13, %cst_10 {dimension_numbers = #tpu.dot_dimension_numbers<[1], [0], [0], [1], [0, 0, 1, 1], [], []>} : vector<64x64xf32>, vector<64x256xf32>, vector<64x256xf32> -> vector<64x256xf32>
      %15 = arith.negf %12 : vector<64x256xf32>
      %16 = math.exp %15 : vector<64x256xf32>
      %cst_11 = arith.constant 1.000000e+00 : f32
      %17 = vector.broadcast %cst_11 : f32 to vector<64x256xf32>
      %18 = arith.addf %17, %16 : vector<64x256xf32>
      %19 = arith.divf %17, %18 : vector<64x256xf32>
      %20 = arith.mulf %12, %19 : vector<64x256xf32>
      %21 = arith.mulf %20, %14 : vector<64x256xf32>
      %c0_12 = arith.constant 0 : index
      %c0_13 = arith.constant 0 : index
      %22 = vector.load %arg10[%c0_12, %c0_13] : memref<64x64xf32, #tpu.memory_space<vmem>>, vector<64x64xf32>
      %c0_14 = arith.constant 0 : index
      %c0_15 = arith.constant 0 : index
      %23 = vector.load %arg7[%c0_14, %c0_15] : memref<256x64xf32, #tpu.memory_space<vmem>>, vector<256x64xf32>
      %cst_16 = arith.constant dense<0.000000e+00> : vector<64x64xf32>
      %24 = tpu.matmul %21, %23, %cst_16 {dimension_numbers = #tpu.dot_dimension_numbers<[1], [0], [0], [1], [0, 0, 1, 1], [], []>} : vector<64x256xf32>, vector<256x64xf32>, vector<64x64xf32> -> vector<64x64xf32>
      %25 = arith.addf %22, %24 : vector<64x64xf32>
      %c0_17 = arith.constant 0 : index
      %c0_18 = arith.constant 0 : index
      %26 = vector.load %arg10[%c0_17, %c0_18] : memref<64x64xf32, #tpu.memory_space<vmem>>, vector<64x64xf32>
      tpu.vector_store %arg10[%c0_17, %c0_18], %25 {strides = array<i32>} : memref<64x64xf32, #tpu.memory_space<vmem>>, vector<64x64xf32>,
    } else {
    }
    %c0_i32_2 = arith.constant 0 : i32
    %7 = arith.cmpi eq, %arg1, %c0_i32_2 : i32
    %8 = arith.extui %7 : i1 to i32
    %c0_i32_3 = arith.constant 0 : i32
    %9 = arith.cmpi ne, %8, %c0_i32_3 : i32
    scf.if %9 {
      %c0_4 = arith.constant 0 : index
      %c0_5 = arith.constant 0 : index
      %10 = vector.load %arg10[%c0_4, %c0_5] : memref<64x64xf32, #tpu.memory_space<vmem>>, vector<64x64xf32>
      %c0_6 = arith.constant 0 : index
      %c0_7 = arith.constant 0 : index
      %11 = vector.load %arg8[%c0_6, %c0_7] : memref<64x1xf32, #tpu.memory_space<vmem>>, vector<64x1xf32>
      %12 = vector.broadcast %11 : vector<64x1xf32> to vector<64x64xf32>
      %13 = arith.mulf %10, %12 : vector<64x64xf32>
      %c0_8 = arith.constant 0 : index
      %c0_9 = arith.constant 0 : index
      %14 = vector.load %arg9[%c0_8, %c0_9] : memref<64x64xf32, #tpu.memory_space<vmem>>, vector<64x64xf32>
      tpu.vector_store %arg9[%c0_8, %c0_9], %13 {strides = array<i32>} : memref<64x64xf32, #tpu.memory_space<vmem>>, vector<64x64xf32>,
    } else {
    }
    return
  }
  func.func @transform_0(%arg0: i32, %arg1: i32, %arg2: memref<1xi32, #tpu.memory_space<smem>>, %arg3: memref<13xi32, #tpu.memory_space<smem>>) -> (i32, i32) {
    %c0_i32 = arith.constant 0 : i32
    %c0_i32_0 = arith.constant 0 : i32
    return %arg0, %c0_i32 : i32, i32
  }
  func.func @transform_1(%arg0: i32, %arg1: i32, %arg2: memref<1xi32, #tpu.memory_space<smem>>, %arg3: memref<13xi32, #tpu.memory_space<smem>>) -> (i32, i32) {
    %0 = arith.index_cast %arg0 : i32 to index
    %1 = memref.load %arg3[%0] : memref<13xi32, #tpu.memory_space<smem>>
    %c0_i32 = arith.constant 0 : i32
    return %1, %arg1 : i32, i32
  }
  func.func @transform_2(%arg0: i32, %arg1: i32, %arg2: memref<1xi32, #tpu.memory_space<smem>>, %arg3: memref<13xi32, #tpu.memory_space<smem>>) -> (i32, i32) {
    %0 = arith.index_cast %arg0 : i32 to index
    %1 = memref.load %arg3[%0] : memref<13xi32, #tpu.memory_space<smem>>
    %c0_i32 = arith.constant 0 : i32
    return %1, %arg1 : i32, i32
  }
  func.func @transform_3(%arg0: i32, %arg1: i32, %arg2: memref<1xi32, #tpu.memory_space<smem>>, %arg3: memref<13xi32, #tpu.memory_space<smem>>) -> (i32, i32) {
    %0 = arith.index_cast %arg0 : i32 to index
    %1 = memref.load %arg3[%0] : memref<13xi32, #tpu.memory_space<smem>>
    %c1_i32 = arith.constant 1 : i32
    %2 = arith.muli %1, %c1_i32 : i32
    %3 = arith.addi %2, %arg1 : i32
    %c0_i32 = arith.constant 0 : i32
    %c0_i32_0 = arith.constant 0 : i32
    return %3, %c0_i32 : i32, i32
  }
  func.func @transform_4(%arg0: i32, %arg1: i32, %arg2: memref<1xi32, #tpu.memory_space<smem>>, %arg3: memref<13xi32, #tpu.memory_space<smem>>) -> (i32, i32) {
    %c0_i32 = arith.constant 0 : i32
    %c0_i32_0 = arith.constant 0 : i32
    return %arg0, %c0_i32 : i32, i32
  }
  func.func @transform_5(%arg0: i32, %arg1: i32, %arg2: memref<1xi32, #tpu.memory_space<smem>>, %arg3: memref<13xi32, #tpu.memory_space<smem>>) -> (i32, i32) {
    %c0_i32 = arith.constant 0 : i32
    %c0_i32_0 = arith.constant 0 : i32
    return %arg0, %c0_i32 : i32, i32
  }
}

</mosaic_0001>

<bundles_post_ra>
// kernel: custom-call.2
= control target key start
LH: loop header
LB: loop body
LE: loop exit
PB: predicated region body
PF: predicated region fallthrough
CT: control target
= control target key end

     0   :  { %s6_s0 = inlined_call_operand.vmem [shape: u32[13], index: 0, kind: output, shape index: {}]  }

// kernel: ernie45_moe_moe.2
= control target key start
LH: loop header
LB: loop body
LE: loop exit
PB: predicated region body
PF: predicated region fallthrough
CT: control target
= control target key end

     0   :  { %s2893_s15 = smov 0   ;;  %s2895_s16 = smov 0   ;;  %s4039_s0 = inlined_call_operand.vmem [shape: f32[256,64], index: 0, kind: input, shape index: {}]   ;;  %s4040_s1 = inlined_call_operand.vmem [shape: f32[64,512], index: 1, kind: input, shape index: {}]   ;;  %s4041_s2 = inlined_call_operand.vmem [shape: f32[64,512], index: 2, kind: input, shape index: {}]   ;;  %s4042_s3 = inlined_call_operand.vmem [shape: f32[512,64], index: 3, kind: input, shape index: {}]   ;;  %s4043_s4 = inlined_call_operand.vmem [shape: f32[256,64], index: 4, kind: output, shape index: {}]  }
   0x1   :  { %s2897_s17 = smov 0  }
   0x2 LB: > { %s26_s18 = sadd.s32 1, %s2861_s16  ;;  %p2139_p0 = scmp.ge.s32.totalorder %s2865_s17, 1  ;;  %s2865_s17 = sphi %s2897_s17, %s14_s17   ;;  %s2861_s16 = sphi %s2895_s16, %s4166_s16   ;;  %s2857_s15 = sphi %s2893_s15, %s4165_s15  }
   0x3   : > { %p28_p1 = scmp.ge.s32.totalorder %s26_s18, 2  ;;  %p208_p2 = scmp.lt.s32.totalorder %s2865_s17, 3 }
   0x5   : > { %s4168_s18 = smov (%p28_p1, %s26_s18), 0  ;;  %p209_p3 = pnand %p2139_p0, %p208_p2 }
   0x7   : > { %212 = sbr.rel (%p209_p3) target bundleno = 620 (0x26c), region = 36 }
   0xe   : > { %v317_v0 = vld [vmem:[%s4040_s1 + $0x8] sm:$0xff]  ;;  %v319_v2 = vld [vmem:[%s4040_s1 + $0x18] sm:$0xff]  ;;  %s2140_s25 = sshll.u32 %s2857_s15, 4  ;;  %vm283_vm0 = vcmask 523264   ;;  %v316_v5 = vld [vmem:[%s4040_s1] sm:$0xff]  ;;  %v2867_v7 = vmov 0.0  }
   0xf   : > { %v321_v1 = vld [vmem:[%s4040_s1 + $0x28] sm:$0xff]  ;;  %v323_v4 = vld [vmem:[%s4040_s1 + $0x38] sm:$0xff]  ;;  %v320_v6 = vld [vmem:[%s4040_s1 + $0x20] sm:$0xff]  ;;  %461 = vmatprep.mubr.f32.mxu0 %v2867_v7  ;;  %622 = vmatprep.mubr.f32.mxu1 %v2867_v7  ;;  %284 = vst.msk [vmem:[#allocation2] sm:$0xff] %vm283_vm0, %v2867_v7  ;;  %p2977_p4 = scmp.lt.s32.totalorder %s2140_s25, 31 }
  0x10   : > { %v2434_v3 = vpack.c.bf16 %v321_v1, %v317_v0  ;;  %285 = vst.msk [vmem:[#allocation2 + $0x8] sm:$0xff] %vm283_vm0, %v2867_v7  ;;  %286 = vst.msk [vmem:[#allocation2 + $0x10] sm:$0xff] %vm283_vm0, %v2867_v7  ;;  %v2450_v8 = vpack.c.bf16 %v323_v4, %v319_v2  ;;  %v2436_v9 = vpack.c.bf16 %v320_v6, %v316_v5  ;;  %v318_v10 = vld [vmem:[%s4040_s1 + $0x10] sm:$0xff]  ;;  %v325_v12 = vld [vmem:[%s4040_s1 + $0x48] sm:$0xff] }
  0x11   : > { %287 = vst.msk [vmem:[#allocation2 + $0x18] sm:$0xff] %vm283_vm0, %v2867_v7  ;;  %288 = vst.msk [vmem:[#allocation2 + $0x20] sm:$0xff] %vm283_vm0, %v2867_v7  ;;  %v322_v11 = vld [vmem:[%s4040_s1 + $0x30] sm:$0xff]  ;;  %v329_v14 = vld [vmem:[%s4040_s1 + $0x68] sm:$0xff]  ;;  %s4170_s25 = smov (!%p2977_p4, %s2140_s25), 31 }
  0x12   : > { %289 = vst.msk [vmem:[#allocation2 + $0x28] sm:$0xff] %vm283_vm0, %v2867_v7  ;;  %290 = vst.msk [vmem:[#allocation2 + $0x30] sm:$0xff] %vm283_vm0, %v2867_v7  ;;  %2435 = vmatprep.subr.bf16.mxu0 %v2434_v3  ;;  %v2452_v13 = vpack.c.bf16 %v322_v11, %v318_v10  ;;  %v327_v15 = vld [vmem:[%s4040_s1 + $0x58] sm:$0xff]  ;;  %2451 = vmatprep.subr.bf16.mxu1 %v2450_v8  ;;  %v2438_v17 = vpack.c.bf16 %v329_v14, %v325_v12  ;;  %v324_v19 = vld [vmem:[%s4040_s1 + $0x40] sm:$0xff]  ;;  %s2141_s21 = sshll.u32 %s4170_s25, 3 }
  0x13   : > { %291 = vst.msk [vmem:[#allocation2 + $0x38] sm:$0xff] %vm283_vm0, %v2867_v7  ;;  %292 = vst.msk [vmem:[#allocation2 + $0x40] sm:$0xff] %vm283_vm0, %v2867_v7  ;;  %v331_v16 = vld [vmem:[%s4040_s1 + $0x78] sm:$0xff]  ;;  %2437 = vmatpush1.bf16.msra.mxu0 %v2436_v9  ;;  %v328_v20 = vld [vmem:[%s4040_s1 + $0x60] sm:$0xff]  ;;  %s3074_s5 = scalar_lea.vmem %s4039_s0, %s2141_s21  ;;  %s3982_s30 = scalar_lea.vmem %s4043_s4, %s2141_s21 }
  0x14   : > { %293 = vst.msk [vmem:[#allocation2 + $0x48] sm:$0xff] %vm283_vm0, %v2867_v7  ;;  %294 = vst.msk [vmem:[#allocation2 + $0x50] sm:$0xff] %vm283_vm0, %v2867_v7  ;;  %v2454_v18 = vpack.c.bf16 %v331_v16, %v327_v15  ;;  %v326_v21 = vld [vmem:[%s4040_s1 + $0x50] sm:$0xff]  ;;  %2453 = vmatpush1.bf16.msra.mxu1 %v2452_v13  ;;  %v2440_v22 = vpack.c.bf16 %v328_v20, %v324_v19  ;;  %v333_v24 = vld [vmem:[%s4040_s1 + $0x88] sm:$0xff]  ;;  %2439 = vmatprep.subr.bf16.mxu0 %v2438_v17 }
  0x15   : > { %295 = vst.msk [vmem:[#allocation2 + $0x58] sm:$0xff] %vm283_vm0, %v2867_v7  ;;  %296 = vst.msk [vmem:[#allocation2 + $0x60] sm:$0xff] %vm283_vm0, %v2867_v7  ;;  %v330_v23 = vld [vmem:[%s4040_s1 + $0x70] sm:$0xff]  ;;  %v337_v25 = vld [vmem:[%s4040_s1 + $0xa8] sm:$0xff] }
  0x16   : > { %297 = vst.msk [vmem:[#allocation2 + $0x68] sm:$0xff] %vm283_vm0, %v2867_v7  ;;  %298 = vst.msk [vmem:[#allocation2 + $0x70] sm:$0xff] %vm283_vm0, %v2867_v7  ;;  %2455 = vmatprep.subr.bf16.mxu1 %v2454_v18  ;;  %v2456_v26 = vpack.c.bf16 %v330_v23, %v326_v21  ;;  %v2442_v27 = vpack.c.bf16 %v337_v25, %v333_v24  ;;  %v335_v28 = vld [vmem:[%s4040_s1 + $0x98] sm:$0xff]  ;;  %v332_v30 = vld [vmem:[%s4040_s1 + $0x80] sm:$0xff] }
  0x17   : > { %299 = vst.msk [vmem:[#allocation2 + $0x78] sm:$0xff] %vm283_vm0, %v2867_v7  ;;  %v339_v29 = vld [vmem:[%s4040_s1 + $0xb8] sm:$0xff]  ;;  %v336_v32 = vld [vmem:[%s4040_s1 + $0xa0] sm:$0xff]  ;;  %v334_v33 = vld [vmem:[%s4040_s1 + $0x90] sm:$0xff]  ;;  %2441 = vmatpush1.bf16.msra.mxu0 %v2440_v22 }
  0x18   : > { %v2458_v31 = vpack.c.bf16 %v339_v29, %v335_v28  ;;  %v338_v34 = vld [vmem:[%s4040_s1 + $0xb0] sm:$0xff]  ;;  %v2444_v35 = vpack.c.bf16 %v336_v32, %v332_v30  ;;  %v341_v36 = vld [vmem:[%s4040_s1 + $0xc8] sm:$0xff]  ;;  %v343_v38 = vld [vmem:[%s4040_s1 + $0xd8] sm:$0xff]  ;;  %2457 = vmatpush1.bf16.msra.mxu1 %v2456_v26  ;;  %2443 = vmatprep.subr.bf16.mxu0 %v2442_v27 }
  0x19   : > { %v345_v37 = vld [vmem:[%s4040_s1 + $0xe8] sm:$0xff]  ;;  %v2460_v39 = vpack.c.bf16 %v338_v34, %v334_v33  ;;  %v347_v41 = vld [vmem:[%s4040_s1 + $0xf8] sm:$0xff]  ;;  %v340_v42 = vld [vmem:[%s4040_s1 + $0xc0] sm:$0xff] }
  0x1a   : > { %v2446_v40 = vpack.c.bf16 %v345_v37, %v341_v36  ;;  %v344_v43 = vld [vmem:[%s4040_s1 + $0xe0] sm:$0xff]  ;;  %2459 = vmatprep.subr.bf16.mxu1 %v2458_v31  ;;  %v2462_v44 = vpack.c.bf16 %v347_v41, %v343_v38  ;;  %v342_v45 = vld [vmem:[%s4040_s1 + $0xd0] sm:$0xff]  ;;  %v720_v47 = vld [vmem:[%s4041_s2 + $0x8] sm:$0xff] }
  0x1b   : > { %v346_v46 = vld [vmem:[%s4040_s1 + $0xf0] sm:$0xff]  ;;  %v724_v48 = vld [vmem:[%s4041_s2 + $0x28] sm:$0xff]  ;;  %v722_v49 = vld [vmem:[%s4041_s2 + $0x18] sm:$0xff]  ;;  %2445 = vmatpush1.bf16.msra.mxu0 %v2444_v35  ;;  %v2448_v50 = vpack.c.bf16 %v344_v43, %v340_v42 }
  0x1c   : > { %v726_v51 = vld [vmem:[%s4041_s2 + $0x38] sm:$0xff]  ;;  %2461 = vmatpush1.bf16.msra.mxu1 %v2460_v39  ;;  %2447 = vmatprep.subr.bf16.mxu0 %v2446_v40  ;;  %v2464_v52 = vpack.c.bf16 %v346_v46, %v342_v45  ;;  %v2466_v53 = vpack.c.bf16 %v724_v48, %v720_v47  ;;  %v719_v54 = vld [vmem:[%s4041_s2] sm:$0xff]  ;;  %v721_v57 = vld [vmem:[%s4041_s2 + $0x10] sm:$0xff] }
  0x1d   : > { %v723_v55 = vld [vmem:[%s4041_s2 + $0x20] sm:$0xff]  ;;  %2463 = vmatprep.subr.bf16.mxu1 %v2462_v44  ;;  %v2482_v56 = vpack.c.bf16 %v726_v51, %v722_v49  ;;  %v725_v58 = vld [vmem:[%s4041_s2 + $0x30] sm:$0xff]  ;;  %v728_v59 = vld [vmem:[%s4041_s2 + $0x48] sm:$0xff] }
  0x1e   : > { %v732_v60 = vld [vmem:[%s4041_s2 + $0x68] sm:$0xff]  ;;  %v3095_v61 = vld [vmem:[%s3074_s5] sm:$0xff]  ;;  %v2468_v62 = vpack.c.bf16 %v723_v55, %v719_v54  ;;  %v730_v63 = vld [vmem:[%s4041_s2 + $0x58] sm:$0xff]  ;;  %v2484_v1 = vpack.c.bf16 %v725_v58, %v721_v57 }
  0x1f   : > { %2449 = vmatpush1.bf16.msra.mxu0 %v2448_v50  ;;  %v734_v0 = vld [vmem:[%s4041_s2 + $0x78] sm:$0xff]  ;;  %v2470_v2 = vpack.c.bf16 %v732_v60, %v728_v59  ;;  %v727_v3 = vld [vmem:[%s4041_s2 + $0x40] sm:$0xff]  ;;  %v729_v5 = vld [vmem:[%s4041_s2 + $0x50] sm:$0xff] }
  0x20   : > { %2465 = vmatpush1.bf16.msra.mxu1 %v2464_v52  ;;  %2467 = vmatprep.subr.bf16.mxu0 %v2466_v53  ;;  %v731_v4 = vld [vmem:[%s4041_s2 + $0x60] sm:$0xff]  ;;  %v2486_v6 = vpack.c.bf16 %v734_v0, %v730_v63  ;;  %v733_v8 = vld [vmem:[%s4041_s2 + $0x70] sm:$0xff]  ;;  %v736_v9 = vld [vmem:[%s4041_s2 + $0x88] sm:$0xff] }
  0x21   : > { %2483 = vmatprep.subr.bf16.mxu1 %v2482_v56  ;;  %v740_v10 = vld [vmem:[%s4041_s2 + $0xa8] sm:$0xff]  ;;  %v738_v12 = vld [vmem:[%s4041_s2 + $0x98] sm:$0xff]  ;;  %v2472_v14 = vpack.c.bf16 %v731_v4, %v727_v3  ;;  %v2488_v15 = vpack.c.bf16 %v733_v8, %v729_v5  ;;  %v735_v17 = vld [vmem:[%s4041_s2 + $0x80] sm:$0xff] }
  0x22   : > { %2144 = vmatmul.mubr.msk.f32.vlgmr.msra.gmra.mrb[0].mxu0 %vm283_vm0, %v3095_v61  ;;  %v3126_v11 = vld [vmem:[%s3074_s5 + $0x8] sm:$0xff]  ;;  %v742_v13 = vld [vmem:[%s4041_s2 + $0xb8] sm:$0xff]  ;;  %v2474_v16 = vpack.c.bf16 %v740_v10, %v736_v9  ;;  %v739_v18 = vld [vmem:[%s4041_s2 + $0xa0] sm:$0xff] }
  0x23   : > { %2160 = vmatmul.mubr.msk.f32.vlgmr.msra.gmra.mrb[0].mxu1 %vm283_vm0, %v3095_v61  ;;  %2469 = vmatpush1.bf16.msra.mxu0 %v2468_v62  ;;  %v737_v19 = vld [vmem:[%s4041_s2 + $0x90] sm:$0xff]  ;;  %v2490_v20 = vpack.c.bf16 %v742_v13, %v738_v12  ;;  %v744_v22 = vld [vmem:[%s4041_s2 + $0xc8] sm:$0xff]  ;;  %v746_v25 = vld [vmem:[%s4041_s2 + $0xd8] sm:$0xff]  ;;  %v2476_v27 = vpack.c.bf16 %v739_v18, %v735_v17 }
  0x24   : > { %2485 = vmatpush1.bf16.msra.mxu1 %v2484_v1  ;;  %467 = vmatprep.mubr.f32.mxu0 %v2867_v7  ;;  %v741_v21 = vld [vmem:[%s4041_s2 + $0xb0] sm:$0xff]  ;;  %v748_v23 = vld [vmem:[%s4041_s2 + $0xe8] sm:$0xff]  ;;  %v750_v26 = vld [vmem:[%s4041_s2 + $0xf8] sm:$0xff] }
  0x25   : > { %628 = vmatprep.mubr.f32.mxu1 %v2867_v7  ;;  %2471 = vmatprep.subr.bf16.mxu0 %v2470_v2  ;;  %v3160_v24 = vld [vmem:[%s3074_s5 + $0x10] sm:$0xff]  ;;  %v2492_v28 = vpack.c.bf16 %v741_v21, %v737_v19  ;;  %v2478_v29 = vpack.c.bf16 %v748_v23, %v744_v22  ;;  %v743_v30 = vld [vmem:[%s4041_s2 + $0xc0] sm:$0xff]  ;;  %v2494_v32 = vpack.c.bf16 %v750_v26, %v746_v25  ;;  %v3187_v35 = vld [vmem:[%s3074_s5 + $0x18] sm:$0xff] }
  0x26   : > { %2145 = vmatmul.mubr.msk.f32.gmra.mrb[2].mxu0 %vm283_vm0, %v3126_v11  ;;  %2487 = vmatprep.subr.bf16.mxu1 %v2486_v6  ;;  %v747_v31 = vld [vmem:[%s4041_s2 + $0xe0] sm:$0xff]  ;;  %v745_v33 = vld [vmem:[%s4041_s2 + $0xd0] sm:$0xff]  ;;  %v3205_v39 = vld [vmem:[%s3074_s5 + $0x28] sm:$0xff] }
  0x27   : > { %2161 = vmatmul.mubr.msk.f32.gmra.mrb[2].mxu1 %vm283_vm0, %v3126_v11  ;;  %473 = vmatprep.mubr.f32.mxu0 %v2867_v7  ;;  %v749_v34 = vld [vmem:[%s4041_s2 + $0xf0] sm:$0xff]  ;;  %v2480_v36 = vpack.c.bf16 %v747_v31, %v743_v30  ;;  %v3196_v38 = vld [vmem:[%s3074_s5 + $0x20] sm:$0xff]  ;;  %v3223_v41 = vld [vmem:[%s3074_s5 + $0x38] sm:$0xff] }
  0x28   : > { %634 = vmatprep.mubr.f32.mxu1 %v2867_v7  ;;  %2473 = vmatpush1.bf16.msra.mxu0 %v2472_v14  ;;  %v2496_v37 = vpack.c.bf16 %v749_v34, %v745_v33  ;;  %v3214_v40 = vld [vmem:[%s3074_s5 + $0x30] sm:$0xff]  ;;  %v3232_v42 = vld [vmem:[%s3074_s5 + $0x40] sm:$0xff]  ;;  %v3241_v43 = vld [vmem:[%s3074_s5 + $0x48] sm:$0xff] }
  0x29   : > { %2489 = vmatpush1.bf16.msra.mxu1 %v2488_v15  ;;  %2475 = vmatprep.subr.bf16.mxu0 %v2474_v16  ;;  %v3250_v44 = vld [vmem:[%s3074_s5 + $0x50] sm:$0xff]  ;;  %v3259_v45 = vld [vmem:[%s3074_s5 + $0x58] sm:$0xff]  ;;  %v3268_v46 = vld [vmem:[%s3074_s5 + $0x60] sm:$0xff] }
  0x2a   : > { %2146 = vmatmul.mubr.msk.f32.gmra.mrb[4].mxu0 %vm283_vm0, %v3160_v24  ;;  %2491 = vmatprep.subr.bf16.mxu1 %v2490_v20  ;;  %v3277_v47 = vld [vmem:[%s3074_s5 + $0x68] sm:$0xff]  ;;  %v3286_v48 = vld [vmem:[%s3074_s5 + $0x70] sm:$0xff]  ;;  %v3295_v49 = vld [vmem:[%s3074_s5 + $0x78] sm:$0xff] }
  0x2b   : > { %2162 = vmatmul.mubr.msk.f32.gmra.mrb[4].mxu1 %vm283_vm0, %v3160_v24  ;;  %479 = vmatprep.mubr.f32.mxu0 %v2867_v7  ;;  %v1617_v50 = vld [vmem:[%s4042_s3 + $0x80] sm:$0xff]  ;;  %v1618_v51 = vld [vmem:[%s4042_s3 + $0x88] sm:$0xff]  ;;  %v1619_v62 = vld [vmem:[%s4042_s3 + $0x90] sm:$0xff] }
  0x2c   : > { %640 = vmatprep.mubr.f32.mxu1 %v2867_v7  ;;  %2477 = vmatpush1.bf16.msra.mxu0 %v2476_v27  ;;  %v1649_v52 = vld [vmem:[%s4042_s3 + $0x180] sm:$0xff]  ;;  %v2498_v53 = vpack.c.bf16 %v1618_v51, %v1617_v50  ;;  %v1650_v54 = vld [vmem:[%s4042_s3 + $0x188] sm:$0xff]  ;;  %v1620_v63 = vld [vmem:[%s4042_s3 + $0x98] sm:$0xff] }
  0x2d   : > { %2493 = vmatpush1.bf16.msra.mxu1 %v2492_v28  ;;  %2479 = vmatprep.subr.bf16.mxu0 %v2478_v29  ;;  %v1601_v55 = vld [vmem:[%s4042_s3] sm:$0xff]  ;;  %v1602_v56 = vld [vmem:[%s4042_s3 + $0x8] sm:$0xff]  ;;  %v2530_v57 = vpack.c.bf16 %v1650_v54, %v1649_v52  ;;  %v2502_v0 = vpack.c.bf16 %v1620_v63, %v1619_v62  ;;  %v1652_v1 = vld [vmem:[%s4042_s3 + $0x198] sm:$0xff] }
  0x2e   : > { %2147 = vmatmul.mubr.msk.f32.gmra.mrb[6].mxu0 %vm283_vm0, %v3187_v35  ;;  %2495 = vmatprep.subr.bf16.mxu1 %v2494_v32  ;;  %v2500_v58 = vpack.c.bf16 %v1602_v56, %v1601_v55  ;;  %v1633_v59 = vld [vmem:[%s4042_s3 + $0x100] sm:$0xff]  ;;  %v1634_v60 = vld [vmem:[%s4042_s3 + $0x108] sm:$0xff]  ;;  %v1603_v2 = vld [vmem:[%s4042_s3 + $0x10] sm:$0xff] }
  0x2f   : > { %2163 = vmatmul.mubr.msk.f32.gmra.mrb[6].mxu1 %vm283_vm0, %v3187_v35  ;;  %485 = vmatprep.mubr.f32.mxu0 %v2867_v7  ;;  %v1604_v3 = vld [vmem:[%s4042_s3 + $0x18] sm:$0xff]  ;;  %v1635_v6 = vld [vmem:[%s4042_s3 + $0x110] sm:$0xff]  ;;  %v1621_v10 = vld [vmem:[%s4042_s3 + $0xa0] sm:$0xff] }
  0x30   : > { %646 = vmatprep.mubr.f32.mxu1 %v2867_v7  ;;  %2481 = vmatpush1.bf16.msra.mxu0 %v2480_v36  ;;  %v2504_v5 = vpack.c.bf16 %v1604_v3, %v1603_v2  ;;  %v1636_v8 = vld [vmem:[%s4042_s3 + $0x118] sm:$0xff]  ;;  %v1653_v12 = vld [vmem:[%s4042_s3 + $0x1a0] sm:$0xff]  ;;  %v1654_v14 = vld [vmem:[%s4042_s3 + $0x1a8] sm:$0xff] }
  0x31   : > { %2497 = vmatpush1.bf16.msra.mxu1 %v2496_v37  ;;  %2499 = vmatprep.subr.bf16.mxu0 %v2498_v53  ;;  %v2536_v9 = vpack.c.bf16 %v1636_v8, %v1635_v6  ;;  %v1605_v15 = vld [vmem:[%s4042_s3 + $0x20] sm:$0xff]  ;;  %v1606_v16 = vld [vmem:[%s4042_s3 + $0x28] sm:$0xff]  ;;  %v2538_v17 = vpack.c.bf16 %v1654_v14, %v1653_v12  ;;  %v1623_v22 = vld [vmem:[%s4042_s3 + $0xb0] sm:$0xff] }
  0x32   : > { %2148 = vmatmul.mubr.msk.f32.gmra.mrb[8].mxu0 %vm283_vm0, %v3196_v38  ;;  %2531 = vmatprep.subr.bf16.mxu1 %v2530_v57  ;;  %v2508_v18 = vpack.c.bf16 %v1606_v16, %v1605_v15  ;;  %v1637_v19 = vld [vmem:[%s4042_s3 + $0x120] sm:$0xff]  ;;  %v1638_v20 = vld [vmem:[%s4042_s3 + $0x128] sm:$0xff]  ;;  %v1624_v23 = vld [vmem:[%s4042_s3 + $0xb8] sm:$0xff] }
  0x33   : > { %2164 = vmatmul.mubr.msk.f32.gmra.mrb[8].mxu1 %vm283_vm0, %v3196_v38  ;;  %491 = vmatprep.mubr.f32.mxu0 %v2867_v7  ;;  %v2540_v21 = vpack.c.bf16 %v1638_v20, %v1637_v19  ;;  %v2510_v25 = vpack.c.bf16 %v1624_v23, %v1623_v22  ;;  %v1656_v26 = vld [vmem:[%s4042_s3 + $0x1b8] sm:$0xff]  ;;  %v1607_v27 = vld [vmem:[%s4042_s3 + $0x30] sm:$0xff]  ;;  %v1625_v34 = vld [vmem:[%s4042_s3 + $0xc0] sm:$0xff] }
  0x34   : > { %652 = vmatprep.mubr.f32.mxu1 %v2867_v7  ;;  %v1608_v28 = vld [vmem:[%s4042_s3 + $0x38] sm:$0xff]  ;;  %v1639_v31 = vld [vmem:[%s4042_s3 + $0x130] sm:$0xff]  ;;  %v1657_v36 = vld [vmem:[%s4042_s3 + $0x1c0] sm:$0xff] }
  0x35   : > { %v2512_v30 = vpack.c.bf16 %v1608_v28, %v1607_v27  ;;  %v1640_v32 = vld [vmem:[%s4042_s3 + $0x138] sm:$0xff]  ;;  %v1611_v51 = vld [vmem:[%s4042_s3 + $0x50] sm:$0xff]  ;;  %v1662_v62 = vld [vmem:[%s4042_s3 + $0x1e8] sm:$0xff] }
  0x36   : > { %2149 = vmatmul.mubr.msk.f32.gmra.mrb[10].mxu0 %vm283_vm0, %v3205_v39  ;;  %v2544_v33 = vpack.c.bf16 %v1640_v32, %v1639_v31  ;;  %v1660_v50 = vld [vmem:[%s4042_s3 + $0x1d8] sm:$0xff]  ;;  %v1643_v55 = vld [vmem:[%s4042_s3 + $0x150] sm:$0xff]  ;;  %v1613_v63 = vld [vmem:[%s4042_s3 + $0x60] sm:$0xff] }
  0x37   : > { %2165 = vmatmul.mubr.msk.f32.gmra.mrb[10].mxu1 %vm283_vm0, %v3205_v39  ;;  %497 = vmatprep.mubr.f32.mxu0 %v2867_v7  ;;  %v1612_v52 = vld [vmem:[%s4042_s3 + $0x58] sm:$0xff]  ;;  %v1645_v2 = vld [vmem:[%s4042_s3 + $0x160] sm:$0xff]  ;;  %v1646_v3 = vld [vmem:[%s4042_s3 + $0x168] sm:$0xff] }
  0x38   : > { %658 = vmatprep.mubr.f32.mxu1 %v2867_v7  ;;  %v2520_v54 = vpack.c.bf16 %v1612_v52, %v1611_v51  ;;  %v1644_v56 = vld [vmem:[%s4042_s3 + $0x158] sm:$0xff]  ;;  %v1663_v8 = vld [vmem:[%s4042_s3 + $0x1f0] sm:$0xff] }
  0x39   : > { %v2552_v57 = vpack.c.bf16 %v1644_v56, %v1643_v55  ;;  %v1632_v6 = vld [vmem:[%s4042_s3 + $0xf8] sm:$0xff]  ;;  %v1647_v15 = vld [vmem:[%s4042_s3 + $0x170] sm:$0xff] }
  0x3a   : > { %2150 = vmatmul.mubr.msk.f32.gmra.mrb[12].mxu0 %vm283_vm0, %v3214_v40  ;;  %v1616_v12 = vld [vmem:[%s4042_s3 + $0x78] sm:$0xff] }
  0x3b   : > { %2166 = vmatmul.mubr.msk.f32.gmra.mrb[12].mxu1 %vm283_vm0, %v3214_v40  ;;  %503 = vmatprep.mubr.f32.mxu0 %v2867_v7  ;;  %v1648_v16 = vld [vmem:[%s4042_s3 + $0x178] sm:$0xff] }
  0x3c   : > { %664 = vmatprep.mubr.f32.mxu1 %v2867_v7 }
  0x3e   : > { %2151 = vmatmul.mubr.msk.f32.gmra.mrb[14].mxu0 %vm283_vm0, %v3223_v41 }
  0x3f   : > { %2167 = vmatmul.mubr.msk.f32.gmra.mrb[14].mxu1 %vm283_vm0, %v3223_v41  ;;  %509 = vmatprep.mubr.f32.mxu0 %v2867_v7 }
  0x40   : > { %670 = vmatprep.mubr.f32.mxu1 %v2867_v7 }
  0x42   : > { %2152 = vmatmul.mubr.msk.f32.gmra.mrb[16].mxu0 %vm283_vm0, %v3232_v42 }
  0x43   : > { %2168 = vmatmul.mubr.msk.f32.gmra.mrb[16].mxu1 %vm283_vm0, %v3232_v42  ;;  %515 = vmatprep.mubr.f32.mxu0 %v2867_v7 }
  0x44   : > { %676 = vmatprep.mubr.f32.mxu1 %v2867_v7 }
  0x46   : > { %2153 = vmatmul.mubr.msk.f32.gmra.mrb[18].mxu0 %vm283_vm0, %v3241_v43 }
  0x47   : > { %2169 = vmatmul.mubr.msk.f32.gmra.mrb[18].mxu1 %vm283_vm0, %v3241_v43  ;;  %521 = vmatprep.mubr.f32.mxu0 %v2867_v7 }
  0x48   : > { %682 = vmatprep.mubr.f32.mxu1 %v2867_v7 }
  0x4a   : > { %2154 = vmatmul.mubr.msk.f32.gmra.mrb[20].mxu0 %vm283_vm0, %v3250_v44 }
  0x4b   : > { %2170 = vmatmul.mubr.msk.f32.gmra.mrb[20].mxu1 %vm283_vm0, %v3250_v44  ;;  %527 = vmatprep.mubr.f32.mxu0 %v2867_v7 }
  0x4c   : > { %688 = vmatprep.mubr.f32.mxu1 %v2867_v7 }
  0x4e   : > { %2155 = vmatmul.mubr.msk.f32.gmra.mrb[22].mxu0 %vm283_vm0, %v3259_v45 }
  0x4f   : > { %2171 = vmatmul.mubr.msk.f32.gmra.mrb[22].mxu1 %vm283_vm0, %v3259_v45  ;;  %533 = vmatprep.mubr.f32.mxu0 %v2867_v7 }
  0x50   : > { %694 = vmatprep.mubr.f32.mxu1 %v2867_v7 }
  0x52   : > { %2156 = vmatmul.mubr.msk.f32.gmra.mrb[24].mxu0 %vm283_vm0, %v3268_v46 }
  0x53   : > { %2172 = vmatmul.mubr.msk.f32.gmra.mrb[24].mxu1 %vm283_vm0, %v3268_v46  ;;  %539 = vmatprep.mubr.f32.mxu0 %v2867_v7 }
  0x54   : > { %700 = vmatprep.mubr.f32.mxu1 %v2867_v7 }
  0x56   : > { %2157 = vmatmul.mubr.msk.f32.gmra.mrb[26].mxu0 %vm283_vm0, %v3277_v47 }
  0x57   : > { %2173 = vmatmul.mubr.msk.f32.gmra.mrb[26].mxu1 %vm283_vm0, %v3277_v47  ;;  %545 = vmatprep.mubr.f32.mxu0 %v2867_v7 }
  0x58   : > { %706 = vmatprep.mubr.f32.mxu1 %v2867_v7 }
  0x5a   : > { %2158 = vmatmul.mubr.msk.f32.gmra.mrb[28].mxu0 %vm283_vm0, %v3286_v48 }
  0x5b   : > { %2174 = vmatmul.mubr.msk.f32.gmra.mrb[28].mxu1 %vm283_vm0, %v3286_v48  ;;  %551 = vmatprep.mubr.f32.mxu0 %v2867_v7 }
  0x5c   : > { %712 = vmatprep.mubr.f32.mxu1 %v2867_v7 }
  0x5e   : > { %2159 = vmatmul.mubr.msk.f32.gmra.mrb[30].mxu0 %vm283_vm0, %v3295_v49 }
  0x5f   : > { %2175 = vmatmul.mubr.msk.f32.gmra.mrb[30].mxu1 %vm283_vm0, %v3295_v49  ;;  %815 = vmatprep.mubr.f32.mxu0 %v2867_v7 }
  0x60   : > { %976 = vmatprep.mubr.f32.mxu1 %v2867_v7 }
  0x62   : > { %2176 = vmatmul.mubr.msk.f32.vlgmr.msra.gmra.mrb[32].mxu0 %vm283_vm0, %v3095_v61 }
  0x63   : > { %2192 = vmatmul.mubr.msk.f32.vlgmr.msra.gmra.mrb[32].mxu1 %vm283_vm0, %v3095_v61  ;;  %821 = vmatprep.mubr.f32.mxu0 %v2867_v7  ;;  %v2532_v61 = vpack.c.bf16 %v1634_v60, %v1633_v59  ;;  %v1630_v59 = vld [vmem:[%s4042_s3 + $0xe8] sm:$0xff]  ;;  %v1661_v60 = vld [vmem:[%s4042_s3 + $0x1e0] sm:$0xff] }
  0x64   : > { %982 = vmatprep.mubr.f32.mxu1 %v2867_v7  ;;  %2501 = vmatpush3.bf16.msra.mxu0 %v2500_v58  ;;  %v1629_v58 = vld [vmem:[%s4042_s3 + $0xe0] sm:$0xff] }
  0x65   : > { %2533 = vmatpush3.bf16.msra.mxu1 %v2532_v61  ;;  %2503 = vmatprep.subr.bf16.mxu0 %v2502_v0  ;;  %v2522_v61 = vpack.c.bf16 %v1630_v59, %v1629_v58  ;;  %v2554_v0 = vpack.c.bf16 %v1662_v62, %v1661_v60 }
  0x66   : > { %2177 = vmatmul.mubr.msk.f32.gmra.mrb[34].mxu0 %vm283_vm0, %v3126_v11 }
  0x67   : > { %2193 = vmatmul.mubr.msk.f32.gmra.mrb[34].mxu1 %vm283_vm0, %v3126_v11  ;;  %827 = vmatprep.mubr.f32.mxu0 %v2867_v7  ;;  %v1622_v11 = vld [vmem:[%s4042_s3 + $0xa8] sm:$0xff] }
  0x68   : > { %988 = vmatprep.mubr.f32.mxu1 %v2867_v7  ;;  %2505 = vmatpush3.bf16.msra.mxu0 %v2504_v5  ;;  %v2506_v13 = vpack.c.bf16 %v1622_v11, %v1621_v10  ;;  %v1631_v5 = vld [vmem:[%s4042_s3 + $0xf0] sm:$0xff]  ;;  %v1664_v10 = vld [vmem:[%s4042_s3 + $0x1f8] sm:$0xff] }
  0x69   : > { %v1615_v11 = vld [vmem:[%s4042_s3 + $0x70] sm:$0xff] }
  0x6a   : > { %2178 = vmatmul.mubr.msk.f32.gmra.mrb[36].mxu0 %vm283_vm0, %v3160_v24  ;;  %2507 = vmatprep.subr.bf16.mxu0 %v2506_v13  ;;  %v2558_v13 = vpack.c.bf16 %v1664_v10, %v1663_v8  ;;  %v2528_v14 = vpack.c.bf16 %v1616_v12, %v1615_v11 }
  0x6b   : > { %2194 = vmatmul.mubr.msk.f32.gmra.mrb[36].mxu1 %vm283_vm0, %v3160_v24  ;;  %833 = vmatprep.mubr.f32.mxu0 %v2867_v7  ;;  %v1655_v24 = vld [vmem:[%s4042_s3 + $0x1b0] sm:$0xff] }
  0x6c   : > { %994 = vmatprep.mubr.f32.mxu1 %v2867_v7  ;;  %2509 = vmatpush3.bf16.msra.mxu0 %v2508_v18  ;;  %v2542_v29 = vpack.c.bf16 %v1656_v26, %v1655_v24 }
  0x6d   : > { %2511 = vmatprep.subr.bf16.mxu0 %v2510_v25 }
  0x6e   : > { %2179 = vmatmul.mubr.msk.f32.gmra.mrb[38].mxu0 %vm283_vm0, %v3187_v35 }
  0x6f   : > { %2195 = vmatmul.mubr.msk.f32.gmra.mrb[38].mxu1 %vm283_vm0, %v3187_v35  ;;  %839 = vmatprep.mubr.f32.mxu0 %v2867_v7  ;;  %v1626_v35 = vld [vmem:[%s4042_s3 + $0xc8] sm:$0xff] }
  0x70   : > { %1000 = vmatprep.mubr.f32.mxu1 %v2867_v7  ;;  %2513 = vmatpush3.bf16.msra.mxu0 %v2512_v30  ;;  %v2514_v37 = vpack.c.bf16 %v1626_v35, %v1625_v34 }
  0x72   : > { %2180 = vmatmul.mubr.msk.f32.gmra.mrb[40].mxu0 %vm283_vm0, %v3196_v38  ;;  %2515 = vmatprep.subr.bf16.mxu0 %v2514_v37 }
  0x73   : > { %2196 = vmatmul.mubr.msk.f32.gmra.mrb[40].mxu1 %vm283_vm0, %v3196_v38  ;;  %845 = vmatprep.mubr.f32.mxu0 %v2867_v7  ;;  %v1658_v38 = vld [vmem:[%s4042_s3 + $0x1c8] sm:$0xff] }
  0x74   : > { %1006 = vmatprep.mubr.f32.mxu1 %v2867_v7 }
  0x76   : > { %2181 = vmatmul.mubr.msk.f32.gmra.mrb[42].mxu0 %vm283_vm0, %v3205_v39 }
  0x77   : > { %2197 = vmatmul.mubr.msk.f32.gmra.mrb[42].mxu1 %vm283_vm0, %v3205_v39  ;;  %851 = vmatprep.mubr.f32.mxu0 %v2867_v7  ;;  %v1609_v39 = vld [vmem:[%s4042_s3 + $0x40] sm:$0xff] }
  0x78   : > { %1012 = vmatprep.mubr.f32.mxu1 %v2867_v7 }
  0x7a   : > { %2182 = vmatmul.mubr.msk.f32.gmra.mrb[44].mxu0 %vm283_vm0, %v3214_v40 }
  0x7b   : > { %2198 = vmatmul.mubr.msk.f32.gmra.mrb[44].mxu1 %vm283_vm0, %v3214_v40  ;;  %857 = vmatprep.mubr.f32.mxu0 %v2867_v7  ;;  %v1610_v40 = vld [vmem:[%s4042_s3 + $0x48] sm:$0xff] }
  0x7c   : > { %1018 = vmatprep.mubr.f32.mxu1 %v2867_v7 }
  0x7e   : > { %2183 = vmatmul.mubr.msk.f32.gmra.mrb[46].mxu0 %vm283_vm0, %v3223_v41 }
  0x7f   : > { %2199 = vmatmul.mubr.msk.f32.gmra.mrb[46].mxu1 %vm283_vm0, %v3223_v41  ;;  %863 = vmatprep.mubr.f32.mxu0 %v2867_v7  ;;  %v2546_v41 = vpack.c.bf16 %v1658_v38, %v1657_v36 }
  0x80   : > { %1024 = vmatprep.mubr.f32.mxu1 %v2867_v7 }
  0x82   : > { %2184 = vmatmul.mubr.msk.f32.gmra.mrb[48].mxu0 %vm283_vm0, %v3232_v42 }
  0x83   : > { %2200 = vmatmul.mubr.msk.f32.gmra.mrb[48].mxu1 %vm283_vm0, %v3232_v42  ;;  %869 = vmatprep.mubr.f32.mxu0 %v2867_v7  ;;  %v2516_v42 = vpack.c.bf16 %v1610_v40, %v1609_v39 }
  0x84   : > { %1030 = vmatprep.mubr.f32.mxu1 %v2867_v7 }
  0x85   : > { %2517 = vmatpush3.bf16.msra.mxu0 %v2516_v42 }
  0x86   : > { %2185 = vmatmul.mubr.msk.f32.gmra.mrb[50].mxu0 %vm283_vm0, %v3241_v43 }
  0x87   : > { %2201 = vmatmul.mubr.msk.f32.gmra.mrb[50].mxu1 %vm283_vm0, %v3241_v43  ;;  %875 = vmatprep.mubr.f32.mxu0 %v2867_v7  ;;  %v1641_v43 = vld [vmem:[%s4042_s3 + $0x140] sm:$0xff] }
  0x88   : > { %1036 = vmatprep.mubr.f32.mxu1 %v2867_v7 }
  0x8a   : > { %2186 = vmatmul.mubr.msk.f32.gmra.mrb[52].mxu0 %vm283_vm0, %v3250_v44 }
  0x8b   : > { %2202 = vmatmul.mubr.msk.f32.gmra.mrb[52].mxu1 %vm283_vm0, %v3250_v44  ;;  %881 = vmatprep.mubr.f32.mxu0 %v2867_v7  ;;  %v1642_v44 = vld [vmem:[%s4042_s3 + $0x148] sm:$0xff] }
  0x8c   : > { %1042 = vmatprep.mubr.f32.mxu1 %v2867_v7 }
  0x8e   : > { %2187 = vmatmul.mubr.msk.f32.gmra.mrb[54].mxu0 %vm283_vm0, %v3259_v45 }
  0x8f   : > { %2203 = vmatmul.mubr.msk.f32.gmra.mrb[54].mxu1 %vm283_vm0, %v3259_v45  ;;  %887 = vmatprep.mubr.f32.mxu0 %v2867_v7  ;;  %v2548_v45 = vpack.c.bf16 %v1642_v44, %v1641_v43 }
  0x90   : > { %1048 = vmatprep.mubr.f32.mxu1 %v2867_v7 }
  0x92   : > { %2188 = vmatmul.mubr.msk.f32.gmra.mrb[56].mxu0 %vm283_vm0, %v3268_v46 }
  0x93   : > { %2204 = vmatmul.mubr.msk.f32.gmra.mrb[56].mxu1 %vm283_vm0, %v3268_v46  ;;  %893 = vmatprep.mubr.f32.mxu0 %v2867_v7  ;;  %v1627_v46 = vld [vmem:[%s4042_s3 + $0xd0] sm:$0xff] }
  0x94   : > { %1054 = vmatprep.mubr.f32.mxu1 %v2867_v7 }
  0x96   : > { %2189 = vmatmul.mubr.msk.f32.gmra.mrb[58].mxu0 %vm283_vm0, %v3277_v47 }
  0x97   : > { %2205 = vmatmul.mubr.msk.f32.gmra.mrb[58].mxu1 %vm283_vm0, %v3277_v47  ;;  %899 = vmatprep.mubr.f32.mxu0 %v2867_v7  ;;  %v1628_v47 = vld [vmem:[%s4042_s3 + $0xd8] sm:$0xff] }
  0x98   : > { %1060 = vmatprep.mubr.f32.mxu1 %v2867_v7 }
  0x9a   : > { %2190 = vmatmul.mubr.msk.f32.gmra.mrb[60].mxu0 %vm283_vm0, %v3286_v48 }
  0x9b   : > { %2206 = vmatmul.mubr.msk.f32.gmra.mrb[60].mxu1 %vm283_vm0, %v3286_v48  ;;  %905 = vmatprep.mubr.f32.mxu0 %v2867_v7  ;;  %v1659_v48 = vld [vmem:[%s4042_s3 + $0x1d0] sm:$0xff] }
  0x9c   : > { %1066 = vmatprep.mubr.f32.mxu1 %v2867_v7  ;;  %v1651_v7 = vld [vmem:[%s4042_s3 + $0x190] sm:$0xff]  ;;  %v2550_v53 = vpack.c.bf16 %v1660_v50, %v1659_v48 }
  0x9d   : > { %v2534_v4 = vpack.c.bf16 %v1652_v1, %v1651_v7  ;;  %v1614_v7 = vld [vmem:[%s4042_s3 + $0x68] sm:$0xff] }
  0x9e   : > { %2191 = vmatmul.mubr.msk.f32.gmra.mrb[62].mxu0 %vm283_vm0, %v3295_v49  ;;  %v2524_v1 = vpack.c.bf16 %v1614_v7, %v1613_v63 }
  0x9f   : > { %2207 = vmatmul.mubr.msk.f32.gmra.mrb[62].mxu1 %vm283_vm0, %v3295_v49  ;;  %2535 = vmatprep.subr.bf16.mxu1 %v2534_v4  ;;  %v2518_v49 = vpack.c.bf16 %v1628_v47, %v1627_v46  ;;  %v2556_v4 = vpack.c.bf16 %v1646_v3, %v1645_v2 }
  0xa0   : > { %2537 = vmatpush3.bf16.msra.mxu1 %v2536_v9  ;;  %v2526_v9 = vpack.c.bf16 %v1632_v6, %v1631_v5 }
  0xa1   : > { %2539 = vmatprep.subr.bf16.mxu1 %v2538_v17  ;;  %2519 = vmatprep.subr.bf16.mxu0 %v2518_v49  ;;  %v2560_v17 = vpack.c.bf16 %v1648_v16, %v1647_v15 }
  0xa2   : > { %2521 = vmatpush3.bf16.msra.mxu0 %v2520_v54 }
  0xa3   : > { %2523 = vmatprep.subr.bf16.mxu0 %v2522_v61 }
  0xa4   : > { %2541 = vmatpush3.bf16.msra.mxu1 %v2540_v21 }
  0xa5   : > { %2543 = vmatprep.subr.bf16.mxu1 %v2542_v29 }
  0xa6   : > { %2525 = vmatpush3.bf16.msra.mxu0 %v2524_v1 }
  0xa7   : > { %2527 = vmatprep.subr.bf16.mxu0 %v2526_v9 }
  0xa8   : > { %2545 = vmatpush3.bf16.msra.mxu1 %v2544_v33 }
  0xa9   : > { %2547 = vmatprep.subr.bf16.mxu1 %v2546_v41 }
  0xaa   : > { %2529 = vmatpush3.bf16.msra.mxu0 %v2528_v14 }
  0xac   : > { %2549 = vmatpush3.bf16.msra.mxu1 %v2548_v45 }
  0xad   : > { %2551 = vmatprep.subr.bf16.mxu1 %v2550_v53 }
  0xb0   : > { %2553 = vmatpush3.bf16.msra.mxu1 %v2552_v57 }
  0xb1   : > { %2555 = vmatprep.subr.bf16.mxu1 %v2554_v0 }
  0xb4   : > { %2557 = vmatpush3.bf16.msra.mxu1 %v2556_v4 }
  0xb5   : > { %2559 = vmatprep.subr.bf16.mxu1 %v2558_v13 }
  0xb8   : > { %2561 = vmatpush3.bf16.msra.mxu1 %v2560_v17 }
  0xf5   : > { %v3590_v18 = vpop.f32.mrb[0].mxu0 }
  0xf6   : > { %v2208_v19 = vmul.f32 -1.442695, %v3590_v18  ;;  %v3593_v20 = vpop.f32.mrb[0].mxu1  ;;  %v3595_v21 = vpop.f32.mrb[1].mxu0 }
  0xf7   : > { %v2210_v22 = vmul.f32 -1.442695, %v3593_v20  ;;  %v2209_v23 = vmul.f32 -1.442695, %v3595_v21  ;;  %v3599_v24 = vpop.f32.mrb[1].mxu1 }
  0xf8   : > { %2587 = vpow2.f32 %v2208_v19  ;;  %v2211_v25 = vmul.f32 -1.442695, %v3599_v24 }
  0xf9   : > { %2589 = vpow2.f32 %v2210_v22  ;;  %v3602_v26 = vpop.f32.mrb[2].mxu0 }
  0xfa   : > { %2591 = vpow2.f32 %v2209_v23  ;;  %v2212_v27 = vmul.f32 -1.442695, %v3602_v26  ;;  %v3605_v28 = vpop.f32.mrb[2].mxu1  ;;  %v3607_v29 = vpop.f32.mrb[3].mxu0 }
  0xfb   : > { %2593 = vpow2.f32 %v2211_v25  ;;  %v2214_v30 = vmul.f32 -1.442695, %v3605_v28  ;;  %v2213_v31 = vmul.f32 -1.442695, %v3607_v29  ;;  %v3611_v32 = vpop.f32.mrb[3].mxu1 }
  0xfc   : > { %2595 = vpow2.f32 %v2212_v27  ;;  %v2215_v33 = vmul.f32 -1.442695, %v3611_v32 }
  0xfd   : > { %2597 = vpow2.f32 %v2214_v30  ;;  %v3614_v34 = vpop.f32.mrb[4].mxu0 }
  0xfe   : > { %2599 = vpow2.f32 %v2213_v31  ;;  %v2216_v35 = vmul.f32 -1.442695, %v3614_v34  ;;  %v3617_v36 = vpop.f32.mrb[4].mxu1  ;;  %v3619_v37 = vpop.f32.mrb[5].mxu0 }
  0xff   : > { %2601 = vpow2.f32 %v2215_v33  ;;  %v2218_v38 = vmul.f32 -1.442695, %v3617_v36  ;;  %v2217_v39 = vmul.f32 -1.442695, %v3619_v37  ;;  %v3623_v40 = vpop.f32.mrb[5].mxu1 }
 0x100   : > { %2603 = vpow2.f32 %v2216_v35  ;;  %v2219_v41 = vmul.f32 -1.442695, %v3623_v40 }
 0x101   : > { %2605 = vpow2.f32 %v2218_v38  ;;  %v3626_v42 = vpop.f32.mrb[6].mxu0 }
 0x102   : > { %v2588_v43 = vpop.eup %2587  ;;  %2607 = vpow2.f32 %v2217_v39  ;;  %v2220_v44 = vmul.f32 -1.442695, %v3626_v42  ;;  %v3629_v45 = vpop.f32.mrb[6].mxu1 }
 0x103   : > { %v3631_v46 = vpop.f32.mrb[7].mxu0  ;;  %v2590_v47 = vpop.eup %2589  ;;  %v1265_v48 = vadd.f32 1.0, %v2588_v43  ;;  %2609 = vpow2.f32 %v2219_v41  ;;  %v2222_v17 = vmul.f32 -1.442695, %v3629_v45 }
 0x104   : > { %v3633_v49 = vpop.f32.mrb[7].mxu1  ;;  %v2592_v50 = vpop.eup %2591  ;;  %v1267_v51 = vadd.f32 1.0, %v2590_v47  ;;  %2611 = vpow2.f32 %v2220_v44  ;;  %v2221_v27 = vmul.f32 -1.442695, %v3631_v46 }
 0x105   : > { %v2594_v52 = vpop.eup %2593  ;;  %2613 = vrcp.f32 %v1265_v48  ;;  %v1266_v53 = vadd.f32 1.0, %v2592_v50  ;;  %v3635_v54 = vpop.f32.mrb[8].mxu0  ;;  %v2223_v33 = vmul.f32 -1.442695, %v3633_v49 }
 0x106   : > { %v2596_v55 = vpop.eup %2595  ;;  %2615 = vrcp.f32 %v1267_v51  ;;  %v1268_v56 = vadd.f32 1.0, %v2594_v52  ;;  %v3637_v57 = vpop.f32.mrb[8].mxu1  ;;  %v2224_v38 = vmul.f32 -1.442695, %v3635_v54 }
 0x107   : > { %v3639_v58 = vpop.f32.mrb[9].mxu0  ;;  %v2598_v59 = vpop.eup %2597  ;;  %2617 = vrcp.f32 %v1266_v53  ;;  %v1269_v60 = vadd.f32 1.0, %v2596_v55  ;;  %v2226_v43 = vmul.f32 -1.442695, %v3637_v57 }
 0x108   : > { %v3641_v61 = vpop.f32.mrb[9].mxu1  ;;  %v2600_v62 = vpop.eup %2599  ;;  %2619 = vrcp.f32 %v1268_v56  ;;  %v1271_v63 = vadd.f32 1.0, %v2598_v59  ;;  %v2225_v50 = vmul.f32 -1.442695, %v3639_v58 }
 0x109   : > { %4085 = vst [vmem:[#allocation3_spill] sm:$0xff] %v3641_v61  ;;  %v2602_v7 = vpop.eup %2601  ;;  %2621 = vrcp.f32 %v1269_v60  ;;  %v1270_v0 = vadd.f32 1.0, %v2600_v62  ;;  %v3643_v1 = vpop.f32.mrb[10].mxu0  ;;  %v2227_v53 = vmul.f32 -1.442695, %v3641_v61 }
 0x10a   : > { %4086 = vst [vmem:[#allocation4_spill] sm:$0xff] %v3643_v1  ;;  %v2604_v2 = vpop.eup %2603  ;;  %2623 = vrcp.f32 %v1271_v63  ;;  %v1272_v3 = vadd.f32 1.0, %v2602_v7  ;;  %v3645_v4 = vpop.f32.mrb[10].mxu1  ;;  %v2228_v56 = vmul.f32 -1.442695, %v3643_v1 }
 0x10b   : > { %4087 = vst [vmem:[#allocation5_spill] sm:$0xff] %v3645_v4  ;;  %v3647_v5 = vpop.f32.mrb[11].mxu0  ;;  %v2606_v6 = vpop.eup %2605  ;;  %2625 = vrcp.f32 %v1270_v0  ;;  %v1273_v8 = vadd.f32 1.0, %v2604_v2  ;;  %v2230_v62 = vmul.f32 -1.442695, %v3645_v4 }
 0x10c   : > { %4088 = vst [vmem:[#allocation6_spill] sm:$0xff] %v3647_v5  ;;  %v3649_v9 = vpop.f32.mrb[11].mxu1  ;;  %v2608_v10 = vpop.eup %2607  ;;  %2627 = vrcp.f32 %v1272_v3  ;;  %v1275_v11 = vadd.f32 1.0, %v2606_v6  ;;  %v2229_v2 = vmul.f32 -1.442695, %v3647_v5 }
 0x10d   : > { %4089 = vst [vmem:[#allocation7_spill] sm:$0xff] %v3649_v9  ;;  %v2610_v12 = vpop.eup %2609  ;;  %2629 = vrcp.f32 %v1273_v8  ;;  %v1274_v13 = vadd.f32 1.0, %v2608_v10  ;;  %v3651_v14 = vpop.f32.mrb[12].mxu0  ;;  %v2231_v8 = vmul.f32 -1.442695, %v3649_v9 }
 0x10e   : > { %4090 = vst [vmem:[#allocation8_spill] sm:$0xff] %v3651_v14  ;;  %v2612_v15 = vpop.eup %2611  ;;  %2631 = vrcp.f32 %v1275_v11  ;;  %v1276_v16 = vadd.f32 1.0, %v2610_v12  ;;  %v3654_v19 = vpop.f32.mrb[12].mxu1  ;;  %v2232_v11 = vmul.f32 -1.442695, %v3651_v14 }
 0x10f   : > { %4091 = vst [vmem:[#allocation9_spill] sm:$0xff] %v3654_v19  ;;  %v3656_v22 = vpop.f32.mrb[13].mxu0  ;;  %v3658_v23 = vpop.eup %2613  ;;  %2633 = vrcp.f32 %v1274_v13  ;;  %v1277_v25 = vadd.f32 1.0, %v2612_v15  ;;  %v2234_v15 = vmul.f32 -1.442695, %v3654_v19 }
 0x110   : > { %v3661_v30 = vpop.f32.mrb[13].mxu1  ;;  %v3663_v31 = vpop.eup %2615  ;;  %2635 = vrcp.f32 %v1276_v16 }
 0x111   : > { %4092 = vst [vmem:[#allocation10_spill] sm:$0xff] %v3661_v30  ;;  %v3666_v35 = vpop.eup %2617  ;;  %2637 = vrcp.f32 %v1277_v25  ;;  %v3669_v39 = vpop.f32.mrb[14].mxu0 }
 0x112   : > { %4093 = vst [vmem:[#allocation11_spill] sm:$0xff] %v3669_v39  ;;  %v3671_v41 = vpop.eup %2619  ;;  %2639 = vpow2.f32 %v2222_v17  ;;  %v3674_v44 = vpop.f32.mrb[14].mxu1 }
 0x113   : > { %4094 = vst [vmem:[#allocation12_spill] sm:$0xff] %v3674_v44  ;;  %v3676_v47 = vpop.f32.mrb[15].mxu0  ;;  %v3678_v48 = vpop.eup %2621  ;;  %2641 = vpow2.f32 %v2221_v27 }
 0x114   : > { %4095 = vst [vmem:[#allocation13_spill] sm:$0xff] %v3676_v47  ;;  %v3681_v51 = vpop.f32.mrb[15].mxu1  ;;  %v3683_v52 = vpop.eup %2623  ;;  %2643 = vpow2.f32 %v2223_v33 }
 0x115   : > { %4096 = vst [vmem:[#allocation14_spill] sm:$0xff] %v3681_v51  ;;  %v3686_v55 = vpop.eup %2625  ;;  %2645 = vpow2.f32 %v2224_v38  ;;  %v3689_v59 = vpop.f32.mrb[16].mxu0 }
 0x116   : > { %4097 = vst [vmem:[#allocation15_spill] sm:$0xff] %v3689_v59  ;;  %v3691_v60 = vpop.eup %2627  ;;  %2647 = vpow2.f32 %v2226_v43  ;;  %v3694_v63 = vpop.f32.mrb[16].mxu1 }
 0x117   : > { %4098 = vst [vmem:[#allocation16_spill] sm:$0xff] %v3694_v63  ;;  %v3696_v7 = vpop.f32.mrb[17].mxu0  ;;  %v3698_v0 = vpop.eup %2629  ;;  %2649 = vpow2.f32 %v2225_v50 }
 0x118   : > { %4099 = vst [vmem:[#allocation17_spill] sm:$0xff] %v3696_v7  ;;  %v3701_v3 = vpop.f32.mrb[17].mxu1  ;;  %v3703_v6 = vpop.eup %2631  ;;  %2651 = vpow2.f32 %v2227_v53 }
 0x119   : > { %4100 = vst [vmem:[#allocation18_spill] sm:$0xff] %v3701_v3  ;;  %v3706_v10 = vpop.eup %2633  ;;  %2653 = vpow2.f32 %v2228_v56  ;;  %v3709_v12 = vpop.f32.mrb[18].mxu0 }
 0x11a   : > { %4101 = vst [vmem:[#allocation19_spill] sm:$0xff] %v3709_v12  ;;  %v3711_v13 = vpop.eup %2635  ;;  %2655 = vpow2.f32 %v2230_v62  ;;  %v3714_v16 = vpop.f32.mrb[18].mxu1 }
 0x11b   : > { %4102 = vst [vmem:[#allocation20_spill] sm:$0xff] %v3714_v16  ;;  %v3716_v17 = vpop.f32.mrb[19].mxu0  ;;  %v3718_v25 = vpop.eup %2637  ;;  %2657 = vpow2.f32 %v2229_v2 }
 0x11c   : > { %4103 = vst [vmem:[#allocation21_spill] sm:$0xff] %v3716_v17  ;;  %v3720_v27 = vpop.f32.mrb[19].mxu1  ;;  %v2640_v33 = vpop.eup %2639  ;;  %2659 = vpow2.f32 %v2231_v8 }
 0x11d   : > { %v2642_v38 = vpop.eup %2641  ;;  %v1279_v43 = vadd.f32 1.0, %v2640_v33  ;;  %2661 = vpow2.f32 %v2232_v11  ;;  %v3722_v50 = vpop.f32.mrb[20].mxu0 }
 0x11e   : > { %v2644_v53 = vpop.eup %2643  ;;  %v1278_v56 = vadd.f32 1.0, %v2642_v38  ;;  %2663 = vpow2.f32 %v2234_v15  ;;  %v3724_v62 = vpop.f32.mrb[20].mxu1 }
 0x11f   : > { %v3726_v19 = vpop.f32.mrb[21].mxu0  ;;  %v2646_v14 = vpop.eup %2645  ;;  %2665 = vrcp.f32 %v1279_v43  ;;  %v1280_v9 = vadd.f32 1.0, %v2644_v53 }
 0x120   : > { %4104 = vst [vmem:[#allocation22_spill] sm:$0xff] %v3726_v19  ;;  %v3728_v2 = vpop.f32.mrb[21].mxu1  ;;  %v2648_v5 = vpop.eup %2647  ;;  %2667 = vrcp.f32 %v1278_v56  ;;  %v1281_v8 = vadd.f32 1.0, %v2646_v14 }
 0x121   : > { %4105 = vst [vmem:[#allocation23_spill] sm:$0xff] %v3728_v2  ;;  %v2650_v4 = vpop.eup %2649  ;;  %2669 = vrcp.f32 %v1280_v9  ;;  %v1283_v11 = vadd.f32 1.0, %v2648_v5  ;;  %v3730_v33 = vpop.f32.mrb[22].mxu0 }
 0x122   : > { %4106 = vst [vmem:[#allocation24_spill] sm:$0xff] %v3730_v33  ;;  %v2652_v1 = vpop.eup %2651  ;;  %2671 = vrcp.f32 %v1281_v8  ;;  %v1282_v15 = vadd.f32 1.0, %v2650_v4  ;;  %v3732_v38 = vpop.f32.mrb[22].mxu1 }
 0x123   : > { %4107 = vst [vmem:[#allocation25_spill] sm:$0xff] %v3732_v38  ;;  %v3734_v61 = vpop.f32.mrb[23].mxu0  ;;  %v2654_v19 = vpop.eup %2653  ;;  %2673 = vrcp.f32 %v1283_v11  ;;  %v1284_v43 = vadd.f32 1.0, %v2652_v1 }
 0x124   : > { %4108 = vst [vmem:[#allocation26_spill] sm:$0xff] %v3734_v61  ;;  %v3736_v53 = vpop.f32.mrb[23].mxu1  ;;  %v2656_v2 = vpop.eup %2655  ;;  %2675 = vrcp.f32 %v1282_v15  ;;  %v1285_v14 = vadd.f32 1.0, %v2654_v19  ;;  %v2233_v15 = vmul.f32 -1.442695, %v3656_v22 }
 0x125   : > { %4109 = vst [vmem:[#allocation27_spill] sm:$0xff] %v3736_v53  ;;  %v2658_v56 = vpop.eup %2657  ;;  %2677 = vrcp.f32 %v1284_v43  ;;  %v1287_v5 = vadd.f32 1.0, %v2656_v2  ;;  %v3738_v9 = vpop.f32.mrb[24].mxu0 }
 0x126   : > { %v2660_v33 = vpop.eup %2659  ;;  %2679 = vrcp.f32 %v1285_v14  ;;  %v1286_v4 = vadd.f32 1.0, %v2658_v56  ;;  %v3740_v8 = vpop.f32.mrb[24].mxu1  ;;  %v2235_v14 = vmul.f32 -1.442695, %v3661_v30 }
 0x127   : > { %4110 = vst [vmem:[#allocation28_spill] sm:$0xff] %v3740_v8  ;;  %v3742_v38 = vpop.f32.mrb[25].mxu0  ;;  %v2662_v61 = vpop.eup %2661  ;;  %2681 = vrcp.f32 %v1287_v5  ;;  %v1288_v1 = vadd.f32 1.0, %v2660_v33  ;;  %v2236_v33 = vmul.f32 -1.442695, %v3669_v39 }
 0x128   : > { %4111 = vst [vmem:[#allocation29_spill] sm:$0xff] %v3742_v38  ;;  %v3744_v11 = vpop.f32.mrb[25].mxu1  ;;  %v2664_v53 = vpop.eup %2663  ;;  %2683 = vrcp.f32 %v1286_v4  ;;  %v1289_v19 = vadd.f32 1.0, %v2662_v61  ;;  %v2238_v4 = vmul.f32 -1.442695, %v3674_v44 }
 0x129   : > { %4112 = vst [vmem:[#allocation30_spill] sm:$0xff] %v3744_v11  ;;  %v3747_v2 = vpop.eup %2665  ;;  %2685 = vrcp.f32 %v1288_v1  ;;  %v1291_v43 = vadd.f32 1.0, %v2664_v53  ;;  %v3750_v56 = vpop.f32.mrb[26].mxu0 }
 0x12a   : > { %4113 = vst [vmem:[#allocation31_spill] sm:$0xff] %v3750_v56  ;;  %v3752_v8 = vpop.eup %2667  ;;  %2687 = vrcp.f32 %v1289_v19  ;;  %v3755_v5 = vpop.f32.mrb[26].mxu1  ;;  %v2237_v56 = vmul.f32 -1.442695, %v3676_v47  ;;  %v2239_v19 = vmul.f32 -1.442695, %v3681_v51 }
 0x12b   : > { %4114 = vst [vmem:[#allocation32_spill] sm:$0xff] %v3755_v5  ;;  %v3757_v11 = vpop.f32.mrb[27].mxu0  ;;  %v3759_v61 = vpop.eup %2669  ;;  %2689 = vrcp.f32 %v1291_v43  ;;  %v2240_v43 = vmul.f32 -1.442695, %v3689_v59 }
 0x12c   : > { %4115 = vst [vmem:[#allocation33_spill] sm:$0xff] %v3757_v11  ;;  %v3762_v1 = vpop.f32.mrb[27].mxu1  ;;  %v3764_v53 = vpop.eup %2671  ;;  %2691 = vpow2.f32 %v2233_v15  ;;  %v2242_v15 = vmul.f32 -1.442695, %v3694_v63 }
 0x12d   : > { %4116 = vst [vmem:[#allocation34_spill] sm:$0xff] %v3762_v1  ;;  %v3767_v30 = vpop.eup %2673  ;;  %2693 = vpow2.f32 %v2235_v14  ;;  %v3770_v5 = vpop.f32.mrb[28].mxu0 }
 0x12e   : > { %4117 = vst [vmem:[#allocation35_spill] sm:$0xff] %v3770_v5  ;;  %v3772_v11 = vpop.eup %2675  ;;  %2695 = vpow2.f32 %v2236_v33  ;;  %v3775_v44 = vpop.f32.mrb[28].mxu1  ;;  %v2241_v5 = vmul.f32 -1.442695, %v3696_v7  ;;  %v2243_v33 = vmul.f32 -1.442695, %v3701_v3 }
 0x12f   : > { %4118 = vst [vmem:[#allocation36_spill] sm:$0xff] %v3775_v44  ;;  %v3777_v1 = vpop.f32.mrb[29].mxu0  ;;  %v3779_v39 = vpop.eup %2677  ;;  %2697 = vpow2.f32 %v2238_v4  ;;  %v2244_v4 = vmul.f32 -1.442695, %v3709_v12 }
 0x130   : > { %4119 = vst [vmem:[#allocation37_spill] sm:$0xff] %v3777_v1  ;;  %v3782_v47 = vpop.f32.mrb[29].mxu1  ;;  %v3784_v14 = vpop.eup %2679  ;;  %2699 = vpow2.f32 %v2237_v56  ;;  %v2246_v56 = vmul.f32 -1.442695, %v3714_v16 }
 0x131   : > { %4120 = vst [vmem:[#allocation38_spill] sm:$0xff] %v3782_v47  ;;  %v3787_v51 = vpop.eup %2681  ;;  %2701 = vpow2.f32 %v2239_v19  ;;  %v3790_v44 = vpop.f32.mrb[30].mxu0 }
 0x132   : > { %4121 = vst [vmem:[#allocation39_spill] sm:$0xff] %v3790_v44  ;;  %v3792_v1 = vpop.eup %2683  ;;  %2703 = vpow2.f32 %v2240_v43  ;;  %v3795_v63 = vpop.f32.mrb[30].mxu1  ;;  %v1457_v44 = vmul.f32 %v3658_v23, %v3590_v18  ;;  %v2245_v43 = vmul.f32 -1.442695, %v3716_v17  ;;  %v1461_v18 = vmul.f32 %v3678_v48, %v3602_v26 }
 0x133   : > { %4122 = vst [vmem:[#allocation40_spill] sm:$0xff] %v3795_v63  ;;  %v3797_v47 = vpop.f32.mrb[31].mxu0  ;;  %v3799_v59 = vpop.eup %2685  ;;  %2705 = vpow2.f32 %v2242_v15  ;;  %v1458_v15 = vmul.f32 %v3666_v35, %v3595_v21  ;;  %v1460_v63 = vmul.f32 %v3671_v41, %v3599_v24  ;;  %v1463_v23 = vmul.f32 %v3683_v52, %v3605_v28 }
 0x134   : > { %4123 = vst [vmem:[#allocation41_spill] sm:$0xff] %v3797_v47  ;;  %v3802_v7 = vpop.f32.mrb[31].mxu1  ;;  %v3804_v19 = vpop.eup %2687  ;;  %2707 = vpow2.f32 %v2241_v5  ;;  %v1459_v47 = vmul.f32 %v3663_v31, %v3593_v20  ;;  %v1462_v41 = vmul.f32 %v3686_v55, %v3607_v29  ;;  %v1464_v28 = vmul.f32 %v3691_v60, %v3611_v32 }
 0x135   : > { %4124 = vst [vmem:[#allocation42_spill] sm:$0xff] %v3802_v7  ;;  %v3809_v12 = vpop.eup %2689  ;;  %2709 = vpow2.f32 %v2243_v33  ;;  %v817_v7 = vpop.f32.mrb[32].mxu0 }
 0x136   : > { %v2692_v16 = vpop.eup %2691  ;;  %2711 = vpow2.f32 %v2244_v4  ;;  %v1521_v5 = vmul.f32 %v1457_v44, %v817_v7  ;;  %v978_v17 = vpop.f32.mrb[32].mxu1  ;;  %v1465_v44 = vmul.f32 %v3698_v0, %v3614_v34  ;;  %v1466_v4 = vmul.f32 %v3706_v10, %v3619_v37 }
 0x137   : > { %v819_v3 = vpop.f32.mrb[33].mxu0  ;;  %v2694_v20 = vpop.eup %2693  ;;  %v1290_v31 = vadd.f32 1.0, %v2692_v16  ;;  %2713 = vpow2.f32 %v2246_v56  ;;  %v1523_v21 = vmul.f32 %v1459_v47, %v978_v17 }
 0x138   : > { %v1522_v35 = vmul.f32 %v1458_v15, %v819_v3  ;;  %v980_v38 = vpop.f32.mrb[33].mxu1  ;;  %v2696_v24 = vpop.eup %2695  ;;  %v1292_v33 = vadd.f32 1.0, %v2694_v20  ;;  %2715 = vpow2.f32 %v2245_v43  ;;  %v1467_v3 = vmul.f32 %v3703_v6, %v3617_v36 }
 0x139   : > { %v1524_v26 = vmul.f32 %v1460_v63, %v980_v38  ;;  %v2698_v48 = vpop.eup %2697  ;;  %2717 = vrcp.f32 %v1290_v31  ;;  %v1293_v52 = vadd.f32 1.0, %v2696_v24  ;;  %v823_v7 = vpop.f32.mrb[34].mxu0  ;;  %v1468_v43 = vmul.f32 %v3711_v13, %v3623_v40 }
 0x13a   : > { %1729 = vmatprep.mubr.f32.mxu0 %v1522_v35  ;;  %v2700_v47 = vpop.eup %2699  ;;  %2719 = vrcp.f32 %v1292_v33  ;;  %v1295_v29 = vadd.f32 1.0, %v2698_v48  ;;  %v1525_v55 = vmul.f32 %v1461_v18, %v823_v7  ;;  %v984_v16 = vpop.f32.mrb[34].mxu1  ;;  %v1469_v15 = vmul.f32 %v3718_v25, %v3626_v42 }
 0x13b   : > { %1874 = vmatprep.mubr.f32.mxu1 %v1524_v26  ;;  %v825_v63 = vpop.f32.mrb[35].mxu0  ;;  %1730 = vmatmul.mubr.f32.vlgmr.msra.gmra.mrb[64].mxu0 %v1521_v5  ;;  %v2702_v17 = vpop.eup %2701  ;;  %2721 = vrcp.f32 %v1293_v52  ;;  %v1294_v32 = vadd.f32 1.0, %v2700_v47  ;;  %v1527_v60 = vmul.f32 %v1463_v23, %v984_v16  ;;  %v2247_v31 = vmul.f32 -1.442695, %v3720_v27 }
 0x13c   : > { %v1526_v34 = vmul.f32 %v1462_v41, %v825_v63  ;;  %v986_v0 = vpop.f32.mrb[35].mxu1  ;;  %1875 = vmatmul.mubr.f32.vlgmr.msra.gmra.mrb[64].mxu1 %v1523_v21  ;;  %v2704_v38 = vpop.eup %2703  ;;  %2723 = vrcp.f32 %v1295_v29  ;;  %v1296_v36 = vadd.f32 1.0, %v2702_v17  ;;  %v2248_v33 = vmul.f32 -1.442695, %v3722_v50 }
 0x13d   : > { %v1528_v6 = vmul.f32 %v1464_v28, %v986_v0  ;;  %v2706_v56 = vpop.eup %2705  ;;  %2725 = vrcp.f32 %v1294_v32  ;;  %v1297_v18 = vadd.f32 1.0, %v2704_v38  ;;  %v829_v23 = vpop.f32.mrb[36].mxu0  ;;  %v1471_v28 = vmul.f32 %v3747_v2, %v3629_v45 }
 0x13e   : > { %1734 = vmatprep.mubr.f32.mxu0 %v1526_v34  ;;  %v2708_v5 = vpop.eup %2707  ;;  %2727 = vrcp.f32 %v1296_v36  ;;  %v1299_v20 = vadd.f32 1.0, %v2706_v56  ;;  %v1529_v37 = vmul.f32 %v1465_v44, %v829_v23  ;;  %v990_v10 = vpop.f32.mrb[36].mxu1  ;;  %v1470_v44 = vmul.f32 %v3752_v8, %v3631_v46 }
 0x13f   : > { %1879 = vmatprep.mubr.f32.mxu1 %v1528_v6  ;;  %v831_v21 = vpop.f32.mrb[37].mxu0  ;;  %1735 = vmatmul.mubr.f32.gmra.mrb[66].mxu0 %v1525_v55  ;;  %v2710_v35 = vpop.eup %2709  ;;  %2729 = vrcp.f32 %v1297_v18  ;;  %v1298_v40 = vadd.f32 1.0, %v2708_v5  ;;  %v1531_v13 = vmul.f32 %v1467_v3, %v990_v10  ;;  %v1472_v3 = vmul.f32 %v3759_v61, %v3633_v49 }
 0x140   : > { %v1530_v24 = vmul.f32 %v1466_v4, %v831_v21  ;;  %v992_v42 = vpop.f32.mrb[37].mxu1  ;;  %1880 = vmatmul.mubr.f32.gmra.mrb[66].mxu1 %v1527_v60  ;;  %v2712_v25 = vpop.eup %2711  ;;  %2731 = vrcp.f32 %v1299_v20  ;;  %v1300_v41 = vadd.f32 1.0, %v2710_v35  ;;  %v1473_v49 = vmul.f32 %v3764_v53, %v3635_v54  ;;  %v4125_v4 = vld [vmem:[#allocation22_spill] sm:$0xff]  ;;  %v4126_v54 = vld [vmem:[#allocation3_spill] sm:$0xff]  ;;  %v4130_v21 = vld [vmem:[#allocation25_spill] sm:$0xff] }
 0x141   : > { %v1532_v26 = vmul.f32 %v1468_v43, %v992_v42  ;;  %v2714_v48 = vpop.eup %2713  ;;  %2733 = vrcp.f32 %v1298_v40  ;;  %v1301_v52 = vadd.f32 1.0, %v2712_v25  ;;  %v835_v7 = vpop.f32.mrb[38].mxu0  ;;  %v2250_v61 = vmul.f32 -1.442695, %v3724_v62  ;;  %v4127_v43 = vld [vmem:[#allocation23_spill] sm:$0xff]  ;;  %v4132_v25 = vld [vmem:[#allocation6_spill] sm:$0xff] }
 0x142   : > { %1739 = vmatprep.mubr.f32.mxu0 %v1530_v24  ;;  %v2716_v47 = vpop.eup %2715  ;;  %2735 = vrcp.f32 %v1300_v41  ;;  %v1303_v29 = vadd.f32 1.0, %v2714_v48  ;;  %v1533_v55 = vmul.f32 %v1469_v15, %v835_v7  ;;  %v996_v16 = vpop.f32.mrb[38].mxu1  ;;  %v1475_v0 = vmul.f32 %v3767_v30, %v3637_v57  ;;  %v4131_v24 = vld [vmem:[#allocation5_spill] sm:$0xff] }
 0x143   : > { %1884 = vmatprep.mubr.f32.mxu1 %v1532_v26  ;;  %v837_v63 = vpop.f32.mrb[39].mxu0  ;;  %1740 = vmatmul.mubr.f32.gmra.mrb[68].mxu0 %v1529_v37  ;;  %v3843_v17 = vpop.eup %2717  ;;  %2737 = vrcp.f32 %v1301_v52  ;;  %v1302_v45 = vadd.f32 1.0, %v2716_v47  ;;  %v1535_v46 = vmul.f32 %v1471_v28, %v996_v16  ;;  %v1474_v38 = vmul.f32 %v3772_v11, %v3639_v58  ;;  %v4128_v58 = vld [vmem:[#allocation24_spill] sm:$0xff]  ;;  %v4135_v52 = vld [vmem:[#allocation27_spill] sm:$0xff] }
 0x144   : > { %v1534_v8 = vmul.f32 %v1470_v44, %v837_v63  ;;  %v998_v2 = vpop.f32.mrb[39].mxu1  ;;  %1885 = vmatmul.mubr.f32.gmra.mrb[68].mxu1 %v1531_v13  ;;  %v3845_v32 = vpop.eup %2719  ;;  %2739 = vrcp.f32 %v1303_v29  ;;  %v2249_v36 = vmul.f32 -1.442695, %v4125_v4  ;;  %v1476_v53 = vmul.f32 %v3779_v39, %v4126_v54  ;;  %v4129_v39 = vld [vmem:[#allocation4_spill] sm:$0xff] }
 0x145   : > { %v1536_v60 = vmul.f32 %v1472_v3, %v998_v2  ;;  %v3850_v34 = vpop.eup %2721  ;;  %2741 = vrcp.f32 %v1302_v45  ;;  %v841_v6 = vpop.f32.mrb[40].mxu0  ;;  %v2251_v15 = vmul.f32 -1.442695, %v4127_v43  ;;  %v2252_v11 = vmul.f32 -1.442695, %v4128_v58 }
 0x146   : > { %1744 = vmatprep.mubr.f32.mxu0 %v1534_v8  ;;  %v3857_v56 = vpop.eup %2723  ;;  %2743 = vpow2.f32 %v2247_v31  ;;  %v1537_v18 = vmul.f32 %v1473_v49, %v841_v6  ;;  %v1002_v23 = vpop.f32.mrb[40].mxu1  ;;  %v1477_v31 = vmul.f32 %v3784_v14, %v4129_v39  ;;  %v2254_v35 = vmul.f32 -1.442695, %v4130_v21  ;;  %v4134_v14 = vld [vmem:[#allocation7_spill] sm:$0xff]  ;;  %v4137_v8 = vld [vmem:[#allocation28_spill] sm:$0xff] }
 0x147   : > { %1889 = vmatprep.mubr.f32.mxu1 %v1536_v60  ;;  %v843_v57 = vpop.f32.mrb[41].mxu0  ;;  %1745 = vmatmul.mubr.f32.gmra.mrb[70].mxu0 %v1533_v55  ;;  %v3862_v30 = vpop.eup %2725  ;;  %2745 = vpow2.f32 %v2248_v33  ;;  %v1539_v5 = vmul.f32 %v1475_v0, %v1002_v23  ;;  %v1479_v42 = vmul.f32 %v3787_v51, %v4131_v24  ;;  %v1478_v41 = vmul.f32 %v3792_v1, %v4132_v25  ;;  %v4133_v33 = vld [vmem:[#allocation26_spill] sm:$0xff]  ;;  %v4138_v60 = vld [vmem:[#allocation9_spill] sm:$0xff]  ;;  %v4142_v39 = vld [vmem:[#allocation11_spill] sm:$0xff] }
 0x148   : > { %v1538_v20 = vmul.f32 %v1474_v38, %v843_v57  ;;  %v1004_v37 = vpop.f32.mrb[41].mxu1  ;;  %1890 = vmatmul.mubr.f32.gmra.mrb[70].mxu1 %v1535_v46  ;;  %v3865_v10 = vpop.eup %2727  ;;  %2747 = vpow2.f32 %v2250_v61  ;;  %v2253_v26 = vmul.f32 -1.442695, %v4133_v33  ;;  %v1480_v44 = vmul.f32 %v3799_v59, %v4134_v14  ;;  %v4136_v59 = vld [vmem:[#allocation8_spill] sm:$0xff]  ;;  %v4145_v14 = vld [vmem:[#allocation14_spill] sm:$0xff] }
 0x149   : > { %v1540_v40 = vmul.f32 %v1476_v53, %v1004_v37  ;;  %v3870_v13 = vpop.eup %2729  ;;  %2749 = vpow2.f32 %v2249_v36  ;;  %v847_v48 = vpop.f32.mrb[42].mxu0  ;;  %v2255_v7 = vmul.f32 -1.442695, %v4135_v52  ;;  %v2256_v1 = vmul.f32 -1.442695, %v3738_v9  ;;  %v4139_v36 = vld [vmem:[#allocation29_spill] sm:$0xff] }
 0x14a   : > { %1749 = vmatprep.mubr.f32.mxu0 %v1538_v20  ;;  %v3877_v28 = vpop.eup %2731  ;;  %2751 = vpow2.f32 %v2251_v15  ;;  %v1541_v47 = vmul.f32 %v1477_v31, %v847_v48  ;;  %v1008_v3 = vpop.f32.mrb[42].mxu1  ;;  %v1481_v46 = vmul.f32 %v3804_v19, %v4136_v59  ;;  %v2258_v2 = vmul.f32 -1.442695, %v4137_v8  ;;  %v4140_v19 = vld [vmem:[#allocation10_spill] sm:$0xff] }
 0x14b   : > { %1894 = vmatprep.mubr.f32.mxu1 %v1540_v40  ;;  %v849_v51 = vpop.f32.mrb[43].mxu0  ;;  %1750 = vmatmul.mubr.f32.gmra.mrb[72].mxu0 %v1537_v18  ;;  %v3882_v29 = vpop.eup %2733  ;;  %2753 = vpow2.f32 %v2252_v11  ;;  %v1543_v55 = vmul.f32 %v1479_v42, %v1008_v3  ;;  %v1483_v0 = vmul.f32 %v3809_v12, %v4138_v60  ;;  %v1482_v38 = vmul.f32 %v3843_v17, %v3656_v22  ;;  %v4141_v18 = vld [vmem:[#allocation30_spill] sm:$0xff]  ;;  %v4143_v40 = vld [vmem:[#allocation12_spill] sm:$0xff]  ;;  %v4144_v42 = vld [vmem:[#allocation13_spill] sm:$0xff] }
 0x14c   : > { %v1542_v16 = vmul.f32 %v1478_v41, %v849_v51  ;;  %v1010_v63 = vpop.f32.mrb[43].mxu1  ;;  %1895 = vmatmul.mubr.f32.gmra.mrb[72].mxu1 %v1539_v5  ;;  %v3885_v45 = vpop.eup %2735  ;;  %2755 = vpow2.f32 %v2254_v35  ;;  %v2257_v6 = vmul.f32 -1.442695, %v4139_v36  ;;  %v1484_v15 = vmul.f32 %v3845_v32, %v4140_v19 }
 0x14d   : > { %v1544_v49 = vmul.f32 %v1480_v44, %v1010_v63  ;;  %v3890_v61 = vpop.eup %2737  ;;  %2757 = vpow2.f32 %v2253_v26  ;;  %v853_v54 = vpop.f32.mrb[44].mxu0  ;;  %v2259_v23 = vmul.f32 -1.442695, %v4141_v18  ;;  %v1485_v31 = vmul.f32 %v3850_v34, %v4142_v39  ;;  %v4146_v63 = vld [vmem:[#allocation15_spill] sm:$0xff] }
 0x14e   : > { %1754 = vmatprep.mubr.f32.mxu0 %v1542_v16  ;;  %v3897_v53 = vpop.eup %2739  ;;  %2759 = vpow2.f32 %v2255_v7  ;;  %v1545_v57 = vmul.f32 %v1481_v46, %v853_v54  ;;  %v1014_v11 = vpop.f32.mrb[44].mxu1  ;;  %v1487_v24 = vmul.f32 %v3857_v56, %v4143_v40  ;;  %v1486_v25 = vmul.f32 %v3862_v30, %v4144_v42  ;;  %v4150_v39 = vld [vmem:[#allocation19_spill] sm:$0xff]  ;;  %v4151_v40 = vld [vmem:[#allocation20_spill] sm:$0xff]  ;;  %v4152_v42 = vld [vmem:[#allocation21_spill] sm:$0xff] }
 0x14f   : > { %1899 = vmatprep.mubr.f32.mxu1 %v1544_v49  ;;  %v855_v12 = vpop.f32.mrb[45].mxu0  ;;  %1755 = vmatmul.mubr.f32.gmra.mrb[74].mxu0 %v1541_v47  ;;  %v3902_v5 = vpop.eup %2741  ;;  %2761 = vpow2.f32 %v2256_v1  ;;  %v1547_v22 = vmul.f32 %v1483_v0, %v1014_v11  ;;  %v1488_v44 = vmul.f32 %v3865_v10, %v4145_v14  ;;  %v1489_v59 = vmul.f32 %v3870_v13, %v4146_v63  ;;  %v4147_v49 = vld [vmem:[#allocation16_spill] sm:$0xff]  ;;  %v4148_v0 = vld [vmem:[#allocation17_spill] sm:$0xff] }
 0x150   : > { %v1546_v17 = vmul.f32 %v1482_v38, %v855_v12  ;;  %v1016_v20 = vpop.f32.mrb[45].mxu1  ;;  %1900 = vmatmul.mubr.f32.gmra.mrb[74].mxu1 %v1543_v55  ;;  %v2744_v37 = vpop.eup %2743  ;;  %2763 = vpow2.f32 %v2258_v2  ;;  %v1491_v60 = vmul.f32 %v3877_v28, %v4147_v49  ;;  %v1490_v38 = vmul.f32 %v3882_v29, %v4148_v0  ;;  %v4154_v63 = vld [vmem:[#allocation32_spill] sm:$0xff]  ;;  %v4155_v49 = vld [vmem:[#allocation33_spill] sm:$0xff] }
 0x151   : > { %v1548_v32 = vmul.f32 %v1484_v15, %v1016_v20  ;;  %v2746_v35 = vpop.eup %2745  ;;  %v1304_v41 = vadd.f32 1.0, %v2744_v37  ;;  %2765 = vpow2.f32 %v2257_v6  ;;  %v859_v26 = vpop.f32.mrb[46].mxu0  ;;  %v4149_v15 = vld [vmem:[#allocation18_spill] sm:$0xff] }
 0x152   : > { %1759 = vmatprep.mubr.f32.mxu0 %v1546_v17  ;;  %v2748_v48 = vpop.eup %2747  ;;  %v1305_v7 = vadd.f32 1.0, %v2746_v35  ;;  %2767 = vpow2.f32 %v2259_v23  ;;  %v1549_v34 = vmul.f32 %v1485_v31, %v859_v26  ;;  %v1020_v47 = vpop.f32.mrb[46].mxu1  ;;  %v1492_v23 = vmul.f32 %v3885_v45, %v4149_v15 }
 0x153   : > { %1904 = vmatprep.mubr.f32.mxu1 %v1548_v32  ;;  %v861_v3 = vpop.f32.mrb[47].mxu0  ;;  %1760 = vmatmul.mubr.f32.gmra.mrb[76].mxu0 %v1545_v57  ;;  %v2750_v51 = vpop.eup %2749  ;;  %2769 = vrcp.f32 %v1304_v41  ;;  %v1307_v56 = vadd.f32 1.0, %v2748_v48  ;;  %v1551_v1 = vmul.f32 %v1487_v24, %v1020_v47  ;;  %v1493_v31 = vmul.f32 %v3890_v61, %v4150_v39 }
 0x154   : > { %v1550_v30 = vmul.f32 %v1486_v25, %v861_v3  ;;  %v1022_v55 = vpop.f32.mrb[47].mxu1  ;;  %1905 = vmatmul.mubr.f32.gmra.mrb[76].mxu1 %v1547_v22  ;;  %v2752_v16 = vpop.eup %2751  ;;  %2771 = vrcp.f32 %v1305_v7  ;;  %v1306_v10 = vadd.f32 1.0, %v2750_v51  ;;  %v1495_v24 = vmul.f32 %v3897_v53, %v4151_v40 }
 0x155   : > { %v1552_v46 = vmul.f32 %v1488_v44, %v1022_v55  ;;  %v2754_v2 = vpop.eup %2753  ;;  %2773 = vrcp.f32 %v1307_v56  ;;  %v1308_v6 = vadd.f32 1.0, %v2752_v16  ;;  %v865_v54 = vpop.f32.mrb[48].mxu0  ;;  %v1494_v25 = vmul.f32 %v3902_v5, %v4152_v42 }
 0x156   : > { %1764 = vmatprep.mubr.f32.mxu0 %v1550_v30  ;;  %v2756_v19 = vpop.eup %2755  ;;  %2775 = vrcp.f32 %v1306_v10  ;;  %v1309_v13 = vadd.f32 1.0, %v2754_v2  ;;  %v1553_v57 = vmul.f32 %v1489_v59, %v865_v54  ;;  %v1026_v11 = vpop.f32.mrb[48].mxu1  ;;  %v2262_v59 = vmul.f32 -1.442695, %v4154_v63 }
 0x157   : > { %1909 = vmatprep.mubr.f32.mxu1 %v1552_v46  ;;  %v867_v12 = vpop.f32.mrb[49].mxu0  ;;  %1765 = vmatmul.mubr.f32.gmra.mrb[78].mxu0 %v1549_v34  ;;  %v2758_v22 = vpop.eup %2757  ;;  %2777 = vrcp.f32 %v1308_v6  ;;  %v1311_v28 = vadd.f32 1.0, %v2756_v19  ;;  %v1555_v17 = vmul.f32 %v1491_v60, %v1026_v11  ;;  %v2261_v60 = vmul.f32 -1.442695, %v4155_v49  ;;  %v4156_v19 = vld [vmem:[#allocation34_spill] sm:$0xff]  ;;  %v4157_v11 = vld [vmem:[#allocation35_spill] sm:$0xff] }
 0x158   : > { %v1554_v29 = vmul.f32 %v1490_v38, %v867_v12  ;;  %v1028_v20 = vpop.f32.mrb[49].mxu1  ;;  %1910 = vmatmul.mubr.f32.gmra.mrb[78].mxu1 %v1551_v1  ;;  %v2760_v37 = vpop.eup %2759  ;;  %2779 = vrcp.f32 %v1309_v13  ;;  %v1310_v45 = vadd.f32 1.0, %v2758_v22  ;;  %v4153_v1 = vld [vmem:[#allocation31_spill] sm:$0xff]  ;;  %v2263_v15 = vmul.f32 -1.442695, %v4156_v19 }
 0x159   : > { %v1556_v32 = vmul.f32 %v1492_v23, %v1028_v20  ;;  %v2762_v35 = vpop.eup %2761  ;;  %2781 = vrcp.f32 %v1311_v28  ;;  %v1312_v41 = vadd.f32 1.0, %v2760_v37  ;;  %v871_v26 = vpop.f32.mrb[50].mxu0  ;;  %v2260_v30 = vmul.f32 -1.442695, %v4153_v1 }
 0x15a   : > { %1769 = vmatprep.mubr.f32.mxu0 %v1554_v29  ;;  %v2764_v48 = vpop.eup %2763  ;;  %2783 = vrcp.f32 %v1310_v45  ;;  %v1313_v14 = vadd.f32 1.0, %v2762_v35  ;;  %v1557_v44 = vmul.f32 %v1493_v31, %v871_v26  ;;  %v1032_v7 = vpop.f32.mrb[50].mxu1  ;;  %v2264_v12 = vmul.f32 -1.442695, %v4157_v11  ;;  %v4159_v31 = vld [vmem:[#allocation37_spill] sm:$0xff] }
 0x15b   : > { %1914 = vmatprep.mubr.f32.mxu1 %v1556_v32  ;;  %v873_v61 = vpop.f32.mrb[51].mxu0  ;;  %1770 = vmatmul.mubr.f32.gmra.mrb[80].mxu0 %v1553_v57  ;;  %v2766_v34 = vpop.eup %2765  ;;  %2785 = vrcp.f32 %v1312_v41  ;;  %v1315_v47 = vadd.f32 1.0, %v2764_v48  ;;  %v1559_v3 = vmul.f32 %v1495_v24, %v1032_v7  ;;  %v2265_v45 = vmul.f32 -1.442695, %v4159_v31 }
 0x15c   : > { %v1558_v53 = vmul.f32 %v1494_v25, %v873_v61  ;;  %v1034_v51 = vpop.f32.mrb[51].mxu1  ;;  %1915 = vmatmul.mubr.f32.gmra.mrb[80].mxu1 %v1555_v17  ;;  %v2768_v5 = vpop.eup %2767  ;;  %2787 = vrcp.f32 %v1313_v14  ;;  %v1314_v56 = vadd.f32 1.0, %v2766_v34  ;;  %v4158_v17 = vld [vmem:[#allocation36_spill] sm:$0xff] }
 0x15d   : > { %v2770_v55 = vpop.eup %2769  ;;  %2789 = vrcp.f32 %v1315_v47  ;;  %v1316_v16 = vadd.f32 1.0, %v2768_v5  ;;  %v877_v10 = vpop.f32.mrb[52].mxu0  ;;  %v2266_v29 = vmul.f32 -1.442695, %v4158_v17  ;;  %v4162_v34 = vld [vmem:[#allocation40_spill] sm:$0xff]  ;;  %v4163_v5 = vld [vmem:[#allocation41_spill] sm:$0xff] }
 0x15e   : > { %1774 = vmatprep.mubr.f32.mxu0 %v1558_v53  ;;  %v2772_v46 = vpop.eup %2771  ;;  %v1496_v2 = vmul.f32 %v2770_v55, %v3720_v27  ;;  %2791 = vrcp.f32 %v1314_v56  ;;  %v1038_v0 = vpop.f32.mrb[52].mxu1  ;;  %v2270_v47 = vmul.f32 -1.442695, %v4162_v34  ;;  %v2269_v56 = vmul.f32 -1.442695, %v4163_v5 }
 0x15f   : > { %v879_v38 = vpop.f32.mrb[53].mxu0  ;;  %1775 = vmatmul.mubr.f32.gmra.mrb[82].mxu0 %v1557_v44  ;;  %v2774_v6 = vpop.eup %2773  ;;  %v1497_v54 = vmul.f32 %v2772_v46, %v3722_v50  ;;  %2793 = vrcp.f32 %v1316_v16 }
 0x160   : > { %v1040_v23 = vpop.f32.mrb[53].mxu1  ;;  %v2776_v13 = vpop.eup %2775  ;;  %v1499_v57 = vmul.f32 %v2774_v6, %v3724_v62  ;;  %2795 = vpow2.f32 %v2260_v30  ;;  %v1560_v27 = vmul.f32 %v1496_v2, %v1034_v51 }
 0x161   : > { %v2778_v22 = vpop.eup %2777  ;;  %v1498_v28 = vmul.f32 %v2776_v13, %v4125_v4  ;;  %2797 = vpow2.f32 %v2262_v59  ;;  %v1561_v20 = vmul.f32 %v1497_v54, %v877_v10  ;;  %v883_v37 = vpop.f32.mrb[54].mxu0  ;;  %v4160_v4 = vld [vmem:[#allocation38_spill] sm:$0xff] }
 0x162   : > { %v2780_v50 = vpop.eup %2779  ;;  %v1500_v39 = vmul.f32 %v2778_v22, %v4127_v43  ;;  %2799 = vpow2.f32 %v2261_v60  ;;  %v1563_v32 = vmul.f32 %v1499_v57, %v1038_v0  ;;  %1919 = vmatprep.mubr.f32.mxu1 %v1560_v27  ;;  %v1044_v62 = vpop.f32.mrb[54].mxu1  ;;  %v2267_v42 = vmul.f32 -1.442695, %v4160_v4  ;;  %v4161_v43 = vld [vmem:[#allocation39_spill] sm:$0xff]  ;;  %v4164_v59 = vld [vmem:[#allocation42_spill] sm:$0xff] }
 0x163   : > { %v885_v35 = vpop.f32.mrb[55].mxu0  ;;  %v2782_v40 = vpop.eup %2781  ;;  %v1501_v24 = vmul.f32 %v2780_v50, %v4128_v58  ;;  %2801 = vpow2.f32 %v2263_v15  ;;  %v1562_v25 = vmul.f32 %v1498_v28, %v879_v38  ;;  %1920 = vmatmul.mubr.f32.gmra.mrb[82].mxu1 %v1559_v3  ;;  %v2268_v14 = vmul.f32 -1.442695, %v4161_v43 }
 0x164   : > { %v1046_v41 = vpop.f32.mrb[55].mxu1  ;;  %v2784_v26 = vpop.eup %2783  ;;  %v1503_v48 = vmul.f32 %v2782_v40, %v4130_v21  ;;  %2803 = vpow2.f32 %v2264_v12  ;;  %v1564_v44 = vmul.f32 %v1500_v39, %v1040_v23  ;;  %v2271_v10 = vmul.f32 -1.442695, %v4164_v59 }
 0x165   : > { %v2786_v7 = vpop.eup %2785  ;;  %v1502_v61 = vmul.f32 %v2784_v26, %v4133_v33  ;;  %2805 = vpow2.f32 %v2266_v29  ;;  %v1565_v58 = vmul.f32 %v1501_v24, %v883_v37  ;;  %1779 = vmatprep.mubr.f32.mxu0 %v1562_v25  ;;  %v889_v53 = vpop.f32.mrb[56].mxu0 }
 0x166   : > { %v2788_v51 = vpop.eup %2787  ;;  %v1504_v3 = vmul.f32 %v2786_v7, %v4135_v52  ;;  %2807 = vpow2.f32 %v2265_v45  ;;  %v1567_v21 = vmul.f32 %v1503_v48, %v1044_v62  ;;  %1924 = vmatprep.mubr.f32.mxu1 %v1564_v44  ;;  %1780 = vmatmul.mubr.f32.gmra.mrb[84].mxu0 %v1561_v20  ;;  %v1050_v30 = vpop.f32.mrb[56].mxu1 }
 0x167   : > { %v891_v55 = vpop.f32.mrb[57].mxu0  ;;  %v2790_v16 = vpop.eup %2789  ;;  %v1505_v33 = vmul.f32 %v2788_v51, %v3738_v9  ;;  %2809 = vpow2.f32 %v2267_v42  ;;  %v1566_v46 = vmul.f32 %v1502_v61, %v885_v35  ;;  %1925 = vmatmul.mubr.f32.gmra.mrb[84].mxu1 %v1563_v32 }
 0x168   : > { %v1052_v2 = vpop.f32.mrb[57].mxu1  ;;  %v2792_v60 = vpop.eup %2791  ;;  %v1507_v52 = vmul.f32 %v2790_v16, %v4137_v8  ;;  %2811 = vpow2.f32 %v2268_v14  ;;  %v1568_v0 = vmul.f32 %v1504_v3, %v1046_v41 }
 0x169   : > { %v2794_v38 = vpop.eup %2793  ;;  %v1506_v6 = vmul.f32 %v2792_v60, %v4139_v36  ;;  %2813 = vpow2.f32 %v2270_v47  ;;  %v1569_v54 = vmul.f32 %v1505_v33, %v889_v53  ;;  %1784 = vmatprep.mubr.f32.mxu0 %v1566_v46  ;;  %v3950_v15 = vpop.f32.mrb[58].mxu0 }
 0x16a   : > { %v2796_v9 = vpop.eup %2795  ;;  %v1508_v23 = vmul.f32 %v2794_v38, %v4141_v18  ;;  %2815 = vpow2.f32 %v2269_v56  ;;  %v1571_v13 = vmul.f32 %v1507_v52, %v1050_v30  ;;  %1929 = vmatprep.mubr.f32.mxu1 %v1568_v0  ;;  %1785 = vmatmul.mubr.f32.gmra.mrb[86].mxu0 %v1565_v58  ;;  %v3953_v57 = vpop.f32.mrb[58].mxu1 }
 0x16b   : > { %v3955_v8 = vpop.f32.mrb[59].mxu0  ;;  %v2798_v12 = vpop.eup %2797  ;;  %v1317_v27 = vadd.f32 1.0, %v2796_v9  ;;  %2817 = vpow2.f32 %v2271_v10  ;;  %v1570_v36 = vmul.f32 %v1506_v6, %v891_v55  ;;  %1930 = vmatmul.mubr.f32.gmra.mrb[86].mxu1 %v1567_v21 }
 0x16c   : > { %v3957_v22 = vpop.f32.mrb[59].mxu1  ;;  %v2800_v28 = vpop.eup %2799  ;;  %v1319_v29 = vadd.f32 1.0, %v2798_v12  ;;  %v1572_v20 = vmul.f32 %v1508_v23, %v1052_v2 }
 0x16d   : > { %v2802_v37 = vpop.eup %2801  ;;  %2819 = vrcp.f32 %v1317_v27  ;;  %v1318_v18 = vadd.f32 1.0, %v2800_v28  ;;  %1789 = vmatprep.mubr.f32.mxu0 %v1570_v36  ;;  %v901_v50 = vpop.f32.mrb[60].mxu0 }
 0x16e   : > { %v2804_v39 = vpop.eup %2803  ;;  %2821 = vrcp.f32 %v1319_v29  ;;  %v1320_v45 = vadd.f32 1.0, %v2802_v37  ;;  %1934 = vmatprep.mubr.f32.mxu1 %v1572_v20  ;;  %1790 = vmatmul.mubr.f32.gmra.mrb[88].mxu0 %v1569_v54  ;;  %v1062_v32 = vpop.f32.mrb[60].mxu1 }
 0x16f   : > { %v903_v62 = vpop.f32.mrb[61].mxu0  ;;  %v2806_v35 = vpop.eup %2805  ;;  %2823 = vrcp.f32 %v1318_v18  ;;  %v1321_v40 = vadd.f32 1.0, %v2804_v39  ;;  %1935 = vmatmul.mubr.f32.gmra.mrb[88].mxu1 %v1571_v13 }
 0x170   : > { %v1064_v24 = vpop.f32.mrb[61].mxu1  ;;  %v2808_v42 = vpop.eup %2807  ;;  %2825 = vrcp.f32 %v1320_v45  ;;  %v1323_v25 = vadd.f32 1.0, %v2806_v35 }
 0x171   : > { %v2810_v41 = vpop.eup %2809  ;;  %2827 = vrcp.f32 %v1321_v40  ;;  %v1322_v26 = vadd.f32 1.0, %v2808_v42  ;;  %v907_v48 = vpop.f32.mrb[62].mxu0 }
 0x172   : > { %v2812_v14 = vpop.eup %2811  ;;  %2829 = vrcp.f32 %v1323_v25  ;;  %v1324_v44 = vadd.f32 1.0, %v2810_v41  ;;  %v1068_v7 = vpop.f32.mrb[62].mxu1 }
 0x173   : > { %v909_v61 = vpop.f32.mrb[63].mxu0  ;;  %v2814_v47 = vpop.eup %2813  ;;  %2831 = vrcp.f32 %v1322_v26  ;;  %v1325_v58 = vadd.f32 1.0, %v2812_v14 }
 0x174   : > { %v1070_v53 = vpop.f32.mrb[63].mxu1  ;;  %v2816_v51 = vpop.eup %2815  ;;  %2833 = vrcp.f32 %v1324_v44  ;;  %v1327_v3 = vadd.f32 1.0, %v2814_v47 }
 0x175   : > { %v2818_v56 = vpop.eup %2817  ;;  %2835 = vrcp.f32 %v1325_v58  ;;  %v1326_v21 = vadd.f32 1.0, %v2816_v51 }
 0x176   : > { %2837 = vrcp.f32 %v1327_v3  ;;  %v1328_v30 = vadd.f32 1.0, %v2818_v56  ;;  %v1587_v3 = vld [vmem:[#allocation2 + $0x10] sm:$0xff] }
 0x177   : > { %v2820_v55 = vpop.eup %2819  ;;  %2839 = vrcp.f32 %v1326_v21 }
 0x178   : > { %v2822_v16 = vpop.eup %2821  ;;  %v1509_v33 = vmul.f32 %v2820_v55, %v4153_v1  ;;  %2841 = vrcp.f32 %v1328_v30 }
 0x179   : > { %v2824_v10 = vpop.eup %2823  ;;  %v1511_v46 = vmul.f32 %v2822_v16, %v4154_v63 }
 0x17a   : > { %v2826_v2 = vpop.eup %2825  ;;  %v1510_v60 = vmul.f32 %v2824_v10, %v4155_v49  ;;  %v1573_v52 = vmul.f32 %v1509_v33, %v3950_v15 }
 0x17b   : > { %v2828_v0 = vpop.eup %2827  ;;  %v1512_v38 = vmul.f32 %v2826_v2, %v4156_v19  ;;  %v1575_v6 = vmul.f32 %v1511_v46, %v3953_v57 }
 0x17c   : > { %v2830_v54 = vpop.eup %2829  ;;  %v1513_v9 = vmul.f32 %v2828_v0, %v4157_v11  ;;  %v1574_v23 = vmul.f32 %v1510_v60, %v3955_v8  ;;  %v1588_v60 = vld [vmem:[#allocation2 + $0x18] sm:$0xff] }
 0x17d   : > { %v2832_v1 = vpop.eup %2831  ;;  %v1515_v13 = vmul.f32 %v2830_v54, %v4158_v17  ;;  %v1576_v63 = vmul.f32 %v1512_v38, %v3957_v22 }
 0x17e   : > { %v2834_v12 = vpop.eup %2833  ;;  %v1514_v49 = vmul.f32 %v2832_v1, %v4159_v31  ;;  %v1577_v27 = vmul.f32 %v1513_v9, %v901_v50  ;;  %1794 = vmatprep.mubr.f32.mxu0 %v1574_v23 }
 0x17f   : > { %v2836_v15 = vpop.eup %2835  ;;  %v1516_v19 = vmul.f32 %v2834_v12, %v4160_v4  ;;  %v1579_v36 = vmul.f32 %v1515_v13, %v1062_v32  ;;  %1939 = vmatprep.mubr.f32.mxu1 %v1576_v63  ;;  %1795 = vmatmul.mubr.f32.gmra.mrb[90].mxu0 %v1573_v52  ;;  %v1589_v63 = vld [vmem:[#allocation2 + $0x20] sm:$0xff] }
 0x180   : > { %v2838_v57 = vpop.eup %2837  ;;  %v1517_v11 = vmul.f32 %v2836_v15, %v4161_v43  ;;  %v1578_v8 = vmul.f32 %v1514_v49, %v903_v62  ;;  %1940 = vmatmul.mubr.f32.gmra.mrb[90].mxu1 %v1575_v6  ;;  %v1585_v62 = vld [vmem:[#allocation2] sm:$0xff] }
 0x181   : > { %v2840_v28 = vpop.eup %2839  ;;  %v1519_v17 = vmul.f32 %v2838_v57, %v4162_v34  ;;  %v1580_v22 = vmul.f32 %v1516_v19, %v1064_v24 }
 0x182   : > { %v2842_v29 = vpop.eup %2841  ;;  %v1518_v31 = vmul.f32 %v2840_v28, %v4163_v5  ;;  %v1581_v20 = vmul.f32 %v1517_v11, %v907_v48  ;;  %1799 = vmatprep.mubr.f32.mxu0 %v1578_v8  ;;  %v1586_v48 = vld [vmem:[#allocation2 + $0x8] sm:$0xff] }
 0x183   : > { %v1520_v37 = vmul.f32 %v2842_v29, %v4164_v59  ;;  %v1583_v4 = vmul.f32 %v1519_v17, %v1068_v7  ;;  %1944 = vmatprep.mubr.f32.mxu1 %v1580_v22  ;;  %1800 = vmatmul.mubr.f32.gmra.mrb[92].mxu0 %v1577_v27  ;;  %v1590_v28 = vld [vmem:[#allocation2 + $0x28] sm:$0xff] }
 0x184   : > { %v1582_v18 = vmul.f32 %v1518_v31, %v909_v61  ;;  %1945 = vmatmul.mubr.f32.gmra.mrb[92].mxu1 %v1579_v36 }
 0x185   : > { %v1584_v50 = vmul.f32 %v1520_v37, %v1070_v53 }
 0x186   : > { %1804 = vmatprep.mubr.f32.mxu0 %v1582_v18 }
 0x187   : > { %1949 = vmatprep.mubr.f32.mxu1 %v1584_v50  ;;  %1805 = vmatmul.mubr.f32.gmra.mrb[94].mxu0 %v1581_v20 }
 0x188   : > { %1950 = vmatmul.mubr.f32.gmra.mrb[94].mxu1 %v1583_v4 }
 0x20e   : > { %v2306_v43 = vpop.f32.mrb[64].mxu0 }
 0x20f   : > { %v2386_v34 = vpop.f32.mrb[64].mxu1  ;;  %v2307_v39 = vpop.f32.mrb[65].mxu0 }
 0x210   : > { %v2308_v45 = vadd.f32 %v2307_v39, %v2306_v43  ;;  %v2387_v32 = vpop.f32.mrb[65].mxu1  ;;  %v1591_v43 = vld [vmem:[#allocation2 + $0x30] sm:$0xff] }
 0x211   : > { %v2388_v5 = vadd.f32 %v2387_v32, %v2386_v34 }
 0x212   : > { %v2309_v35 = vpop.f32.mrb[66].mxu0 }
 0x213   : > { %v1877_v40 = vadd.f32 %v2388_v5, %v2308_v45  ;;  %v2389_v59 = vpop.f32.mrb[66].mxu1  ;;  %v2310_v24 = vpop.f32.mrb[67].mxu0 }
 0x214   : > { %v2311_v42 = vadd.f32 %v2310_v24, %v2309_v35  ;;  %v2390_v25 = vpop.f32.mrb[67].mxu1  ;;  %v1592_v24 = vld [vmem:[#allocation2 + $0x38] sm:$0xff] }
 0x215   : > { %v1955_v41 = vadd.f32 %v1877_v40, %v1585_v62  ;;  %v2391_v26 = vadd.f32 %v2390_v25, %v2389_v59 }
 0x216   : > { %v2312_v14 = vpop.f32.mrb[68].mxu0 }
 0x217   : > { %1971 = vst.msk [vmem:[#allocation2] sm:$0xff] %vm283_vm0, %v1955_v41  ;;  %v1882_v44 = vadd.f32 %v2391_v26, %v2311_v42  ;;  %v2392_v7 = vpop.f32.mrb[68].mxu1  ;;  %v2313_v61 = vpop.f32.mrb[69].mxu0 }
 0x218   : > { %v2314_v47 = vadd.f32 %v2313_v61, %v2312_v14  ;;  %v2393_v58 = vpop.f32.mrb[69].mxu1 }
 0x219   : > { %v1956_v53 = vadd.f32 %v1882_v44, %v1586_v48  ;;  %v2394_v51 = vadd.f32 %v2393_v58, %v2392_v7 }
 0x21a   : > { %v2315_v56 = vpop.f32.mrb[70].mxu0 }
 0x21b   : > { %1972 = vst.msk [vmem:[#allocation2 + $0x8] sm:$0xff] %vm283_vm0, %v1956_v53  ;;  %v1887_v21 = vadd.f32 %v2394_v51, %v2314_v47  ;;  %v2395_v30 = vpop.f32.mrb[70].mxu1  ;;  %v2316_v55 = vpop.f32.mrb[71].mxu0  ;;  %v1593_v47 = vld [vmem:[#allocation2 + $0x40] sm:$0xff] }
 0x21c   : > { %v2317_v16 = vadd.f32 %v2316_v55, %v2315_v56  ;;  %v2396_v33 = vpop.f32.mrb[71].mxu1 }
 0x21d   : > { %v1957_v10 = vadd.f32 %v1887_v21, %v1587_v3  ;;  %v2397_v46 = vadd.f32 %v2396_v33, %v2395_v30 }
 0x21e   : > { %v1990_v2 = vld [vmem:[#allocation2] sm:$0xff]  ;;  %v2318_v52 = vpop.f32.mrb[72].mxu0 }
 0x21f   : > { %2006 = vst.msk [vmem:[%s3982_s30] sm:$0xff] %vm283_vm0, %v1990_v2  ;;  %1973 = vst.msk [vmem:[#allocation2 + $0x10] sm:$0xff] %vm283_vm0, %v1957_v10  ;;  %v1892_v0 = vadd.f32 %v2397_v46, %v2317_v16  ;;  %v2398_v38 = vpop.f32.mrb[72].mxu1  ;;  %v2319_v6 = vpop.f32.mrb[73].mxu0  ;;  %v1594_v10 = vld [vmem:[#allocation2 + $0x48] sm:$0xff] }
 0x220   : > { %v2320_v54 = vadd.f32 %v2319_v6, %v2318_v52  ;;  %v2399_v9 = vpop.f32.mrb[73].mxu1 }
 0x221   : > { %v1958_v23 = vadd.f32 %v1892_v0, %v1588_v60  ;;  %v2400_v1 = vadd.f32 %v2399_v9, %v2398_v38 }
 0x222   : > { %v1991_v13 = vld [vmem:[#allocation2 + $0x8] sm:$0xff]  ;;  %v2321_v12 = vpop.f32.mrb[74].mxu0 }
 0x223   : > { %2007 = vst.msk [vmem:[%s3982_s30 + $0x8] sm:$0xff] %vm283_vm0, %v1991_v13  ;;  %1974 = vst.msk [vmem:[#allocation2 + $0x18] sm:$0xff] %vm283_vm0, %v1958_v23  ;;  %v1897_v49 = vadd.f32 %v2400_v1, %v2320_v54  ;;  %v2401_v27 = vpop.f32.mrb[74].mxu1  ;;  %v2322_v15 = vpop.f32.mrb[75].mxu0  ;;  %v1595_v23 = vld [vmem:[#allocation2 + $0x50] sm:$0xff] }
 0x224   : > { %v2323_v19 = vadd.f32 %v2322_v15, %v2321_v12  ;;  %v2402_v36 = vpop.f32.mrb[75].mxu1 }
 0x225   : > { %v1959_v57 = vadd.f32 %v1897_v49, %v1589_v63  ;;  %v2403_v11 = vadd.f32 %v2402_v36, %v2401_v27  ;;  %v1596_v36 = vld [vmem:[#allocation2 + $0x58] sm:$0xff] }
 0x226   : > { %v1992_v8 = vld [vmem:[#allocation2 + $0x10] sm:$0xff]  ;;  %v2324_v17 = vpop.f32.mrb[76].mxu0 }
 0x227   : > { %2008 = vst.msk [vmem:[%s3982_s30 + $0x10] sm:$0xff] %vm283_vm0, %v1992_v8  ;;  %1975 = vst.msk [vmem:[#allocation2 + $0x20] sm:$0xff] %vm283_vm0, %v1959_v57  ;;  %v1902_v22 = vadd.f32 %v2403_v11, %v2323_v19  ;;  %v2404_v29 = vpop.f32.mrb[76].mxu1  ;;  %v2325_v31 = vpop.f32.mrb[77].mxu0 }
 0x228   : > { %v2326_v20 = vadd.f32 %v2325_v31, %v2324_v17  ;;  %v2405_v37 = vpop.f32.mrb[77].mxu1 }
 0x229   : > { %v1960_v4 = vadd.f32 %v1902_v22, %v1590_v28  ;;  %v2406_v18 = vadd.f32 %v2405_v37, %v2404_v29  ;;  %v1597_v37 = vld [vmem:[#allocation2 + $0x60] sm:$0xff] }
 0x22a   : > { %v1993_v50 = vld [vmem:[#allocation2 + $0x18] sm:$0xff]  ;;  %v2327_v34 = vpop.f32.mrb[78].mxu0 }
 0x22b   : > { %2009 = vst.msk [vmem:[%s3982_s30 + $0x18] sm:$0xff] %vm283_vm0, %v1993_v50  ;;  %1976 = vst.msk [vmem:[#allocation2 + $0x28] sm:$0xff] %vm283_vm0, %v1960_v4  ;;  %v1907_v39 = vadd.f32 %v2406_v18, %v2326_v20  ;;  %v2407_v45 = vpop.f32.mrb[78].mxu1  ;;  %v2328_v32 = vpop.f32.mrb[79].mxu0 }
 0x22c   : > { %v2329_v5 = vadd.f32 %v2328_v32, %v2327_v34  ;;  %v2408_v62 = vpop.f32.mrb[79].mxu1 }
 0x22d   : > { %v1961_v35 = vadd.f32 %v1907_v39, %v1591_v43  ;;  %v2409_v40 = vadd.f32 %v2408_v62, %v2407_v45 }
 0x22e   : > { %v1994_v59 = vld [vmem:[#allocation2 + $0x20] sm:$0xff]  ;;  %v2330_v42 = vpop.f32.mrb[80].mxu0 }
 0x22f   : > { %2010 = vst.msk [vmem:[%s3982_s30 + $0x20] sm:$0xff] %vm283_vm0, %v1994_v59  ;;  %1977 = vst.msk [vmem:[#allocation2 + $0x30] sm:$0xff] %vm283_vm0, %v1961_v35  ;;  %v1912_v25 = vadd.f32 %v2409_v40, %v2329_v5  ;;  %v2410_v41 = vpop.f32.mrb[80].mxu1  ;;  %v2331_v26 = vpop.f32.mrb[81].mxu0  ;;  %v1598_v40 = vld [vmem:[#allocation2 + $0x68] sm:$0xff] }
 0x230   : > { %v2332_v48 = vadd.f32 %v2331_v26, %v2330_v42  ;;  %v2411_v14 = vpop.f32.mrb[81].mxu1 }
 0x231   : > { %v1962_v44 = vadd.f32 %v1912_v25, %v1592_v24  ;;  %v2412_v7 = vadd.f32 %v2411_v14, %v2410_v41 }
 0x232   : > { %v1995_v61 = vld [vmem:[#allocation2 + $0x28] sm:$0xff]  ;;  %v2333_v58 = vpop.f32.mrb[82].mxu0 }
 0x233   : > { %2011 = vst.msk [vmem:[%s3982_s30 + $0x28] sm:$0xff] %vm283_vm0, %v1995_v61  ;;  %1978 = vst.msk [vmem:[#allocation2 + $0x38] sm:$0xff] %vm283_vm0, %v1962_v44  ;;  %v1917_v53 = vadd.f32 %v2412_v7, %v2332_v48  ;;  %v2334_v51 = vpop.f32.mrb[83].mxu0  ;;  %v1599_v44 = vld [vmem:[#allocation2 + $0x70] sm:$0xff] }
 0x234   : > { %v2335_v3 = vadd.f32 %v2334_v51, %v2333_v58 }
 0x235   : > { %v1963_v56 = vadd.f32 %v1917_v53, %v1593_v47 }
 0x236   : > { %v1996_v21 = vld [vmem:[#allocation2 + $0x30] sm:$0xff]  ;;  %v2413_v30 = vpop.f32.mrb[82].mxu1 }
 0x237   : > { %2012 = vst.msk [vmem:[%s3982_s30 + $0x30] sm:$0xff] %vm283_vm0, %v1996_v21  ;;  %1979 = vst.msk [vmem:[#allocation2 + $0x40] sm:$0xff] %vm283_vm0, %v1963_v56  ;;  %v2414_v55 = vpop.f32.mrb[83].mxu1  ;;  %v1600_v21 = vld [vmem:[#allocation2 + $0x78] sm:$0xff] }
 0x238   : > { %v2415_v16 = vadd.f32 %v2414_v55, %v2413_v30 }
 0x239   : > { %v2336_v46 = vpop.f32.mrb[84].mxu0 }
 0x23a   : > { %v1997_v33 = vld [vmem:[#allocation2 + $0x38] sm:$0xff]  ;;  %v1922_v2 = vadd.f32 %v2415_v16, %v2335_v3  ;;  %v2416_v60 = vpop.f32.mrb[84].mxu1  ;;  %v2337_v52 = vpop.f32.mrb[85].mxu0 }
 0x23b   : > { %2013 = vst.msk [vmem:[%s3982_s30 + $0x38] sm:$0xff] %vm283_vm0, %v1997_v33  ;;  %v2338_v0 = vadd.f32 %v2337_v52, %v2336_v46  ;;  %v2417_v38 = vpop.f32.mrb[85].mxu1 }
 0x23c   : > { %v1964_v6 = vadd.f32 %v1922_v2, %v1594_v10  ;;  %v2418_v54 = vadd.f32 %v2417_v38, %v2416_v60 }
 0x23d   : > { %v2339_v1 = vpop.f32.mrb[86].mxu0 }
 0x23e   : > { %v1998_v9 = vld [vmem:[#allocation2 + $0x40] sm:$0xff]  ;;  %1980 = vst.msk [vmem:[#allocation2 + $0x48] sm:$0xff] %vm283_vm0, %v1964_v6  ;;  %v1927_v13 = vadd.f32 %v2418_v54, %v2338_v0  ;;  %v2419_v63 = vpop.f32.mrb[86].mxu1  ;;  %v2340_v12 = vpop.f32.mrb[87].mxu0 }
 0x23f   : > { %2014 = vst.msk [vmem:[%s3982_s30 + $0x40] sm:$0xff] %vm283_vm0, %v1998_v9  ;;  %v2341_v49 = vadd.f32 %v2340_v12, %v2339_v1  ;;  %v2420_v27 = vpop.f32.mrb[87].mxu1 }
 0x240   : > { %v1965_v15 = vadd.f32 %v1927_v13, %v1595_v23  ;;  %v2421_v19 = vadd.f32 %v2420_v27, %v2419_v63 }
 0x241   : > { %v2342_v57 = vpop.f32.mrb[88].mxu0 }
 0x242   : > { %1981 = vst.msk [vmem:[#allocation2 + $0x50] sm:$0xff] %vm283_vm0, %v1965_v15  ;;  %v1932_v11 = vadd.f32 %v2421_v19, %v2341_v49  ;;  %v2422_v8 = vpop.f32.mrb[88].mxu1  ;;  %v2343_v28 = vpop.f32.mrb[89].mxu0 }
 0x243   : > { %v2344_v17 = vadd.f32 %v2343_v28, %v2342_v57  ;;  %v2423_v22 = vpop.f32.mrb[89].mxu1 }
 0x244   : > { %v1966_v29 = vadd.f32 %v1932_v11, %v1596_v36  ;;  %v2424_v31 = vadd.f32 %v2423_v22, %v2422_v8 }
 0x245   : > { %v1999_v20 = vld [vmem:[#allocation2 + $0x48] sm:$0xff] }
 0x246   : > { %2015 = vst.msk [vmem:[%s3982_s30 + $0x48] sm:$0xff] %vm283_vm0, %v1999_v20  ;;  %1982 = vst.msk [vmem:[#allocation2 + $0x58] sm:$0xff] %vm283_vm0, %v1966_v29  ;;  %v1937_v4 = vadd.f32 %v2424_v31, %v2344_v17 }
 0x248   : > { %v1967_v18 = vadd.f32 %v1937_v4, %v1597_v37 }
 0x249   : > { %v2000_v50 = vld [vmem:[#allocation2 + $0x50] sm:$0xff] }
 0x24a   : > { %2016 = vst.msk [vmem:[%s3982_s30 + $0x50] sm:$0xff] %vm283_vm0, %v2000_v50  ;;  %1983 = vst.msk [vmem:[#allocation2 + $0x60] sm:$0xff] %vm283_vm0, %v1967_v18 }
 0x24d   : > { %v2001_v43 = vld [vmem:[#allocation2 + $0x58] sm:$0xff] }
 0x24e   : > { %2017 = vst.msk [vmem:[%s3982_s30 + $0x58] sm:$0xff] %vm283_vm0, %v2001_v43 }
 0x251   : > { %v2002_v34 = vld [vmem:[#allocation2 + $0x60] sm:$0xff] }
 0x252   : > { %2018 = vst.msk [vmem:[%s3982_s30 + $0x60] sm:$0xff] %vm283_vm0, %v2002_v34  ;;  %v2345_v39 = vpop.f32.mrb[90].mxu0 }
 0x253   : > { %v2425_v45 = vpop.f32.mrb[90].mxu1  ;;  %v2346_v32 = vpop.f32.mrb[91].mxu0 }
 0x254   : > { %v2347_v5 = vadd.f32 %v2346_v32, %v2345_v39  ;;  %v2426_v62 = vpop.f32.mrb[91].mxu1 }
 0x255   : > { %v2427_v35 = vadd.f32 %v2426_v62, %v2425_v45 }
 0x256   : > { %v2348_v59 = vpop.f32.mrb[92].mxu0 }
 0x257   : > { %v1942_v24 = vadd.f32 %v2427_v35, %v2347_v5  ;;  %v2428_v42 = vpop.f32.mrb[92].mxu1  ;;  %v2349_v25 = vpop.f32.mrb[93].mxu0 }
 0x258   : > { %v2350_v41 = vadd.f32 %v2349_v25, %v2348_v59  ;;  %v2429_v26 = vpop.f32.mrb[93].mxu1 }
 0x259   : > { %v1968_v48 = vadd.f32 %v1942_v24, %v1598_v40  ;;  %v2430_v14 = vadd.f32 %v2429_v26, %v2428_v42 }
 0x25a   : > { %v2351_v7 = vpop.f32.mrb[94].mxu0 }
 0x25b   : > { %1984 = vst.msk [vmem:[#allocation2 + $0x68] sm:$0xff] %vm283_vm0, %v1968_v48  ;;  %v1947_v61 = vadd.f32 %v2430_v14, %v2350_v41  ;;  %v2431_v47 = vpop.f32.mrb[94].mxu1  ;;  %v2352_v58 = vpop.f32.mrb[95].mxu0 }
 0x25c   : > { %v2353_v53 = vadd.f32 %v2352_v58, %v2351_v7  ;;  %v2432_v51 = vpop.f32.mrb[95].mxu1 }
 0x25d   : > { %v1969_v3 = vadd.f32 %v1947_v61, %v1599_v44  ;;  %v2433_v56 = vadd.f32 %v2432_v51, %v2431_v47 }
 0x25f   : > { %1985 = vst.msk [vmem:[#allocation2 + $0x70] sm:$0xff] %vm283_vm0, %v1969_v3  ;;  %v1952_v30 = vadd.f32 %v2433_v56, %v2353_v53 }
 0x261   : > { %v1970_v55 = vadd.f32 %v1952_v30, %v1600_v21 }
 0x262   : > { %v2003_v16 = vld [vmem:[#allocation2 + $0x68] sm:$0xff] }
 0x263   : > { %2019 = vst.msk [vmem:[%s3982_s30 + $0x68] sm:$0xff] %vm283_vm0, %v2003_v16  ;;  %1986 = vst.msk [vmem:[#allocation2 + $0x78] sm:$0xff] %vm283_vm0, %v1970_v55 }
 0x266   : > { %v2004_v33 = vld [vmem:[#allocation2 + $0x70] sm:$0xff] }
 0x267   : > { %2020 = vst.msk [vmem:[%s3982_s30 + $0x70] sm:$0xff] %vm283_vm0, %v2004_v33 }
 0x26a   : > { %v2005_v10 = vld [vmem:[#allocation2 + $0x78] sm:$0xff] }
 0x26b   : > { %2021 = vst.msk [vmem:[%s3982_s30 + $0x78] sm:$0xff] %vm283_vm0, %v2005_v10 }
 0x26c PF: > { %s14_s17 = sadd.s32 1, %s2865_s17   ;;  %s4165_s15 = smov %s2861_s16 }
 0x26d   : > { %p11_p5 = scmp.ge.s32.totalorder %s14_s17, 4   ;;  %s4166_s16 = smov %s4168_s18 }
 0x26f   :  { %13 = sbr.rel (!%p11_p5) target bundleno = 2 (0x2), region = 83 }

// kernel: ernie45_moe_moe.3
= control target key start
LH: loop header
LB: loop body
LE: loop exit
PB: predicated region body
PF: predicated region fallthrough
CT: control target
= control target key end

     0   :  { %s1893_s0 = inlined_call_operand.<no memory space> [shape: s32[1], index: 0, kind: input, shape index: {}]   ;;  %s1894_s1 = inlined_call_operand.vmem [shape: s32[13], index: 1, kind: input, shape index: {}]   ;;  %s1895_s2 = inlined_call_operand.vmem [shape: f32[832,64], index: 2, kind: input, shape index: {}]   ;;  %s1896_s3 = inlined_call_operand.vmem [shape: f32[512,256], index: 3, kind: input, shape index: {}]   ;;  %s1897_s4 = inlined_call_operand.vmem [shape: f32[512,256], index: 4, kind: input, shape index: {}]   ;;  %s1898_s5 = inlined_call_operand.vmem [shape: f32[2048,64], index: 5, kind: input, shape index: {}]   ;;  %s1899_s6 = inlined_call_operand.vmem [shape: f32[832,1], index: 6, kind: input, shape index: {}]   ;;  %s1900_s7 = inlined_call_operand.vmem [shape: f32[832,64], index: 7, kind: output, shape index: {}]  }
   0x1   :  { %12 = sst [smem:[#allocation4]] %s1893_s0  ;;  %s13_s28 = sshll.u32 %s1894_s1, 4  ;;  %s14_s28 = int_to_ptr.vmem [resolvable:$true] %s13_s28 }
   0x2   :  { %s1488_s29 = scalar_lea.vmem %s14_s28, 16  ;;  %p1493_p1 = scmp.lt.s32.totalorder %s14_s28, %s14_s28 }
   0x3   :  { %p1489_p0 = scmp.ne.s32.totalorder %s14_s28, %s1488_s29  ;;  %p1494_p2 = scmp.lt.s32.totalorder %s1488_s29, %s1488_s29 }
   0x5   :  { %p1495_p3 = por %p1494_p2, %p1493_p1 }
   0x7   :  { %p1496_p4 = pnand %p1495_p3, %p1489_p0 }
   0x9   :  { %1499 = shalt.err (!%p1496_p4)  }
   0xa   :  { %s1526_s30 = smov [#allocation5]  }
   0xb   :  { %16 = dma.vmem_to_smem %s14_s28, 16, %s1526_s30, [#allocation3] }
   0xc   :  { %1512 = dma.done.wait [#allocation3], 16 }
   0xd   :  { %1513 = vsyncadd [#allocation3], 4294967280 }
   0xe   :  { %18 = sfence }
   0xf   :  { %s1576_s8 = smov 0   ;;  %s1578_s0 = smov 0  }
  0x10   :  { %s1580_s9 = smov 0  }
  0x11 LB: > { %s36_s1 = sadd.s32 1, %s1520_s0  ;;  %p1206_p5 = scmp.ge.s32.totalorder %s1524_s9, 1  ;;  %s1524_s9 = sphi %s1580_s9, %s24_s9   ;;  %s1520_s0 = sphi %s1578_s0, %s1902_s0   ;;  %s1516_s8 = sphi %s1576_s8, %s1901_s8  }
  0x12   : > { %p38_p6 = scmp.ge.s32.totalorder %s36_s1, 13  ;;  %p285_p7 = scmp.lt.s32.totalorder %s1524_s9, 14 }
  0x14   : > { %s1904_s1 = smov (%p38_p6, %s36_s1), 0  ;;  %p286_p8 = pnand %p1206_p5, %p285_p7 }
  0x15   : > { %s1207_s10 = sshll.u32 (!%p286_p8), %s1516_s8, 3  ;;  %s353_s11 = sld [smem:[#allocation5 + %s1516_s8]] (!%p286_p8)  ;;  %vm407_vm0 = vcmask (!%p286_p8), 523264   ;;  %v1527_v0 = vmov (!%p286_p8), 0.0  }
  0x16   : > { %289 = sbr.rel (%p286_p8) target bundleno = 694 (0x2b6), region = 40  ;;  %p348_p9 = scmp.lt.s32.totalorder (!%p286_p8), %s1207_s10, 103  ;;  %408 = vst.msk [vmem:[#allocation2] sm:$0xff] (!%p286_p8), %vm407_vm0, %v1527_v0  ;;  %409 = vst.msk [vmem:[#allocation2 + $0x8] sm:$0xff] (!%p286_p8), %vm407_vm0, %v1527_v0 }
  0x17   : > { %s367_s12 = sld [smem:[#allocation5 + %s1516_s8]] (!%p286_p8)  ;;  %410 = vst.msk [vmem:[#allocation2 + $0x10] sm:$0xff] (!%p286_p8), %vm407_vm0, %v1527_v0  ;;  %411 = vst.msk [vmem:[#allocation2 + $0x18] sm:$0xff] (!%p286_p8), %vm407_vm0, %v1527_v0 }
  0x18   : > { %412 = vst.msk [vmem:[#allocation2 + $0x20] sm:$0xff] (!%p286_p8), %vm407_vm0, %v1527_v0  ;;  %413 = vst.msk [vmem:[#allocation2 + $0x28] sm:$0xff] (!%p286_p8), %vm407_vm0, %v1527_v0  ;;  %s381_s13 = sld [smem:[#allocation5 + %s1516_s8]] (!%p286_p8) }
  0x19   : > { %414 = vst.msk [vmem:[#allocation2 + $0x30] sm:$0xff] (!%p286_p8), %vm407_vm0, %v1527_v0  ;;  %415 = vst.msk [vmem:[#allocation2 + $0x38] sm:$0xff] (!%p286_p8), %vm407_vm0, %v1527_v0  ;;  %s416_s14 = sld [smem:[#allocation4]] (!%p286_p8) }
  0x1b   : > { %s1209_s19 = sshll.u32 (!%p286_p8), %s353_s11, 3 }
  0x1c   : > { %p356_p10 = scmp.lt.s32.totalorder (!%p286_p8), %s1209_s19, 63 }
  0x1d   : > { %s1906_s10 = smov (!%p348_p9, %s1207_s10), 103  ;;  %s1212_s20 = sshll.u32 %s367_s12, 3 }
  0x1e   : > { %s1208_s15 = sshll.u32 %s1906_s10, 3  ;;  %p370_p11 = scmp.lt.s32.totalorder %s1212_s20, 63 }
  0x1f   : > { %s1611_s18 = scalar_lea.vmem %s1895_s2, %s1208_s15  ;;  %s1215_s21 = sshll.u32 %s381_s13, 5 }
  0x20   : > { %s1908_s19 = smov (!%p356_p10, %s1209_s19), 63  ;;  %s1910_s20 = smov (!%p370_p11, %s1212_s20), 63 }
  0x21   : > { %s1256_s22 = sshll.u32 %s1908_s19, 4  ;;  %p384_p12 = scmp.lt.s32.totalorder %s1215_s21, 255 }
  0x22   : > { %s1616_s25 = scalar_lea.vmem %s1896_s3, %s1256_s22  ;;  %s1257_s26 = sshll.u32 %s1910_s20, 4 }
  0x23   : > { %s1621_s29 = scalar_lea.vmem %s1897_s4, %s1257_s26  ;;  %s1626_s11 = scalar_lea.vmem %s1899_s6, %s1208_s15 }
  0x24   : > { %s1912_s21 = smov (!%p384_p12, %s1215_s21), 255  ;;  %s1631_s16 = scalar_lea.vmem %s1900_s7, %s1208_s15 }
  0x25   : > { %s1216_s17 = sshll.u32 %s1912_s21, 3  ;;  %p1221_p13 = scmp.ge.s32.totalorder %s1516_s8, %s416_s14 }
  0x26   : > { %s1636_s20 = scalar_lea.vmem %s1898_s5, %s1216_s17  ;;  %v430_v1 = vld [vmem:[%s1616_s25 + $0x8] sm:$0xff] (!%p1221_p13)  ;;  %v432_v2 = vld [vmem:[%s1616_s25 + $0x18] sm:$0xff] (!%p1221_p13)  ;;  %v429_v3 = vld [vmem:[%s1616_s25] sm:$0xff] (!%p1221_p13)  ;;  %v1528_v8 = vmov (!%p1221_p13), 0.0  }
  0x27   : > { %420 = sbr.rel (%p1221_p13) target bundleno = 549 (0x225), region = 48  ;;  %v1314_v4 = vpack.c.bf16 (!%p1221_p13), %v432_v2, %v430_v1  ;;  %v431_v5 = vld [vmem:[%s1616_s25 + $0x10] sm:$0xff] (!%p1221_p13)  ;;  %v434_v6 = vld [vmem:[%s1616_s25 + $0x28] sm:$0xff] (!%p1221_p13)  ;;  %v436_v7 = vld [vmem:[%s1616_s25 + $0x38] sm:$0xff] (!%p1221_p13)  ;;  %534 = vmatprep.mubr.f32.mxu0 (!%p1221_p13), %v1528_v8  ;;  %663 = vmatprep.mubr.f32.mxu1 (!%p1221_p13), %v1528_v8 }
  0x28   : > { %v1316_v9 = vpack.c.bf16 (!%p1221_p13), %v431_v5, %v429_v3  ;;  %v1318_v10 = vpack.c.bf16 (!%p1221_p13), %v436_v7, %v434_v6  ;;  %v433_v11 = vld [vmem:[%s1616_s25 + $0x20] sm:$0xff] (!%p1221_p13)  ;;  %v435_v12 = vld [vmem:[%s1616_s25 + $0x30] sm:$0xff] (!%p1221_p13)  ;;  %v438_v13 = vld [vmem:[%s1616_s25 + $0x48] sm:$0xff] (!%p1221_p13) }
  0x29   : > { %1315 = vmatprep.subr.bf16.mxu0 (!%p1221_p13), %v1314_v4  ;;  %v440_v14 = vld [vmem:[%s1616_s25 + $0x58] sm:$0xff] (!%p1221_p13)  ;;  %v1320_v15 = vpack.c.bf16 (!%p1221_p13), %v435_v12, %v433_v11  ;;  %v437_v17 = vld [vmem:[%s1616_s25 + $0x40] sm:$0xff] (!%p1221_p13)  ;;  %v439_v18 = vld [vmem:[%s1616_s25 + $0x50] sm:$0xff] (!%p1221_p13) }
  0x2a   : > { %1317 = vmatpush1.bf16.msra.mxu0 (!%p1221_p13), %v1316_v9  ;;  %v1322_v16 = vpack.c.bf16 (!%p1221_p13), %v440_v14, %v438_v13  ;;  %v442_v19 = vld [vmem:[%s1616_s25 + $0x68] sm:$0xff] (!%p1221_p13)  ;;  %v444_v20 = vld [vmem:[%s1616_s25 + $0x78] sm:$0xff] (!%p1221_p13)  ;;  %v441_v23 = vld [vmem:[%s1616_s25 + $0x60] sm:$0xff] (!%p1221_p13)  ;;  %v1324_v27 = vpack.c.bf16 (!%p1221_p13), %v439_v18, %v437_v17 }
  0x2b   : > { %1319 = vmatprep.subr.bf16.mxu0 (!%p1221_p13), %v1318_v10  ;;  %v584_v21 = vld [vmem:[%s1621_s29 + $0x8] sm:$0xff] (!%p1221_p13)  ;;  %v586_v22 = vld [vmem:[%s1621_s29 + $0x18] sm:$0xff] (!%p1221_p13)  ;;  %v583_v25 = vld [vmem:[%s1621_s29] sm:$0xff] (!%p1221_p13)  ;;  %v1326_v32 = vpack.c.bf16 (!%p1221_p13), %v444_v20, %v442_v19 }
  0x2c   : > { %v1330_v24 = vpack.c.bf16 (!%p1221_p13), %v586_v22, %v584_v21  ;;  %v585_v26 = vld [vmem:[%s1621_s29 + $0x10] sm:$0xff] (!%p1221_p13)  ;;  %v588_v30 = vld [vmem:[%s1621_s29 + $0x28] sm:$0xff] (!%p1221_p13)  ;;  %v590_v31 = vld [vmem:[%s1621_s29 + $0x38] sm:$0xff] (!%p1221_p13) }
  0x2d   : > { %v443_v28 = vld [vmem:[%s1616_s25 + $0x70] sm:$0xff] (!%p1221_p13)  ;;  %v1332_v29 = vpack.c.bf16 (!%p1221_p13), %v585_v26, %v583_v25  ;;  %v1334_v33 = vpack.c.bf16 (!%p1221_p13), %v590_v31, %v588_v30  ;;  %v587_v34 = vld [vmem:[%s1621_s29 + $0x20] sm:$0xff] (!%p1221_p13)  ;;  %v592_v36 = vld [vmem:[%s1621_s29 + $0x48] sm:$0xff] (!%p1221_p13) }
  0x2e   : > { %1321 = vmatpush1.bf16.msra.mxu0 %v1320_v15  ;;  %1331 = vmatprep.subr.bf16.mxu1 %v1330_v24  ;;  %v589_v35 = vld [vmem:[%s1621_s29 + $0x30] sm:$0xff]  ;;  %v594_v38 = vld [vmem:[%s1621_s29 + $0x58] sm:$0xff]  ;;  %v591_v40 = vld [vmem:[%s1621_s29 + $0x40] sm:$0xff]  ;;  %v1328_v42 = vpack.c.bf16 %v443_v28, %v441_v23 }
  0x2f   : > { %1323 = vmatprep.subr.bf16.mxu0 %v1322_v16  ;;  %1333 = vmatpush1.bf16.msra.mxu1 %v1332_v29  ;;  %v1336_v37 = vpack.c.bf16 %v589_v35, %v587_v34  ;;  %v1338_v39 = vpack.c.bf16 %v594_v38, %v592_v36  ;;  %v593_v41 = vld [vmem:[%s1621_s29 + $0x50] sm:$0xff]  ;;  %v596_v43 = vld [vmem:[%s1621_s29 + $0x68] sm:$0xff]  ;;  %v598_v44 = vld [vmem:[%s1621_s29 + $0x78] sm:$0xff] }
  0x30   : > { %1335 = vmatprep.subr.bf16.mxu1 %v1334_v33  ;;  %v1340_v45 = vpack.c.bf16 %v593_v41, %v591_v40  ;;  %v1342_v46 = vpack.c.bf16 %v598_v44, %v596_v43  ;;  %v595_v47 = vld [vmem:[%s1621_s29 + $0x60] sm:$0xff]  ;;  %v597_v48 = vld [vmem:[%s1621_s29 + $0x70] sm:$0xff]  ;;  %v422_v51 = vld [vmem:[%s1611_s18 + $0x8] sm:$0xff] }
  0x31   : > { %v421_v49 = vld [vmem:[%s1611_s18] sm:$0xff]  ;;  %v1344_v50 = vpack.c.bf16 %v597_v48, %v595_v47  ;;  %v423_v52 = vld [vmem:[%s1611_s18 + $0x10] sm:$0xff]  ;;  %v424_v53 = vld [vmem:[%s1611_s18 + $0x18] sm:$0xff] }
  0x32   : > { %1325 = vmatpush1.bf16.msra.mxu0 %v1324_v27  ;;  %v425_v54 = vld [vmem:[%s1611_s18 + $0x20] sm:$0xff]  ;;  %v426_v55 = vld [vmem:[%s1611_s18 + $0x28] sm:$0xff]  ;;  %v427_v56 = vld [vmem:[%s1611_s18 + $0x30] sm:$0xff] }
  0x33   : > { %1327 = vmatprep.subr.bf16.mxu0 %v1326_v32  ;;  %1337 = vmatpush1.bf16.msra.mxu1 %v1336_v37  ;;  %v428_v57 = vld [vmem:[%s1611_s18 + $0x38] sm:$0xff]  ;;  %v864_v58 = vld [vmem:[%s1636_s20 + $0x80] sm:$0xff]  ;;  %v865_v59 = vld [vmem:[%s1636_s20 + $0x88] sm:$0xff] }
  0x34   : > { %1339 = vmatprep.subr.bf16.mxu1 %v1338_v39  ;;  %v1346_v60 = vpack.c.bf16 %v865_v59, %v864_v58  ;;  %v848_v61 = vld [vmem:[%s1636_s20] sm:$0xff]  ;;  %v849_v62 = vld [vmem:[%s1636_s20 + $0x8] sm:$0xff]  ;;  %v866_v0 = vld [vmem:[%s1636_s20 + $0x90] sm:$0xff] }
  0x35   : > { %v1348_v63 = vpack.c.bf16 %v849_v62, %v848_v61  ;;  %v867_v1 = vld [vmem:[%s1636_s20 + $0x98] sm:$0xff]  ;;  %v850_v3 = vld [vmem:[%s1636_s20 + $0x10] sm:$0xff]  ;;  %v868_v6 = vld [vmem:[%s1636_s20 + $0xa0] sm:$0xff] }
  0x36   : > { %1329 = vmatpush1.bf16.msra.mxu0 %v1328_v42  ;;  %v1350_v2 = vpack.c.bf16 %v867_v1, %v866_v0  ;;  %v851_v4 = vld [vmem:[%s1636_s20 + $0x18] sm:$0xff]  ;;  %v869_v7 = vld [vmem:[%s1636_s20 + $0xa8] sm:$0xff]  ;;  %v852_v9 = vld [vmem:[%s1636_s20 + $0x20] sm:$0xff] }
  0x37   : > { %1341 = vmatpush1.bf16.msra.mxu1 %v1340_v45  ;;  %1347 = vmatprep.subr.bf16.mxu0 %v1346_v60  ;;  %v1352_v5 = vpack.c.bf16 %v851_v4, %v850_v3  ;;  %v853_v10 = vld [vmem:[%s1636_s20 + $0x28] sm:$0xff]  ;;  %v870_v12 = vld [vmem:[%s1636_s20 + $0xb0] sm:$0xff]  ;;  %v871_v13 = vld [vmem:[%s1636_s20 + $0xb8] sm:$0xff] }
  0x38   : > { %1343 = vmatprep.subr.bf16.mxu1 %v1342_v46  ;;  %v1356_v11 = vpack.c.bf16 %v853_v10, %v852_v9  ;;  %v1358_v14 = vpack.c.bf16 %v871_v13, %v870_v12  ;;  %v854_v15 = vld [vmem:[%s1636_s20 + $0x30] sm:$0xff]  ;;  %v855_v16 = vld [vmem:[%s1636_s20 + $0x38] sm:$0xff]  ;;  %v872_v18 = vld [vmem:[%s1636_s20 + $0xc0] sm:$0xff] }
  0x39   : > { %1222 = vmatmul.mubr.msk.f32.vlgmr.msra.gmra.mrb[0].mxu0 %vm407_vm0, %v421_v49  ;;  %v1360_v17 = vpack.c.bf16 %v855_v16, %v854_v15  ;;  %v873_v19 = vld [vmem:[%s1636_s20 + $0xc8] sm:$0xff]  ;;  %v856_v21 = vld [vmem:[%s1636_s20 + $0x40] sm:$0xff]  ;;  %v874_v24 = vld [vmem:[%s1636_s20 + $0xd0] sm:$0xff] }
  0x3a   : > { %540 = vmatprep.mubr.f32.mxu0 %v1528_v8  ;;  %1349 = vmatpush3.bf16.msra.mxu0 %v1348_v63  ;;  %v1362_v20 = vpack.c.bf16 %v873_v19, %v872_v18  ;;  %v857_v22 = vld [vmem:[%s1636_s20 + $0x48] sm:$0xff]  ;;  %v875_v25 = vld [vmem:[%s1636_s20 + $0xd8] sm:$0xff]  ;;  %v858_v27 = vld [vmem:[%s1636_s20 + $0x50] sm:$0xff] }
  0x3b   : > { %1345 = vmatpush1.bf16.msra.mxu1 %v1344_v50  ;;  %1351 = vmatprep.subr.bf16.mxu0 %v1350_v2  ;;  %v1364_v23 = vpack.c.bf16 %v857_v22, %v856_v21  ;;  %v1366_v26 = vpack.c.bf16 %v875_v25, %v874_v24  ;;  %v859_v28 = vld [vmem:[%s1636_s20 + $0x58] sm:$0xff]  ;;  %v876_v30 = vld [vmem:[%s1636_s20 + $0xe0] sm:$0xff]  ;;  %v877_v31 = vld [vmem:[%s1636_s20 + $0xe8] sm:$0xff] }
  0x3c   : > { %1378 = vmatprep.subr.bf16.mxu1 %v1346_v60  ;;  %v1368_v29 = vpack.c.bf16 %v859_v28, %v858_v27  ;;  %v1370_v32 = vpack.c.bf16 %v877_v31, %v876_v30  ;;  %v860_v33 = vld [vmem:[%s1636_s20 + $0x60] sm:$0xff]  ;;  %v861_v34 = vld [vmem:[%s1636_s20 + $0x68] sm:$0xff]  ;;  %v878_v36 = vld [vmem:[%s1636_s20 + $0xf0] sm:$0xff] }
  0x3d   : > { %1223 = vmatmul.mubr.msk.f32.gmra.mrb[2].mxu0 %vm407_vm0, %v422_v51  ;;  %v1372_v35 = vpack.c.bf16 %v861_v34, %v860_v33  ;;  %v879_v37 = vld [vmem:[%s1636_s20 + $0xf8] sm:$0xff]  ;;  %v862_v39 = vld [vmem:[%s1636_s20 + $0x70] sm:$0xff] }
  0x3e   : > { %546 = vmatprep.mubr.f32.mxu0 %v1528_v8  ;;  %1230 = vmatmul.mubr.msk.f32.vlgmr.msra.gmra.mrb[0].mxu1 %vm407_vm0, %v421_v49  ;;  %v1374_v38 = vpack.c.bf16 %v879_v37, %v878_v36  ;;  %v863_v40 = vld [vmem:[%s1636_s20 + $0x78] sm:$0xff] }
  0x3f   : > { %669 = vmatprep.mubr.f32.mxu1 %v1528_v8  ;;  %1386 = vmatpush3.bf16.msra.mxu1 %v1348_v63  ;;  %v1376_v41 = vpack.c.bf16 %v863_v40, %v862_v39 }
  0x40   : > { %1379 = vmatprep.subr.bf16.mxu1 %v1350_v2  ;;  %1353 = vmatpush3.bf16.msra.mxu0 %v1352_v5 }
  0x41   : > { %1224 = vmatmul.mubr.msk.f32.gmra.mrb[4].mxu0 %vm407_vm0, %v423_v52 }
  0x42   : > { %552 = vmatprep.mubr.f32.mxu0 %v1528_v8  ;;  %1231 = vmatmul.mubr.msk.f32.gmra.mrb[2].mxu1 %vm407_vm0, %v422_v51 }
  0x43   : > { %675 = vmatprep.mubr.f32.mxu1 %v1528_v8  ;;  %1387 = vmatpush3.bf16.msra.mxu1 %v1352_v5 }
  0x45   : > { %1225 = vmatmul.mubr.msk.f32.gmra.mrb[6].mxu0 %vm407_vm0, %v424_v53 }
  0x46   : > { %558 = vmatprep.mubr.f32.mxu0 %v1528_v8  ;;  %1232 = vmatmul.mubr.msk.f32.gmra.mrb[4].mxu1 %vm407_vm0, %v423_v52 }
  0x47   : > { %681 = vmatprep.mubr.f32.mxu1 %v1528_v8 }
  0x49   : > { %1226 = vmatmul.mubr.msk.f32.gmra.mrb[8].mxu0 %vm407_vm0, %v425_v54 }
  0x4a   : > { %564 = vmatprep.mubr.f32.mxu0 %v1528_v8  ;;  %1233 = vmatmul.mubr.msk.f32.gmra.mrb[6].mxu1 %vm407_vm0, %v424_v53 }
  0x4b   : > { %687 = vmatprep.mubr.f32.mxu1 %v1528_v8 }
  0x4d   : > { %1227 = vmatmul.mubr.msk.f32.gmra.mrb[10].mxu0 %vm407_vm0, %v426_v55 }
  0x4e   : > { %570 = vmatprep.mubr.f32.mxu0 %v1528_v8  ;;  %1234 = vmatmul.mubr.msk.f32.gmra.mrb[8].mxu1 %vm407_vm0, %v425_v54 }
  0x4f   : > { %693 = vmatprep.mubr.f32.mxu1 %v1528_v8 }
  0x51   : > { %1228 = vmatmul.mubr.msk.f32.gmra.mrb[12].mxu0 %vm407_vm0, %v427_v56 }
  0x52   : > { %576 = vmatprep.mubr.f32.mxu0 %v1528_v8  ;;  %1235 = vmatmul.mubr.msk.f32.gmra.mrb[10].mxu1 %vm407_vm0, %v426_v55 }
  0x53   : > { %699 = vmatprep.mubr.f32.mxu1 %v1528_v8 }
  0x55   : > { %1229 = vmatmul.mubr.msk.f32.gmra.mrb[14].mxu0 %vm407_vm0, %v428_v57 }
  0x56   : > { %1236 = vmatmul.mubr.msk.f32.gmra.mrb[12].mxu1 %vm407_vm0, %v427_v56 }
  0x57   : > { %705 = vmatprep.mubr.f32.mxu1 %v1528_v8  ;;  %v1354_v8 = vpack.c.bf16 %v869_v7, %v868_v6 }
  0x59   : > { %1355 = vmatprep.subr.bf16.mxu0 %v1354_v8  ;;  %1380 = vmatprep.subr.bf16.mxu1 %v1354_v8 }
  0x5a   : > { %1237 = vmatmul.mubr.msk.f32.gmra.mrb[14].mxu1 %vm407_vm0, %v428_v57  ;;  %1357 = vmatpush3.bf16.msra.mxu0 %v1356_v11 }
  0x5b   : > { %1388 = vmatpush3.bf16.msra.mxu1 %v1356_v11  ;;  %1359 = vmatprep.subr.bf16.mxu0 %v1358_v14 }
  0x5c   : > { %1381 = vmatprep.subr.bf16.mxu1 %v1358_v14 }
  0x5e   : > { %1361 = vmatpush3.bf16.msra.mxu0 %v1360_v17 }
  0x5f   : > { %1389 = vmatpush3.bf16.msra.mxu1 %v1360_v17  ;;  %1363 = vmatprep.subr.bf16.mxu0 %v1362_v20 }
  0x60   : > { %1382 = vmatprep.subr.bf16.mxu1 %v1362_v20 }
  0x62   : > { %1365 = vmatpush3.bf16.msra.mxu0 %v1364_v23 }
  0x63   : > { %1390 = vmatpush3.bf16.msra.mxu1 %v1364_v23  ;;  %1367 = vmatprep.subr.bf16.mxu0 %v1366_v26 }
  0x64   : > { %1383 = vmatprep.subr.bf16.mxu1 %v1366_v26 }
  0x66   : > { %1369 = vmatpush3.bf16.msra.mxu0 %v1368_v29 }
  0x67   : > { %1391 = vmatpush3.bf16.msra.mxu1 %v1368_v29  ;;  %1371 = vmatprep.subr.bf16.mxu0 %v1370_v32 }
  0x68   : > { %1384 = vmatprep.subr.bf16.mxu1 %v1370_v32 }
  0x6a   : > { %1373 = vmatpush3.bf16.msra.mxu0 %v1372_v35 }
  0x6b   : > { %1392 = vmatpush3.bf16.msra.mxu1 %v1372_v35  ;;  %1375 = vmatprep.subr.bf16.mxu0 %v1374_v38 }
  0x6c   : > { %1385 = vmatprep.subr.bf16.mxu1 %v1374_v38 }
  0x6e   : > { %1377 = vmatpush3.bf16.msra.mxu0 %v1376_v41 }
  0x6f   : > { %1393 = vmatpush3.bf16.msra.mxu1 %v1376_v41 }
 0x10c   : > { %v1743_v42 = vpop.f32.mrb[0].mxu0 }
 0x10d   : > { %v1238_v43 = vmul.f32 -1.442695, %v1743_v42  ;;  %v1746_v44 = vpop.f32.mrb[1].mxu0 }
 0x10e   : > { %v1239_v45 = vmul.f32 -1.442695, %v1746_v44 }
 0x10f   : > { %1422 = vpow2.f32 %v1238_v43 }
 0x110   : > { %1424 = vpow2.f32 %v1239_v45  ;;  %v1749_v46 = vpop.f32.mrb[2].mxu0 }
 0x111   : > { %v1240_v47 = vmul.f32 -1.442695, %v1749_v46  ;;  %v1752_v48 = vpop.f32.mrb[3].mxu0  ;;  %v1755_v50 = vpop.f32.mrb[0].mxu1 }
 0x112   : > { %v1241_v49 = vmul.f32 -1.442695, %v1752_v48  ;;  %v1757_v51 = vpop.f32.mrb[1].mxu1 }
 0x113   : > { %1426 = vpow2.f32 %v1240_v47 }
 0x114   : > { %1428 = vpow2.f32 %v1241_v49  ;;  %v1759_v52 = vpop.f32.mrb[4].mxu0 }
 0x115   : > { %v1242_v53 = vmul.f32 -1.442695, %v1759_v52  ;;  %v1762_v54 = vpop.f32.mrb[5].mxu0  ;;  %v1765_v56 = vpop.f32.mrb[2].mxu1 }
 0x116   : > { %v1243_v55 = vmul.f32 -1.442695, %v1762_v54  ;;  %v1767_v57 = vpop.f32.mrb[3].mxu1 }
 0x117   : > { %1430 = vpow2.f32 %v1242_v53 }
 0x118   : > { %1432 = vpow2.f32 %v1243_v55  ;;  %v1769_v58 = vpop.f32.mrb[6].mxu0 }
 0x119   : > { %v1423_v59 = vpop.eup %1422  ;;  %v1244_v60 = vmul.f32 -1.442695, %v1769_v58  ;;  %v1772_v61 = vpop.f32.mrb[7].mxu0 }
 0x11a   : > { %v1425_v62 = vpop.eup %1424  ;;  %v760_v63 = vadd.f32 1.0, %v1423_v59  ;;  %v1245_v0 = vmul.f32 -1.442695, %v1772_v61  ;;  %v1775_v1 = vpop.f32.mrb[4].mxu1 }
 0x11b   : > { %v761_v2 = vadd.f32 1.0, %v1425_v62  ;;  %1434 = vpow2.f32 %v1244_v60  ;;  %v1777_v3 = vpop.f32.mrb[5].mxu1 }
 0x11c   : > { %1436 = vrcp.f32 %v760_v63  ;;  %v1779_v4 = vpop.f32.mrb[8].mxu0 }
 0x11d   : > { %v1427_v5 = vpop.eup %1426  ;;  %1438 = vrcp.f32 %v761_v2  ;;  %v1246_v6 = vmul.f32 -1.442695, %v1779_v4  ;;  %v1782_v7 = vpop.f32.mrb[9].mxu0 }
 0x11e   : > { %v1429_v8 = vpop.eup %1428  ;;  %v762_v9 = vadd.f32 1.0, %v1427_v5  ;;  %1440 = vpow2.f32 %v1245_v0  ;;  %v1247_v10 = vmul.f32 -1.442695, %v1782_v7  ;;  %v1785_v11 = vpop.f32.mrb[6].mxu1 }
 0x11f   : > { %v763_v12 = vadd.f32 1.0, %v1429_v8  ;;  %1442 = vpow2.f32 %v1246_v6  ;;  %v1787_v13 = vpop.f32.mrb[7].mxu1 }
 0x120   : > { %1444 = vrcp.f32 %v762_v9  ;;  %v1789_v14 = vpop.f32.mrb[10].mxu0 }
 0x121   : > { %v1431_v15 = vpop.eup %1430  ;;  %1446 = vrcp.f32 %v763_v12  ;;  %v1248_v16 = vmul.f32 -1.442695, %v1789_v14  ;;  %v1792_v17 = vpop.f32.mrb[11].mxu0 }
 0x122   : > { %v1433_v18 = vpop.eup %1432  ;;  %v764_v19 = vadd.f32 1.0, %v1431_v15  ;;  %1448 = vpow2.f32 %v1247_v10  ;;  %v1249_v20 = vmul.f32 -1.442695, %v1792_v17  ;;  %v1795_v21 = vpop.f32.mrb[8].mxu1 }
 0x123   : > { %v765_v22 = vadd.f32 1.0, %v1433_v18  ;;  %1450 = vpow2.f32 %v1248_v16  ;;  %v1797_v23 = vpop.f32.mrb[9].mxu1 }
 0x124   : > { %1452 = vrcp.f32 %v764_v19  ;;  %v1799_v24 = vpop.f32.mrb[12].mxu0 }
 0x125   : > { %v1435_v25 = vpop.eup %1434  ;;  %1454 = vrcp.f32 %v765_v22  ;;  %v1250_v26 = vmul.f32 -1.442695, %v1799_v24  ;;  %v1802_v27 = vpop.f32.mrb[13].mxu0 }
 0x126   : > { %v1437_v28 = vpop.eup %1436  ;;  %v766_v29 = vadd.f32 1.0, %v1435_v25  ;;  %1456 = vpow2.f32 %v1249_v20  ;;  %v1251_v30 = vmul.f32 -1.442695, %v1802_v27  ;;  %v1805_v31 = vpop.f32.mrb[10].mxu1 }
 0x127   : > { %v1439_v32 = vpop.eup %1438  ;;  %v808_v33 = vmul.f32 %v1437_v28, %v1743_v42  ;;  %1458 = vpow2.f32 %v1250_v26  ;;  %v1808_v34 = vpop.f32.mrb[11].mxu1 }
 0x128   : > { %v1441_v35 = vpop.eup %1440  ;;  %v809_v36 = vmul.f32 %v1439_v32, %v1746_v44  ;;  %1460 = vrcp.f32 %v766_v29  ;;  %v1811_v37 = vpop.f32.mrb[14].mxu0 }
 0x129   : > { %v1443_v38 = vpop.eup %1442  ;;  %v767_v39 = vadd.f32 1.0, %v1441_v35  ;;  %1462 = vpow2.f32 %v1251_v30  ;;  %v824_v40 = vmul.f32 %v808_v33, %v1755_v50  ;;  %v1252_v41 = vmul.f32 -1.442695, %v1811_v37  ;;  %v1815_v43 = vpop.f32.mrb[15].mxu0 }
 0x12a   : > { %v1445_v45 = vpop.eup %1444  ;;  %v768_v42 = vadd.f32 1.0, %v1443_v38  ;;  %v825_v47 = vmul.f32 %v809_v36, %v1757_v51  ;;  %v1253_v49 = vmul.f32 -1.442695, %v1815_v43  ;;  %v1819_v53 = vpop.f32.mrb[12].mxu1 }
 0x12b   : > { %v1447_v44 = vpop.eup %1446  ;;  %v810_v55 = vmul.f32 %v1445_v45, %v1749_v46  ;;  %1464 = vrcp.f32 %v767_v39  ;;  %v1822_v59 = vpop.f32.mrb[13].mxu1 }
 0x12c   : > { %v1449_v60 = vpop.eup %1448  ;;  %v811_v50 = vmul.f32 %v1447_v44, %v1752_v48  ;;  %1466 = vrcp.f32 %v768_v42  ;;  %944 = vmatprep.mubr.f32.mxu0 %v825_v47 }
 0x12d   : > { %v1451_v62 = vpop.eup %1450  ;;  %v769_v63 = vadd.f32 1.0, %v1449_v60  ;;  %1468 = vpow2.f32 %v1252_v41  ;;  %v826_v51 = vmul.f32 %v810_v55, %v1765_v56  ;;  %945 = vmatmul.mubr.f32.vlgmr.msra.gmra.mrb[16].mxu0 %v824_v40  ;;  %v1827_v46 = vpop.f32.mrb[14].mxu1 }
 0x12e   : > { %v1453_v0 = vpop.eup %1452  ;;  %v770_v2 = vadd.f32 1.0, %v1451_v62  ;;  %1470 = vpow2.f32 %v1253_v49  ;;  %v827_v5 = vmul.f32 %v811_v50, %v1767_v57  ;;  %v709_v48 = vpop.f32.mrb[15].mxu1 }
 0x12f   : > { %v1455_v6 = vpop.eup %1454  ;;  %v812_v8 = vmul.f32 %v1453_v0, %v1759_v52  ;;  %1472 = vrcp.f32 %v769_v63 }
 0x130   : > { %v1457_v9 = vpop.eup %1456  ;;  %v813_v10 = vmul.f32 %v1455_v6, %v1762_v54  ;;  %1474 = vrcp.f32 %v770_v2  ;;  %949 = vmatprep.mubr.f32.mxu0 %v827_v5  ;;  %v843_v5 = vld [vmem:[#allocation2 + $0x18] sm:$0xff] }
 0x131   : > { %v1459_v12 = vpop.eup %1458  ;;  %v771_v56 = vadd.f32 1.0, %v1457_v9  ;;  %v828_v15 = vmul.f32 %v812_v8, %v1775_v1  ;;  %950 = vmatmul.mubr.f32.gmra.mrb[18].mxu0 %v826_v51  ;;  %v844_v9 = vld [vmem:[#allocation2 + $0x20] sm:$0xff] }
 0x132   : > { %v1461_v16 = vpop.eup %1460  ;;  %v772_v18 = vadd.f32 1.0, %v1459_v12  ;;  %v829_v57 = vmul.f32 %v813_v10, %v1777_v3 }
 0x133   : > { %v1463_v19 = vpop.eup %1462  ;;  %v814_v20 = vmul.f32 %v1461_v16, %v1769_v58  ;;  %1476 = vrcp.f32 %v771_v56  ;;  %v845_v16 = vld [vmem:[#allocation2 + $0x28] sm:$0xff] }
 0x134   : > { %1478 = vrcp.f32 %v772_v18  ;;  %v773_v52 = vadd.f32 1.0, %v1463_v19  ;;  %954 = vmatprep.mubr.f32.mxu0 %v829_v57 }
 0x135   : > { %v1465_v22 = vpop.eup %1464  ;;  %v830_v54 = vmul.f32 %v814_v20, %v1785_v11  ;;  %955 = vmatmul.mubr.f32.gmra.mrb[20].mxu0 %v828_v15 }
 0x136   : > { %v1467_v25 = vpop.eup %1466  ;;  %v815_v26 = vmul.f32 %v1465_v22, %v1772_v61  ;;  %1480 = vrcp.f32 %v773_v52  ;;  %v846_v52 = vld [vmem:[#allocation2 + $0x30] sm:$0xff] }
 0x137   : > { %v1469_v1 = vpop.eup %1468  ;;  %v816_v28 = vmul.f32 %v1467_v25, %v1779_v4 }
 0x138   : > { %v1471_v29 = vpop.eup %1470  ;;  %v774_v3 = vadd.f32 1.0, %v1469_v1  ;;  %v831_v30 = vmul.f32 %v815_v26, %v1787_v13  ;;  %v847_v1 = vld [vmem:[#allocation2 + $0x38] sm:$0xff] }
 0x139   : > { %v1473_v58 = vpop.eup %1472  ;;  %v775_v32 = vadd.f32 1.0, %v1471_v29  ;;  %v832_v33 = vmul.f32 %v816_v28, %v1795_v21 }
 0x13a   : > { %v1475_v35 = vpop.eup %1474  ;;  %v817_v36 = vmul.f32 %v1473_v58, %v1782_v7  ;;  %1482 = vrcp.f32 %v774_v3  ;;  %959 = vmatprep.mubr.f32.mxu0 %v831_v30 }
 0x13b   : > { %v818_v11 = vmul.f32 %v1475_v35, %v1789_v14  ;;  %1484 = vrcp.f32 %v775_v32  ;;  %960 = vmatmul.mubr.f32.gmra.mrb[22].mxu0 %v830_v54 }
 0x13c   : > { %v833_v61 = vmul.f32 %v817_v36, %v1797_v23 }
 0x13d   : > { %v1477_v4 = vpop.eup %1476  ;;  %v834_v38 = vmul.f32 %v818_v11, %v1805_v31 }
 0x13e   : > { %v1479_v39 = vpop.eup %1478  ;;  %v819_v13 = vmul.f32 %v1477_v4, %v1792_v17  ;;  %964 = vmatprep.mubr.f32.mxu1 %v833_v61 }
 0x13f   : > { %v820_v21 = vmul.f32 %v1479_v39, %v1799_v24  ;;  %965 = vmatmul.mubr.f32.vlgmr.msra.gmra.mrb[16].mxu1 %v832_v33 }
 0x140   : > { %v1481_v40 = vpop.eup %1480  ;;  %v835_v7 = vmul.f32 %v819_v13, %v1808_v34  ;;  %v840_v34 = vld [vmem:[#allocation2] sm:$0xff] }
 0x141   : > { %v821_v41 = vmul.f32 %v1481_v40, %v1802_v27  ;;  %v836_v14 = vmul.f32 %v820_v21, %v1819_v53 }
 0x142   : > { %969 = vmatprep.mubr.f32.mxu1 %v835_v7 }
 0x143   : > { %v837_v23 = vmul.f32 %v821_v41, %v1822_v59  ;;  %970 = vmatmul.mubr.f32.gmra.mrb[18].mxu1 %v834_v38  ;;  %v841_v59 = vld [vmem:[#allocation2 + $0x8] sm:$0xff] }
 0x144   : > { %v1483_v45 = vpop.eup %1482 }
 0x145   : > { %v1485_v31 = vpop.eup %1484  ;;  %v822_v42 = vmul.f32 %v1483_v45, %v1811_v37  ;;  %974 = vmatprep.mubr.f32.mxu1 %v837_v23 }
 0x146   : > { %v823_v17 = vmul.f32 %v1485_v31, %v1815_v43  ;;  %v842_v43 = vld [vmem:[#allocation2 + $0x10] sm:$0xff] }
 0x147   : > { %v838_v24 = vmul.f32 %v822_v42, %v1827_v46  ;;  %975 = vmatmul.mubr.f32.gmra.mrb[20].mxu1 %v836_v14 }
 0x148   : > { %v839_v47 = vmul.f32 %v823_v17, %v709_v48 }
 0x14a   : > { %979 = vmatprep.mubr.f32.mxu1 %v839_v47 }
 0x14b   : > { %980 = vmatmul.mubr.f32.gmra.mrb[22].mxu1 %v838_v24 }
 0x200   : > { %v1290_v27 = vpop.f32.mrb[16].mxu0 }
 0x201   : > { %v1291_v49 = vpop.f32.mrb[17].mxu0 }
 0x202   : > { %v1292_v53 = vadd.f32 %v1291_v49, %v1290_v27 }
 0x204   : > { %v985_v44 = vadd.f32 %v1292_v53, %v840_v34  ;;  %v1293_v55 = vpop.f32.mrb[18].mxu0 }
 0x205   : > { %v1294_v60 = vpop.f32.mrb[19].mxu0 }
 0x206   : > { %993 = vst.msk [vmem:[#allocation2] sm:$0xff] %vm407_vm0, %v985_v44  ;;  %v1295_v37 = vadd.f32 %v1294_v60, %v1293_v55 }
 0x208   : > { %v986_v50 = vadd.f32 %v1295_v37, %v841_v59  ;;  %v1296_v62 = vpop.f32.mrb[20].mxu0 }
 0x209   : > { %v1297_v63 = vpop.f32.mrb[21].mxu0 }
 0x20a   : > { %994 = vst.msk [vmem:[#allocation2 + $0x8] sm:$0xff] %vm407_vm0, %v986_v50  ;;  %v1298_v51 = vadd.f32 %v1297_v63, %v1296_v62 }
 0x20c   : > { %v987_v0 = vadd.f32 %v1298_v51, %v842_v43 }
 0x20e   : > { %995 = vst.msk [vmem:[#allocation2 + $0x10] sm:$0xff] %vm407_vm0, %v987_v0  ;;  %v1299_v2 = vpop.f32.mrb[22].mxu0 }
 0x20f   : > { %v1300_v46 = vpop.f32.mrb[23].mxu0 }
 0x210   : > { %v1301_v6 = vadd.f32 %v1300_v46, %v1299_v2 }
 0x212   : > { %v988_v8 = vadd.f32 %v1301_v6, %v843_v5  ;;  %v1302_v48 = vpop.f32.mrb[16].mxu1 }
 0x213   : > { %v1303_v10 = vpop.f32.mrb[17].mxu1 }
 0x214   : > { %996 = vst.msk [vmem:[#allocation2 + $0x18] sm:$0xff] %vm407_vm0, %v988_v8  ;;  %v1304_v12 = vadd.f32 %v1303_v10, %v1302_v48 }
 0x216   : > { %v989_v56 = vadd.f32 %v1304_v12, %v844_v9  ;;  %v1305_v15 = vpop.f32.mrb[18].mxu1 }
 0x217   : > { %v1306_v18 = vpop.f32.mrb[19].mxu1 }
 0x218   : > { %997 = vst.msk [vmem:[#allocation2 + $0x20] sm:$0xff] %vm407_vm0, %v989_v56  ;;  %v1307_v57 = vadd.f32 %v1306_v18, %v1305_v15 }
 0x21a   : > { %v990_v19 = vadd.f32 %v1307_v57, %v845_v16  ;;  %v1308_v20 = vpop.f32.mrb[20].mxu1 }
 0x21b   : > { %v1309_v22 = vpop.f32.mrb[21].mxu1 }
 0x21c   : > { %998 = vst.msk [vmem:[#allocation2 + $0x28] sm:$0xff] %vm407_vm0, %v990_v19  ;;  %v1310_v54 = vadd.f32 %v1309_v22, %v1308_v20 }
 0x21e   : > { %v991_v25 = vadd.f32 %v1310_v54, %v846_v52  ;;  %v1311_v26 = vpop.f32.mrb[22].mxu1 }
 0x21f   : > { %v1312_v28 = vpop.f32.mrb[23].mxu1 }
 0x220   : > { %999 = vst.msk [vmem:[#allocation2 + $0x30] sm:$0xff] %vm407_vm0, %v991_v25  ;;  %v1313_v29 = vadd.f32 %v1312_v28, %v1311_v26 }
 0x222   : > { %v992_v3 = vadd.f32 %v1313_v29, %v847_v1 }
 0x224   : > { %1000 = vst.msk [vmem:[#allocation2 + $0x38] sm:$0xff] %vm407_vm0, %v992_v3 }
 0x225 PF: > { %v1014_v30 = vld [vmem:[%s1626_s11 + $0x10] sm:$0xff]  ;;  %v1012_v58 = vld [vmem:[%s1626_s11] sm:$0xff]  ;;  %v1529_v32 = vmov 0   ;;  %v1015_v33 = vld [vmem:[%s1626_s11 + $0x18] sm:$0xff] }
 0x226   : > { %1487 = vset.pattern.permute.xlu1 %v1529_v32  ;;  %1486 = vset.pattern.permute.xlu0 %v1529_v32  ;;  %v1013_v35 = vld [vmem:[%s1626_s11 + $0x8] sm:$0xff]  ;;  %v1016_v11 = vld [vmem:[%s1626_s11 + $0x20] sm:$0xff]  ;;  %v1019_v61 = vld [vmem:[%s1626_s11 + $0x38] sm:$0xff] }
 0x227   : > { %1032 = vperm.xlu1 %1487, %v1014_v30   ;;  %1022 = vperm.xlu0 %1486, %v1012_v58   ;;  %v1017_v36 = vld [vmem:[%s1626_s11 + $0x28] sm:$0xff]  ;;  %v1018_v4 = vld [vmem:[%s1626_s11 + $0x30] sm:$0xff]  ;;  %v1006_v38 = vld [vmem:[#allocation2 + $0x10] sm:$0xff] }
 0x228   : > { %v1004_v39 = vld [vmem:[#allocation2] sm:$0xff]  ;;  %v1007_v41 = vld [vmem:[#allocation2 + $0x18] sm:$0xff]  ;;  %v1005_v14 = vld [vmem:[#allocation2 + $0x8] sm:$0xff] }
 0x229   : > { %v1009_v17 = vld [vmem:[#allocation2 + $0x28] sm:$0xff]  ;;  %v1008_v24 = vld [vmem:[#allocation2 + $0x20] sm:$0xff]  ;;  %v1010_v44 = vld [vmem:[#allocation2 + $0x30] sm:$0xff] }
 0x22b   : > { %1037 = vperm.xlu1 %1487, %v1015_v33   ;;  %1027 = vperm.xlu0 %1486, %v1013_v35   ;;  %v1011_v53 = vld [vmem:[#allocation2 + $0x38] sm:$0xff] }
 0x22f   : > { %1047 = vperm.xlu1 %1487, %v1017_v36   ;;  %1042 = vperm.xlu0 %1486, %v1016_v11  }
 0x233   : > { %1057 = vperm.xlu1 %1487, %v1019_v61   ;;  %1052 = vperm.xlu0 %1486, %v1018_v4  }
 0x2a6   : > { %v1033_v13 = vpop.permute.xlu1 %1032  ;;  %v1023_v21 = vpop.permute.xlu0 %1022 }
 0x2a7   : > { %v1062_v40 = vmul.f32 %v1033_v13, %v1006_v38  ;;  %v1060_v7 = vmul.f32 %v1023_v21, %v1004_v39 }
 0x2a9   : > { %1071 = vst.msk [vmem:[%s1631_s16 + $0x10] sm:$0xff] %vm407_vm0, %v1062_v40  ;;  %1069 = vst.msk [vmem:[%s1631_s16] sm:$0xff] %vm407_vm0, %v1060_v7 }
 0x2aa   : > { %v1038_v23 = vpop.permute.xlu1 %1037  ;;  %v1028_v45 = vpop.permute.xlu0 %1027 }
 0x2ab   : > { %v1063_v31 = vmul.f32 %v1038_v23, %v1007_v41  ;;  %v1061_v42 = vmul.f32 %v1028_v45, %v1005_v14 }
 0x2ad   : > { %1072 = vst.msk [vmem:[%s1631_s16 + $0x18] sm:$0xff] %vm407_vm0, %v1063_v31  ;;  %1070 = vst.msk [vmem:[%s1631_s16 + $0x8] sm:$0xff] %vm407_vm0, %v1061_v42 }
 0x2ae   : > { %v1048_v47 = vpop.permute.xlu1 %1047  ;;  %v1043_v27 = vpop.permute.xlu0 %1042 }
 0x2af   : > { %v1065_v34 = vmul.f32 %v1048_v47, %v1009_v17  ;;  %v1064_v49 = vmul.f32 %v1043_v27, %v1008_v24 }
 0x2b1   : > { %1074 = vst.msk [vmem:[%s1631_s16 + $0x28] sm:$0xff] %vm407_vm0, %v1065_v34  ;;  %1073 = vst.msk [vmem:[%s1631_s16 + $0x20] sm:$0xff] %vm407_vm0, %v1064_v49 }
 0x2b2   : > { %v1058_v55 = vpop.permute.xlu1 %1057  ;;  %v1053_v59 = vpop.permute.xlu0 %1052 }
 0x2b3   : > { %v1067_v60 = vmul.f32 %v1058_v55, %v1011_v53  ;;  %v1066_v37 = vmul.f32 %v1053_v59, %v1010_v44 }
 0x2b5   : > { %1076 = vst.msk [vmem:[%s1631_s16 + $0x38] sm:$0xff] %vm407_vm0, %v1067_v60  ;;  %1075 = vst.msk [vmem:[%s1631_s16 + $0x30] sm:$0xff] %vm407_vm0, %v1066_v37 }
 0x2b6 PF: > { %s24_s9 = sadd.s32 1, %s1524_s9   ;;  %s1901_s8 = smov %s1520_s0 }
 0x2b7   : > { %p21_p0 = scmp.ge.s32.totalorder %s24_s9, 15   ;;  %s1902_s0 = smov %s1904_s1 }
 0x2b9   :  { %23 = sbr.rel (!%p21_p0) target bundleno = 17 (0x11), region = 94 }

</bundles_post_ra>
